<compile_context>
chip_gen: v7x
topology: tpu7x:2x2x1
jax: 0.10.0
libtpu: 0.0.40
codegen_flags: <defaults>
</compile_context>

<pallas_src>
import functools

import numpy as np
import jax
import jax.numpy as jnp
from jax.experimental import pallas as pl
from jax.experimental.pallas import tpu as pltpu


# --------------------------------------------------------------------------------------
# helpers
# --------------------------------------------------------------------------------------
def get_sinusoid_encoding_table(n_position, d_hid, padding_idx=None):
    """Sinusoid position encoding table (same as the torch helper)."""
    def cal_angle(position, hid_idx):
        return position / np.power(10000, 2 * (hid_idx // 2) / d_hid)

    table = np.array([[cal_angle(p, j) for j in range(d_hid)] for p in range(n_position)],
                     dtype=np.float64)
    table[:, 0::2] = np.sin(table[:, 0::2])
    table[:, 1::2] = np.cos(table[:, 1::2])
    if padding_idx is not None:
        table[padding_idx] = 0.0
    return jnp.asarray(table, dtype=jnp.float32)


def _layer_norm(x, gamma, beta, eps=1e-5):
    mu = jnp.mean(x, axis=-1, keepdims=True)
    var = jnp.mean((x - mu) ** 2, axis=-1, keepdims=True)
    return (x - mu) * jax.lax.rsqrt(var + eps) * gamma + beta


def _pick_batch_block(bs, seq_len, target_rows=512):
    """Largest divisor d of bs with d*seq_len <= target_rows, preferring bs//d >= 2
    (so the 'parallel' batch axis can shard across both v7x TensorCores) and row
    blocks that satisfy the (8, 128) sublane constraint."""
    cands = []
    for d in range(1, bs + 1):
        if bs % d:
            continue
        nb = bs // d
        rows = d * seq_len
        if nb > 1 and rows % 8 != 0:          # row blocks must be sublane aligned
            continue
        cands.append((rows <= target_rows, nb >= 2, rows, d))
    cands.sort()
    return cands[-1][3] if cands else bs


def _build_additive_mask(b_block, seq_len, use_full_attention):
    """Shared additive mask (N, N), N = b_block*seq_len: causal (subsequent) mask
    within each batch of the block, -1e30 on all cross-batch pairs (block-diagonal).
    Every row keeps its diagonal unmasked, so softmax never sees a fully-masked row."""
    N = b_block * seq_len
    b_ids = np.repeat(np.arange(b_block), seq_len)
    t_ids = np.tile(np.arange(seq_len), b_block)
    masked = b_ids[None, :] != b_ids[:, None]
    if not use_full_attention:
        masked = masked | (t_ids[None, :] > t_ids[:, None])
    return jnp.asarray(np.where(masked, -1e30, 0.0).astype(np.float32)).reshape(N, N)


# --------------------------------------------------------------------------------------
# fused kernel: (embed at l==0) + DecoderLayer l, activation resident across layers
# --------------------------------------------------------------------------------------
def fused_decoder_kernel(n_head, d_k, d_v, mm_dtype,
                         x_ref, pos_ref, mask_ref, ws_ref, bs_ref,
                         wq_ref, bq_ref, wk_ref, bk_ref, wv_ref, bv_ref,
                         wfc_ref, bfc_ref, ln1g_ref, ln1b_ref,
                         w1_ref, b1_ref, w2_ref, b2_ref, ln2g_ref, ln2b_ref,
                         out_ref):
    f32 = jnp.float32
    H, dk, dv = n_head, d_k, d_v
    l = pl.program_id(1)

    # ---- l == 0: fused start_conv (k=1 Conv1d == Linear) + positional embedding -----
    @pl.when(l == 0)
    def _():
        xin = x_ref[...].astype(mm_dtype)
        emb = jnp.dot(xin, ws_ref[...], preferred_element_type=f32)
        out_ref[...] = emb + bs_ref[...] + pos_ref[...]

    x = out_ref[...]                                    # (N, D) resident activations
    xm = x.astype(mm_dtype)

    # ---- MHA: fused big-M QKV projections (full MXU lane width, pre-transposed W) ---
    q = jnp.dot(xm, wq_ref[...], preferred_element_type=f32) + bq_ref[...]
    k = jnp.dot(xm, wk_ref[...], preferred_element_type=f32) + bk_ref[...]
    v = jnp.dot(xm, wv_ref[...], preferred_element_type=f32) + bv_ref[...]

    # heads -> leading batch axis with H static lane slices (Mosaic has no minor-dim
    # reshape/transpose); everything below is head-batched (single dot_general each).
    def heads(t, dh):
        return jnp.stack([t[:, h * dh:(h + 1) * dh] for h in range(H)], axis=0)

    qh = heads(q, dk).astype(mm_dtype)                  # (H, N, dk)
    kh = heads(k, dk).astype(mm_dtype)
    vh = heads(v, dv).astype(mm_dtype)

    inv_temp = 1.0 / float(np.sqrt(dk))
    s = jnp.einsum("hqd,hkd->hqk", qh, kh, preferred_element_type=f32) * inv_temp
    s = s + mask_ref[...][None]                         # additive causal + block-diag mask
    m = jnp.max(s, axis=-1, keepdims=True)
    e = jnp.exp(s - m)
    p = e * pl.reciprocal(jnp.sum(e, axis=-1, keepdims=True), approx=True)   # (H, N, N)

    av = jnp.einsum("hqk,hkd->hqd", p.astype(mm_dtype), vh,
                    preferred_element_type=f32)          # (H, N, d_v)
    # fc folded per head (one batched matmul against (H, d_v, D)) + head sum
    ctx = jnp.einsum("hqv,hvd->hqd", av.astype(mm_dtype), wfc_ref[...],
                     preferred_element_type=f32)         # (H, N, D)
    o = ctx[0]
    for h in range(1, H):                                # leading-axis head reduction
        o = o + ctx[h]
    o = o + bfc_ref[...]

    o = _layer_norm(o + x, ln1g_ref[...], ln1b_ref[...])
    # NOTE: self_attn_padding_mask is all-ones in PerStepDecoder -> multiply dropped.

    # ---- position-wise feed forward (Conv1d k=1 == Linear) ---------------------------
    h1 = jnp.maximum(
        jnp.dot(o.astype(mm_dtype), w1_ref[...], preferred_element_type=f32) + b1_ref[...],
        0.0)
    h2 = jnp.dot(h1.astype(mm_dtype), w2_ref[...], preferred_element_type=f32) + b2_ref[...]
    out_ref[...] = _layer_norm(h2 + o, ln2g_ref[...], ln2b_ref[...])


# --------------------------------------------------------------------------------------
# host-side weight prep: transpose, stack along a leading layer axis, cast to mm dtype
# --------------------------------------------------------------------------------------
def prepare_stacked_params(params, n_head, d_k, d_v, mm_dtype):
    layers = params["layers"]
    d_model = params["ws"].shape[0]
    row = lambda a: a.reshape(1, -1)

    def stack(fn, dtype=None):
        a = jnp.stack([fn(lp) for lp in layers], axis=0)
        return a.astype(dtype) if dtype is not None else a

    return dict(
        wq=stack(lambda lp: lp["wq"].T, mm_dtype),                                # (NL, D, H*dk)
        bq=stack(lambda lp: row(lp["bq"])),                                       # (NL, 1, H*dk)
        wk=stack(lambda lp: lp["wk"].T, mm_dtype),
        bk=stack(lambda lp: row(lp["bk"])),
        wv=stack(lambda lp: lp["wv"].T, mm_dtype),
        bv=stack(lambda lp: row(lp["bv"])),
        wfc=stack(lambda lp: lp["wfc"].T.reshape(n_head, d_v, d_model), mm_dtype),  # (NL,H,dv,D)
        bfc=stack(lambda lp: row(lp["bfc"])),
        ln1g=stack(lambda lp: row(lp["ln1_g"])),
        ln1b=stack(lambda lp: row(lp["ln1_b"])),
        w1=stack(lambda lp: lp["w1"].T, mm_dtype),
        b1=stack(lambda lp: row(lp["b1"])),
        w2=stack(lambda lp: lp["w2"].T, mm_dtype),
        b2=stack(lambda lp: row(lp["b2"])),
        ln2g=stack(lambda lp: row(lp["ln2_g"])),
        ln2b=stack(lambda lp: row(lp["ln2_b"])),
    )


_WEIGHT_ORDER = ("wq", "bq", "wk", "bk", "wv", "bv", "wfc", "bfc",
                 "ln1g", "ln1b", "w1", "b1", "w2", "b2", "ln2g", "ln2b")


# --------------------------------------------------------------------------------------
# PerStepDecoder forward (given the accumulated decoder_input state)
# --------------------------------------------------------------------------------------
def per_step_decoder_forward(decoder_input, params, *, n_head, d_k, d_v,
                             use_full_attention=False, matmul_dtype=jnp.bfloat16,
                             target_rows=512):
    """decoder_input: (bs, d_feats, seq_len) accumulated per-step inputs.
    Returns (dec_output[:, -1, :], dec_output)."""
    bs_, d_feats, L = decoder_input.shape
    d_model = params["ws"].shape[0]
    n_layers = len(params["layers"])
    b_block = _pick_batch_block(bs_, L, target_rows)
    nb = bs_ // b_block
    BL = b_block * L
    total_rows = bs_ * L

    # host-side prep (all layout plumbing outside the kernel)
    x_in = jnp.swapaxes(decoder_input, 1, 2).reshape(total_rows, d_feats)
    pos_tiled = jnp.tile(params["pos_table"][1:L + 1], (b_block, 1))       # (BL, D)
    mask = _build_additive_mask(b_block, L, use_full_attention)            # (BL, BL)
    ws_t = params["ws"].T.astype(matmul_dtype)                             # (d_feats, D)
    bsr = params["bs"].reshape(1, -1)
    stk = prepare_stacked_params(params, n_head, d_k, d_v, matmul_dtype)
    weights = [stk[k] for k in _WEIGHT_ORDER]

    def build_call(single_buffer_consts):
        def cspec(a):
            nd = a.ndim
            idx = lambda ib, l, _nd=nd: (0,) * _nd
            if single_buffer_consts:
                return pl.BlockSpec(a.shape, idx, pipeline_mode=pl.Buffered(1))
            return pl.BlockSpec(a.shape, idx)

        def wspec(a):
            nd = a.ndim
            return pl.BlockSpec((None,) + a.shape[1:],
                                lambda ib, l, _nd=nd: (l,) + (0,) * (_nd - 1))

        in_specs = ([pl.BlockSpec((BL, d_feats), lambda ib, l: (ib, 0)),
                     cspec(pos_tiled), cspec(mask), cspec(ws_t), cspec(bsr)]
                    + [wspec(w) for w in weights])
        out_specs = pl.BlockSpec((BL, d_model), lambda ib, l: (ib, 0))

        # VMEM budget from the actual block footprint (+ intermediates / headroom)
        const_bytes = sum(int(np.prod(a.shape)) * a.dtype.itemsize
                          for a in (pos_tiled, mask, ws_t, bsr))
        layer_bytes = sum(int(np.prod(w.shape[1:])) * w.dtype.itemsize for w in weights)
        act_bytes = BL * (d_feats + d_model) * 4
        interm = 4 * (n_head * BL * BL + 8 * BL * d_model)
        vmem_limit = int(min(max(3 * (const_bytes + layer_bytes + act_bytes) + 4 * interm,
                                 32 << 20), 64 << 20))

        kern = functools.partial(fused_decoder_kernel, n_head, d_k, d_v, matmul_dtype)
        return pl.pallas_call(
            kern,
            grid=(nb, n_layers),
            in_specs=in_specs,
            out_specs=out_specs,
            out_shape=jax.ShapeDtypeStruct((total_rows, d_model), jnp.float32),
            compiler_params=pltpu.CompilerParams(
                dimension_semantics=("parallel", "arbitrary"),
                vmem_limit_bytes=vmem_limit),
        )

    args = (x_in, pos_tiled, mask, ws_t, bsr, *weights)
    out2d = None
    last_exc = None
    for single_buf in (True, False):     # fall back if Buffered(1) constants unsupported
        try:
            out2d = jax.block_until_ready(build_call(single_buf)(*args))
            break
        except Exception as e:           # pragma: no cover - robustness fallback
            last_exc = e
            out2d = None
    if out2d is None:
        raise last_exc

    dec_out = out2d.reshape(bs_, L, d_model)
    return dec_out[:, -1, :], dec_out


# --------------------------------------------------------------------------------------
# pure-JAX reference (mirrors the torch forward; dropout = identity).
# cast_dtype emulates the kernel's bf16 matmul-operand casts for tight comparison.
# --------------------------------------------------------------------------------------
def reference_per_step_decoder(decoder_input, params, *, n_head, d_k, d_v,
                               use_full_attention=False, cast_dtype=None):
    def mm(a, b):
        if cast_dtype is not None:
            a, b = a.astype(cast_dtype), b.astype(cast_dtype)
        return jnp.dot(a, b, preferred_element_type=jnp.float32)

    cc = (lambda a: a) if cast_dtype is None else (lambda a: a.astype(cast_dtype))

    bs_, d_feats, L = decoder_input.shape
    d_model = params["ws"].shape[0]
    x2d = jnp.swapaxes(decoder_input, 1, 2).reshape(bs_ * L, d_feats)
    x = mm(x2d, params["ws"].T).reshape(bs_, L, d_model) + params["bs"]
    x = x + params["pos_table"][1:L + 1][None]
    time_mask = None if use_full_attention else jnp.triu(jnp.ones((L, L), bool), k=1)

    for lp in params["layers"]:
        residual = x
        q = mm(x.reshape(-1, d_model), lp["wq"].T).reshape(bs_, L, -1) + lp["bq"]
        k = mm(x.reshape(-1, d_model), lp["wk"].T).reshape(bs_, L, -1) + lp["bk"]
        v = mm(x.reshape(-1, d_model), lp["wv"].T).reshape(bs_, L, -1) + lp["bv"]
        q = q.reshape(bs_, L, n_head, d_k).transpose(2, 0, 1, 3).reshape(n_head * bs_, L, d_k)
        k = k.reshape(bs_, L, n_head, d_k).transpose(2, 0, 1, 3).reshape(n_head * bs_, L, d_k)
        v = v.reshape(bs_, L, n_head, d_v).transpose(2, 0, 1, 3).reshape(n_head * bs_, L, d_v)
        s = jnp.einsum("xqd,xkd->xqk", cc(q), cc(k),
                       preferred_element_type=jnp.float32) / np.sqrt(d_k)
        if time_mask is not None:
            s = jnp.where(time_mask[None], -jnp.inf, s)
        mmax = jnp.max(s, axis=-1, keepdims=True)
        e = jnp.exp(s - mmax)
        p = e / jnp.sum(e, axis=-1, keepdims=True)
        av = jnp.einsum("xqk,xkd->xqd", cc(p), cc(v), preferred_element_type=jnp.float32)
        av = av.reshape(n_head, bs_, L, d_v).transpose(1, 2, 0, 3).reshape(bs_, L, n_head * d_v)
        o = mm(av.reshape(bs_ * L, -1), lp["wfc"].T).reshape(bs_, L, -1) + lp["bfc"]
        o = _layer_norm(o + residual, lp["ln1_g"], lp["ln1_b"])
        # padding mask is all-ones -> identity
        residual = o
        h1 = jnp.maximum(mm(o.reshape(bs_ * L, -1), lp["w1"].T).reshape(bs_, L, -1) + lp["b1"], 0.0)
        h2 = mm(h1.reshape(bs_ * L, -1), lp["w2"].T).reshape(bs_, L, -1) + lp["b2"]
        x = _layer_norm(h2 + residual, lp["ln2_g"], lp["ln2_b"])
    return x[:, -1, :], x


# --------------------------------------------------------------------------------------
# parameter init + test
# --------------------------------------------------------------------------------------
def init_params(key, d_feats, d_model, n_layers, n_head, d_k, d_v, max_timesteps):
    f32 = jnp.float32
    keys = jax.random.split(key, 2 + n_layers)
    params = {
        "ws": jax.random.normal(keys[0], (d_model, d_feats), f32) / np.sqrt(d_feats),
        "bs": 0.02 * jax.random.normal(keys[1], (d_model,), f32),
        "pos_table": get_sinusoid_encoding_table(max_timesteps + 1, d_model, padding_idx=0),
        "layers": [],
    }
    std_qk = np.sqrt(2.0 / (d_model + d_k))
    std_v = np.sqrt(2.0 / (d_model + d_v))
    std_fc = np.sqrt(2.0 / (d_model + n_head * d_v))
    for li in range(n_layers):
        ks = jax.random.split(keys[2 + li], 16)
        lp = {
            "wq": std_qk * jax.random.normal(ks[0], (n_head * d_k, d_model), f32),
            "bq": 0.02 * jax.random.normal(ks[1], (n_head * d_k,), f32),
            "wk": std_qk * jax.random.normal(ks[2], (n_head * d_k, d_model), f32),
            "bk": 0.02 * jax.random.normal(ks[3], (n_head * d_k,), f32),
            "wv": std_v * jax.random.normal(ks[4], (n_head * d_v, d_model), f32),
            "bv": 0.02 * jax.random.normal(ks[5], (n_head * d_v,), f32),
            "wfc": std_fc * jax.random.normal(ks[6], (d_model, n_head * d_v), f32),
            "bfc": 0.02 * jax.random.normal(ks[7], (d_model,), f32),
            "ln1_g": 1.0 + 0.1 * jax.random.normal(ks[8], (d_model,), f32),
            "ln1_b": 0.1 * jax.random.normal(ks[9], (d_model,), f32),
            "w1": jax.random.normal(ks[10], (d_model, d_model), f32) / np.sqrt(d_model),
            "b1": 0.02 * jax.random.normal(ks[11], (d_model,), f32),
            "w2": jax.random.normal(ks[12], (d_model, d_model), f32) / np.sqrt(d_model),
            "b2": 0.02 * jax.random.normal(ks[13], (d_model,), f32),
            "ln2_g": 1.0 + 0.1 * jax.random.normal(ks[14], (d_model,), f32),
            "ln2_b": 0.1 * jax.random.normal(ks[15], (d_model,), f32),
        }
        params["layers"].append(lp)
    return params


def _max_err(a, b):
    a = np.asarray(a, np.float64)
    b = np.asarray(b, np.float64)
    return float(np.max(np.abs(a - b) / (1.0 + np.abs(b))))


if __name__ == "__main__":
    bs, d_feats, seq_len = 4, 16, 8
    d_model, n_layers, n_head, d_k, d_v = 32, 2, 4, 8, 8
    max_timesteps = 20

    key = jax.random.PRNGKey(0)
    pkey, xkey = jax.random.split(key)
    params = init_params(pkey, d_feats, d_model, n_layers, n_head, d_k, d_v, max_timesteps)

    # accumulated decoder_input after `seq_len` per-step calls: (bs, d_feats, seq_len)
    decoder_input = jax.random.normal(xkey, (bs, d_feats, seq_len), jnp.float32)

    # --- bf16-MXU path (production path for v6e / v7x) ---------------------------------
    last_bf, full_bf = per_step_decoder_forward(decoder_input, params,
                                                n_head=n_head, d_k=d_k, d_v=d_v,
                                                matmul_dtype=jnp.bfloat16)
    last_bf, full_bf = jax.block_until_ready((last_bf, full_bf))

    # tight check vs. a reference that applies the identical bf16 operand casts
    ref_last_emu, ref_full_emu = reference_per_step_decoder(
        decoder_input, params, n_head=n_head, d_k=d_k, d_v=d_v, cast_dtype=jnp.bfloat16)
    np.testing.assert_allclose(np.asarray(full_bf), np.asarray(ref_full_emu),
                               rtol=2e-2, atol=2e-2)
    np.testing.assert_allclose(np.asarray(last_bf), np.asarray(ref_last_emu),
                               rtol=2e-2, atol=2e-2)

    # coarse structural sanity check vs. the torch-faithful f32 reference
    ref_last_f32, ref_full_f32 = reference_per_step_decoder(
        decoder_input, params, n_head=n_head, d_k=d_k, d_v=d_v, cast_dtype=None)
    np.testing.assert_allclose(np.asarray(full_bf), np.asarray(ref_full_f32),
                               rtol=1e-1, atol=1e-1)

    # --- f32 path (v5e-style parity; same kernel, casts are no-ops) --------------------
    last_f, full_f = per_step_decoder_forward(decoder_input, params,
                                              n_head=n_head, d_k=d_k, d_v=d_v,
                                              matmul_dtype=jnp.float32)
    last_f, full_f = jax.block_until_ready((last_f, full_f))
    # close to whichever matmul precision the hardware delivers for f32 operands
    err = min(_max_err(full_f, ref_full_f32), _max_err(full_f, ref_full_emu))
    assert err < 2e-2, f"f32-path mismatch: {err}"

    print("KERNEL_OK")
</pallas_src>

<mosaic_0001>
module attributes {stable_mosaic.version = 11 : i64} {
  func.func @fused_decoder_kernel(%arg0: i32, %arg1: i32, %arg2: memref<16x16xf32, #tpu.memory_space<vmem>>, %arg3: memref<16x32xf32, #tpu.memory_space<vmem>>, %arg4: memref<16x16xf32, #tpu.memory_space<vmem>>, %arg5: memref<16x32xbf16, #tpu.memory_space<vmem>>, %arg6: memref<1x32xf32, #tpu.memory_space<vmem>>, %arg7: memref<1x32x32xbf16, #tpu.memory_space<vmem>>, %arg8: memref<1x1x32xf32, #tpu.memory_space<vmem>>, %arg9: memref<1x32x32xbf16, #tpu.memory_space<vmem>>, %arg10: memref<1x1x32xf32, #tpu.memory_space<vmem>>, %arg11: memref<1x32x32xbf16, #tpu.memory_space<vmem>>, %arg12: memref<1x1x32xf32, #tpu.memory_space<vmem>>, %arg13: memref<1x4x8x32xbf16, #tpu.memory_space<vmem>>, %arg14: memref<1x1x32xf32, #tpu.memory_space<vmem>>, %arg15: memref<1x1x32xf32, #tpu.memory_space<vmem>>, %arg16: memref<1x1x32xf32, #tpu.memory_space<vmem>>, %arg17: memref<1x32x32xbf16, #tpu.memory_space<vmem>>, %arg18: memref<1x1x32xf32, #tpu.memory_space<vmem>>, %arg19: memref<1x32x32xbf16, #tpu.memory_space<vmem>>, %arg20: memref<1x1x32xf32, #tpu.memory_space<vmem>>, %arg21: memref<1x1x32xf32, #tpu.memory_space<vmem>>, %arg22: memref<1x1x32xf32, #tpu.memory_space<vmem>>, %arg23: memref<16x32xf32, #tpu.memory_space<vmem>>) attributes {dimension_semantics = [#tpu.dimension_semantics<parallel>, #tpu.dimension_semantics<arbitrary>], iteration_bounds = array<i64: 2, 2>, scalar_prefetch = 0 : i64, scratch_operands = 0 : i64, tpu.core_type = #tpu.core_type<tc>, window_params = [{transform_indices = @transform_0, window_bounds = array<i64: 16, 16>}, {pipeline_mode = #tpu.pipeline_mode<synchronous>, transform_indices = @transform_1, window_bounds = array<i64: 16, 32>}, {pipeline_mode = #tpu.pipeline_mode<synchronous>, transform_indices = @transform_2, window_bounds = array<i64: 16, 16>}, {pipeline_mode = #tpu.pipeline_mode<synchronous>, transform_indices = @transform_3, window_bounds = array<i64: 16, 32>}, {pipeline_mode = #tpu.pipeline_mode<synchronous>, transform_indices = @transform_4, window_bounds = array<i64: 1, 32>}, {transform_indices = @transform_5, window_bounds = array<i64: 1, 32, 32>}, {transform_indices = @transform_6, window_bounds = array<i64: 1, 1, 32>}, {transform_indices = @transform_7, window_bounds = array<i64: 1, 32, 32>}, {transform_indices = @transform_8, window_bounds = array<i64: 1, 1, 32>}, {transform_indices = @transform_9, window_bounds = array<i64: 1, 32, 32>}, {transform_indices = @transform_10, window_bounds = array<i64: 1, 1, 32>}, {transform_indices = @transform_11, window_bounds = array<i64: 1, 4, 8, 32>}, {transform_indices = @transform_12, window_bounds = array<i64: 1, 1, 32>}, {transform_indices = @transform_13, window_bounds = array<i64: 1, 1, 32>}, {transform_indices = @transform_14, window_bounds = array<i64: 1, 1, 32>}, {transform_indices = @transform_15, window_bounds = array<i64: 1, 32, 32>}, {transform_indices = @transform_16, window_bounds = array<i64: 1, 1, 32>}, {transform_indices = @transform_17, window_bounds = array<i64: 1, 32, 32>}, {transform_indices = @transform_18, window_bounds = array<i64: 1, 1, 32>}, {transform_indices = @transform_19, window_bounds = array<i64: 1, 1, 32>}, {transform_indices = @transform_20, window_bounds = array<i64: 1, 1, 32>}, {transform_indices = @transform_21, window_bounds = array<i64: 16, 32>}]} {
    %c0_i32 = arith.constant 0 : i32
    %0 = arith.cmpi eq, %arg1, %c0_i32 : i32
    %1 = arith.extui %0 : i1 to i32
    %c0_i32_0 = arith.constant 0 : i32
    %2 = arith.cmpi ne, %1, %c0_i32_0 : i32
    scf.if %2 {
      %c0_76 = arith.constant 0 : index
      %c0_77 = arith.constant 0 : index
      %167 = vector.load %arg2[%c0_76, %c0_77] : memref<16x16xf32, #tpu.memory_space<vmem>>, vector<16x16xf32>
      %168 = arith.truncf %167 : vector<16x16xf32> to vector<16x16xbf16>
      %c0_78 = arith.constant 0 : index
      %c0_79 = arith.constant 0 : index
      %169 = vector.load %arg5[%c0_78, %c0_79] : memref<16x32xbf16, #tpu.memory_space<vmem>>, vector<16x32xbf16>
      %cst_80 = arith.constant dense<0.000000e+00> : vector<16x32xf32>
      %170 = tpu.matmul %168, %169, %cst_80 {dimension_numbers = #tpu.dot_dimension_numbers<[1], [0], [0], [1], [0, 0, 1, 1], [], []>} : vector<16x16xbf16>, vector<16x32xbf16>, vector<16x32xf32> -> vector<16x32xf32>
      %c0_81 = arith.constant 0 : index
      %c0_82 = arith.constant 0 : index
      %171 = vector.load %arg6[%c0_81, %c0_82] : memref<1x32xf32, #tpu.memory_space<vmem>>, vector<1x32xf32>
      %172 = vector.broadcast %171 : vector<1x32xf32> to vector<16x32xf32>
      %173 = arith.addf %170, %172 : vector<16x32xf32>
      %c0_83 = arith.constant 0 : index
      %c0_84 = arith.constant 0 : index
      %174 = vector.load %arg3[%c0_83, %c0_84] : memref<16x32xf32, #tpu.memory_space<vmem>>, vector<16x32xf32>
      %175 = arith.addf %173, %174 : vector<16x32xf32>
      %c0_85 = arith.constant 0 : index
      %c0_86 = arith.constant 0 : index
      %176 = vector.load %arg23[%c0_85, %c0_86] : memref<16x32xf32, #tpu.memory_space<vmem>>, vector<16x32xf32>
      tpu.vector_store %arg23[%c0_85, %c0_86], %175 {strides = array<i32>} : memref<16x32xf32, #tpu.memory_space<vmem>>, vector<16x32xf32>,
    } else {
    }
    %c0 = arith.constant 0 : index
    %c0_1 = arith.constant 0 : index
    %3 = vector.load %arg23[%c0, %c0_1] : memref<16x32xf32, #tpu.memory_space<vmem>>, vector<16x32xf32>
    %4 = arith.truncf %3 : vector<16x32xf32> to vector<16x32xbf16>
    %c0_2 = arith.constant 0 : index
    %c0_3 = arith.constant 0 : index
    %c0_4 = arith.constant 0 : index
    %5 = vector.load %arg7[%c0_2, %c0_3, %c0_4] : memref<1x32x32xbf16, #tpu.memory_space<vmem>>, vector<1x32x32xbf16>
    %6 = vector.shape_cast %5 : vector<1x32x32xbf16> to vector<32x32xbf16>
    %cst = arith.constant dense<0.000000e+00> : vector<16x32xf32>
    %7 = tpu.matmul %4, %6, %cst {dimension_numbers = #tpu.dot_dimension_numbers<[1], [0], [0], [1], [0, 0, 1, 1], [], []>} : vector<16x32xbf16>, vector<32x32xbf16>, vector<16x32xf32> -> vector<16x32xf32>
    %c0_5 = arith.constant 0 : index
    %c0_6 = arith.constant 0 : index
    %c0_7 = arith.constant 0 : index
    %8 = vector.load %arg8[%c0_5, %c0_6, %c0_7] : memref<1x1x32xf32, #tpu.memory_space<vmem>>, vector<1x1x32xf32>
    %9 = vector.shape_cast %8 : vector<1x1x32xf32> to vector<1x32xf32>
    %10 = vector.broadcast %9 : vector<1x32xf32> to vector<16x32xf32>
    %11 = arith.addf %7, %10 : vector<16x32xf32>
    %c0_8 = arith.constant 0 : index
    %c0_9 = arith.constant 0 : index
    %c0_10 = arith.constant 0 : index
    %12 = vector.load %arg9[%c0_8, %c0_9, %c0_10] : memref<1x32x32xbf16, #tpu.memory_space<vmem>>, vector<1x32x32xbf16>
    %13 = vector.shape_cast %12 : vector<1x32x32xbf16> to vector<32x32xbf16>
    %cst_11 = arith.constant dense<0.000000e+00> : vector<16x32xf32>
    %14 = tpu.matmul %4, %13, %cst_11 {dimension_numbers = #tpu.dot_dimension_numbers<[1], [0], [0], [1], [0, 0, 1, 1], [], []>} : vector<16x32xbf16>, vector<32x32xbf16>, vector<16x32xf32> -> vector<16x32xf32>
    %c0_12 = arith.constant 0 : index
    %c0_13 = arith.constant 0 : index
    %c0_14 = arith.constant 0 : index
    %15 = vector.load %arg10[%c0_12, %c0_13, %c0_14] : memref<1x1x32xf32, #tpu.memory_space<vmem>>, vector<1x1x32xf32>
    %16 = vector.shape_cast %15 : vector<1x1x32xf32> to vector<1x32xf32>
    %17 = vector.broadcast %16 : vector<1x32xf32> to vector<16x32xf32>
    %18 = arith.addf %14, %17 : vector<16x32xf32>
    %c0_15 = arith.constant 0 : index
    %c0_16 = arith.constant 0 : index
    %c0_17 = arith.constant 0 : index
    %19 = vector.load %arg11[%c0_15, %c0_16, %c0_17] : memref<1x32x32xbf16, #tpu.memory_space<vmem>>, vector<1x32x32xbf16>
    %20 = vector.shape_cast %19 : vector<1x32x32xbf16> to vector<32x32xbf16>
    %cst_18 = arith.constant dense<0.000000e+00> : vector<16x32xf32>
    %21 = tpu.matmul %4, %20, %cst_18 {dimension_numbers = #tpu.dot_dimension_numbers<[1], [0], [0], [1], [0, 0, 1, 1], [], []>} : vector<16x32xbf16>, vector<32x32xbf16>, vector<16x32xf32> -> vector<16x32xf32>
    %c0_19 = arith.constant 0 : index
    %c0_20 = arith.constant 0 : index
    %c0_21 = arith.constant 0 : index
    %22 = vector.load %arg12[%c0_19, %c0_20, %c0_21] : memref<1x1x32xf32, #tpu.memory_space<vmem>>, vector<1x1x32xf32>
    %23 = vector.shape_cast %22 : vector<1x1x32xf32> to vector<1x32xf32>
    %24 = vector.broadcast %23 : vector<1x32xf32> to vector<16x32xf32>
    %25 = arith.addf %21, %24 : vector<16x32xf32>
    %26 = vector.extract_strided_slice %11 {offsets = [0, 0], sizes = [16, 8], strides = [1, 1]} : vector<16x32xf32> to vector<16x8xf32>
    %27 = vector.extract_strided_slice %11 {offsets = [0, 8], sizes = [16, 8], strides = [1, 1]} : vector<16x32xf32> to vector<16x8xf32>
    %28 = vector.extract_strided_slice %11 {offsets = [0, 16], sizes = [16, 8], strides = [1, 1]} : vector<16x32xf32> to vector<16x8xf32>
    %29 = vector.extract_strided_slice %11 {offsets = [0, 24], sizes = [16, 8], strides = [1, 1]} : vector<16x32xf32> to vector<16x8xf32>
    %30 = vector.shape_cast %26 : vector<16x8xf32> to vector<1x16x8xf32>
    %31 = vector.shape_cast %27 : vector<16x8xf32> to vector<1x16x8xf32>
    %32 = vector.shape_cast %28 : vector<16x8xf32> to vector<1x16x8xf32>
    %33 = vector.shape_cast %29 : vector<16x8xf32> to vector<1x16x8xf32>
    %34 = tpu.concatenate %30, %31, %32, %33 in 0 : vector<1x16x8xf32>, vector<1x16x8xf32>, vector<1x16x8xf32>, vector<1x16x8xf32> -> vector<4x16x8xf32>
    %35 = arith.truncf %34 : vector<4x16x8xf32> to vector<4x16x8xbf16>
    %36 = vector.extract_strided_slice %18 {offsets = [0, 0], sizes = [16, 8], strides = [1, 1]} : vector<16x32xf32> to vector<16x8xf32>
    %37 = vector.extract_strided_slice %18 {offsets = [0, 8], sizes = [16, 8], strides = [1, 1]} : vector<16x32xf32> to vector<16x8xf32>
    %38 = vector.extract_strided_slice %18 {offsets = [0, 16], sizes = [16, 8], strides = [1, 1]} : vector<16x32xf32> to vector<16x8xf32>
    %39 = vector.extract_strided_slice %18 {offsets = [0, 24], sizes = [16, 8], strides = [1, 1]} : vector<16x32xf32> to vector<16x8xf32>
    %40 = vector.shape_cast %36 : vector<16x8xf32> to vector<1x16x8xf32>
    %41 = vector.shape_cast %37 : vector<16x8xf32> to vector<1x16x8xf32>
    %42 = vector.shape_cast %38 : vector<16x8xf32> to vector<1x16x8xf32>
    %43 = vector.shape_cast %39 : vector<16x8xf32> to vector<1x16x8xf32>
    %44 = tpu.concatenate %40, %41, %42, %43 in 0 : vector<1x16x8xf32>, vector<1x16x8xf32>, vector<1x16x8xf32>, vector<1x16x8xf32> -> vector<4x16x8xf32>
    %45 = arith.truncf %44 : vector<4x16x8xf32> to vector<4x16x8xbf16>
    %46 = vector.extract_strided_slice %25 {offsets = [0, 0], sizes = [16, 8], strides = [1, 1]} : vector<16x32xf32> to vector<16x8xf32>
    %47 = vector.extract_strided_slice %25 {offsets = [0, 8], sizes = [16, 8], strides = [1, 1]} : vector<16x32xf32> to vector<16x8xf32>
    %48 = vector.extract_strided_slice %25 {offsets = [0, 16], sizes = [16, 8], strides = [1, 1]} : vector<16x32xf32> to vector<16x8xf32>
    %49 = vector.extract_strided_slice %25 {offsets = [0, 24], sizes = [16, 8], strides = [1, 1]} : vector<16x32xf32> to vector<16x8xf32>
    %50 = vector.shape_cast %46 : vector<16x8xf32> to vector<1x16x8xf32>
    %51 = vector.shape_cast %47 : vector<16x8xf32> to vector<1x16x8xf32>
    %52 = vector.shape_cast %48 : vector<16x8xf32> to vector<1x16x8xf32>
    %53 = vector.shape_cast %49 : vector<16x8xf32> to vector<1x16x8xf32>
    %54 = tpu.concatenate %50, %51, %52, %53 in 0 : vector<1x16x8xf32>, vector<1x16x8xf32>, vector<1x16x8xf32>, vector<1x16x8xf32> -> vector<4x16x8xf32>
    %55 = arith.truncf %54 : vector<4x16x8xf32> to vector<4x16x8xbf16>
    "tpu.trace_start"() <{level = 10 : i32, message = "hqd,hkd->hqk"}> : () -> ()
    %cst_22 = arith.constant dense<0.000000e+00> : vector<4x16x16xf32>
    %56 = tpu.matmul %35, %45, %cst_22 {dimension_numbers = #tpu.dot_dimension_numbers<[2], [2], [1], [1], [0, 0, 0, 1, 1, 1], [0], [0]>} : vector<4x16x8xbf16>, vector<4x16x8xbf16>, vector<4x16x16xf32> -> vector<4x16x16xf32>
    "tpu.trace_stop"() : () -> ()
    %cst_23 = arith.constant 0.353553385 : f32
    %57 = vector.broadcast %cst_23 : f32 to vector<4x16x16xf32>
    %58 = arith.mulf %56, %57 : vector<4x16x16xf32>
    %c0_24 = arith.constant 0 : index
    %c0_25 = arith.constant 0 : index
    %59 = vector.load %arg4[%c0_24, %c0_25] : memref<16x16xf32, #tpu.memory_space<vmem>>, vector<16x16xf32>
    %60 = vector.shape_cast %59 : vector<16x16xf32> to vector<1x16x16xf32>
    %61 = vector.broadcast %60 : vector<1x16x16xf32> to vector<4x16x16xf32>
    %62 = arith.addf %58, %61 : vector<4x16x16xf32>
    %cst_26 = arith.constant dense<0xFF800000> : vector<4x16xf32>
    %63 = vector.multi_reduction <maximumf>, %62, %cst_26 [2] : vector<4x16x16xf32> to vector<4x16xf32>
    %64 = vector.shape_cast %63 : vector<4x16xf32> to vector<4x16x1xf32>
    %65 = vector.broadcast %64 : vector<4x16x1xf32> to vector<4x16x16xf32>
    %66 = arith.subf %62, %65 : vector<4x16x16xf32>
    %67 = math.exp %66 : vector<4x16x16xf32>
    %cst_27 = arith.constant dense<0.000000e+00> : vector<4x16xf32>
    %68 = vector.multi_reduction <add>, %67, %cst_27 [2] : vector<4x16x16xf32> to vector<4x16xf32>
    %69 = vector.shape_cast %68 : vector<4x16xf32> to vector<4x16x1xf32>
    %70 = tpu.reciprocal %69 {approx = true} : vector<4x16x1xf32> -> vector<4x16x1xf32>
    %71 = vector.broadcast %70 : vector<4x16x1xf32> to vector<4x16x16xf32>
    %72 = arith.mulf %67, %71 : vector<4x16x16xf32>
    %73 = arith.truncf %72 : vector<4x16x16xf32> to vector<4x16x16xbf16>
    "tpu.trace_start"() <{level = 10 : i32, message = "hqk,hkd->hqd"}> : () -> ()
    %cst_28 = arith.constant dense<0.000000e+00> : vector<4x16x8xf32>
    %74 = tpu.matmul %73, %55, %cst_28 {dimension_numbers = #tpu.dot_dimension_numbers<[2], [1], [1], [2], [0, 0, 0, 1, 1, 2], [0], [0]>} : vector<4x16x16xbf16>, vector<4x16x8xbf16>, vector<4x16x8xf32> -> vector<4x16x8xf32>
    "tpu.trace_stop"() : () -> ()
    %75 = arith.truncf %74 : vector<4x16x8xf32> to vector<4x16x8xbf16>
    %c0_29 = arith.constant 0 : index
    %c0_30 = arith.constant 0 : index
    %c0_31 = arith.constant 0 : index
    %c0_32 = arith.constant 0 : index
    %76 = vector.load %arg13[%c0_29, %c0_30, %c0_31, %c0_32] : memref<1x4x8x32xbf16, #tpu.memory_space<vmem>>, vector<1x4x8x32xbf16>
    %77 = vector.shape_cast %76 : vector<1x4x8x32xbf16> to vector<4x8x32xbf16>
    "tpu.trace_start"() <{level = 10 : i32, message = "hqv,hvd->hqd"}> : () -> ()
    %cst_33 = arith.constant dense<0.000000e+00> : vector<4x16x32xf32>
    %78 = tpu.matmul %75, %77, %cst_33 {dimension_numbers = #tpu.dot_dimension_numbers<[2], [1], [1], [2], [0, 0, 0, 1, 1, 2], [0], [0]>} : vector<4x16x8xbf16>, vector<4x8x32xbf16>, vector<4x16x32xf32> -> vector<4x16x32xf32>
    "tpu.trace_stop"() : () -> ()
    %79 = vector.extract_strided_slice %78 {offsets = [0, 0, 0], sizes = [1, 16, 32], strides = [1, 1, 1]} : vector<4x16x32xf32> to vector<1x16x32xf32>
    %80 = vector.shape_cast %79 : vector<1x16x32xf32> to vector<16x32xf32>
    %81 = vector.extract_strided_slice %78 {offsets = [1, 0, 0], sizes = [1, 16, 32], strides = [1, 1, 1]} : vector<4x16x32xf32> to vector<1x16x32xf32>
    %82 = vector.shape_cast %81 : vector<1x16x32xf32> to vector<16x32xf32>
    %83 = arith.addf %80, %82 : vector<16x32xf32>
    %84 = vector.extract_strided_slice %78 {offsets = [2, 0, 0], sizes = [1, 16, 32], strides = [1, 1, 1]} : vector<4x16x32xf32> to vector<1x16x32xf32>
    %85 = vector.shape_cast %84 : vector<1x16x32xf32> to vector<16x32xf32>
    %86 = arith.addf %83, %85 : vector<16x32xf32>
    %87 = vector.extract_strided_slice %78 {offsets = [3, 0, 0], sizes = [1, 16, 32], strides = [1, 1, 1]} : vector<4x16x32xf32> to vector<1x16x32xf32>
    %88 = vector.shape_cast %87 : vector<1x16x32xf32> to vector<16x32xf32>
    %89 = arith.addf %86, %88 : vector<16x32xf32>
    %c0_34 = arith.constant 0 : index
    %c0_35 = arith.constant 0 : index
    %c0_36 = arith.constant 0 : index
    %90 = vector.load %arg14[%c0_34, %c0_35, %c0_36] : memref<1x1x32xf32, #tpu.memory_space<vmem>>, vector<1x1x32xf32>
    %91 = vector.shape_cast %90 : vector<1x1x32xf32> to vector<1x32xf32>
    %92 = vector.broadcast %91 : vector<1x32xf32> to vector<16x32xf32>
    %93 = arith.addf %89, %92 : vector<16x32xf32>
    %94 = arith.addf %93, %3 : vector<16x32xf32>
    %c0_37 = arith.constant 0 : index
    %c0_38 = arith.constant 0 : index
    %c0_39 = arith.constant 0 : index
    %95 = vector.load %arg15[%c0_37, %c0_38, %c0_39] : memref<1x1x32xf32, #tpu.memory_space<vmem>>, vector<1x1x32xf32>
    %96 = vector.shape_cast %95 : vector<1x1x32xf32> to vector<1x32xf32>
    %c0_40 = arith.constant 0 : index
    %c0_41 = arith.constant 0 : index
    %c0_42 = arith.constant 0 : index
    %97 = vector.load %arg16[%c0_40, %c0_41, %c0_42] : memref<1x1x32xf32, #tpu.memory_space<vmem>>, vector<1x1x32xf32>
    %98 = vector.shape_cast %97 : vector<1x1x32xf32> to vector<1x32xf32>
    %cst_43 = arith.constant dense<0.000000e+00> : vector<16xf32>
    %99 = vector.multi_reduction <add>, %94, %cst_43 [1] : vector<16x32xf32> to vector<16xf32>
    %100 = vector.shape_cast %99 : vector<16xf32> to vector<16x1xf32>
    %cst_44 = arith.constant 3.200000e+01 : f32
    %101 = vector.broadcast %cst_44 : f32 to vector<16x1xf32>
    %102 = arith.divf %100, %101 : vector<16x1xf32>
    %103 = vector.broadcast %102 : vector<16x1xf32> to vector<16x32xf32>
    %104 = arith.subf %94, %103 : vector<16x32xf32>
    %105 = arith.mulf %104, %104 : vector<16x32xf32>
    %cst_45 = arith.constant dense<0.000000e+00> : vector<16xf32>
    %106 = vector.multi_reduction <add>, %105, %cst_45 [1] : vector<16x32xf32> to vector<16xf32>
    %107 = vector.shape_cast %106 : vector<16xf32> to vector<16x1xf32>
    %cst_46 = arith.constant 3.200000e+01 : f32
    %108 = vector.broadcast %cst_46 : f32 to vector<16x1xf32>
    %109 = arith.divf %107, %108 : vector<16x1xf32>
    %110 = vector.broadcast %102 : vector<16x1xf32> to vector<16x32xf32>
    %111 = arith.subf %94, %110 : vector<16x32xf32>
    %cst_47 = arith.constant 9.99999974E-6 : f32
    %112 = vector.broadcast %cst_47 : f32 to vector<16x1xf32>
    %113 = arith.addf %109, %112 : vector<16x1xf32>
    %114 = math.rsqrt %113 : vector<16x1xf32>
    %115 = vector.broadcast %114 : vector<16x1xf32> to vector<16x32xf32>
    %116 = arith.mulf %111, %115 : vector<16x32xf32>
    %117 = vector.broadcast %96 : vector<1x32xf32> to vector<16x32xf32>
    %118 = arith.mulf %116, %117 : vector<16x32xf32>
    %119 = vector.broadcast %98 : vector<1x32xf32> to vector<16x32xf32>
    %120 = arith.addf %118, %119 : vector<16x32xf32>
    %121 = arith.truncf %120 : vector<16x32xf32> to vector<16x32xbf16>
    %c0_48 = arith.constant 0 : index
    %c0_49 = arith.constant 0 : index
    %c0_50 = arith.constant 0 : index
    %122 = vector.load %arg17[%c0_48, %c0_49, %c0_50] : memref<1x32x32xbf16, #tpu.memory_space<vmem>>, vector<1x32x32xbf16>
    %123 = vector.shape_cast %122 : vector<1x32x32xbf16> to vector<32x32xbf16>
    %cst_51 = arith.constant dense<0.000000e+00> : vector<16x32xf32>
    %124 = tpu.matmul %121, %123, %cst_51 {dimension_numbers = #tpu.dot_dimension_numbers<[1], [0], [0], [1], [0, 0, 1, 1], [], []>} : vector<16x32xbf16>, vector<32x32xbf16>, vector<16x32xf32> -> vector<16x32xf32>
    %c0_52 = arith.constant 0 : index
    %c0_53 = arith.constant 0 : index
    %c0_54 = arith.constant 0 : index
    %125 = vector.load %arg18[%c0_52, %c0_53, %c0_54] : memref<1x1x32xf32, #tpu.memory_space<vmem>>, vector<1x1x32xf32>
    %126 = vector.shape_cast %125 : vector<1x1x32xf32> to vector<1x32xf32>
    %127 = vector.broadcast %126 : vector<1x32xf32> to vector<16x32xf32>
    %128 = arith.addf %124, %127 : vector<16x32xf32>
    %cst_55 = arith.constant 0.000000e+00 : f32
    %129 = vector.broadcast %cst_55 : f32 to vector<16x32xf32>
    %130 = arith.maximumf %128, %129 : vector<16x32xf32>
    %131 = arith.truncf %130 : vector<16x32xf32> to vector<16x32xbf16>
    %c0_56 = arith.constant 0 : index
    %c0_57 = arith.constant 0 : index
    %c0_58 = arith.constant 0 : index
    %132 = vector.load %arg19[%c0_56, %c0_57, %c0_58] : memref<1x32x32xbf16, #tpu.memory_space<vmem>>, vector<1x32x32xbf16>
    %133 = vector.shape_cast %132 : vector<1x32x32xbf16> to vector<32x32xbf16>
    %cst_59 = arith.constant dense<0.000000e+00> : vector<16x32xf32>
    %134 = tpu.matmul %131, %133, %cst_59 {dimension_numbers = #tpu.dot_dimension_numbers<[1], [0], [0], [1], [0, 0, 1, 1], [], []>} : vector<16x32xbf16>, vector<32x32xbf16>, vector<16x32xf32> -> vector<16x32xf32>
    %c0_60 = arith.constant 0 : index
    %c0_61 = arith.constant 0 : index
    %c0_62 = arith.constant 0 : index
    %135 = vector.load %arg20[%c0_60, %c0_61, %c0_62] : memref<1x1x32xf32, #tpu.memory_space<vmem>>, vector<1x1x32xf32>
    %136 = vector.shape_cast %135 : vector<1x1x32xf32> to vector<1x32xf32>
    %137 = vector.broadcast %136 : vector<1x32xf32> to vector<16x32xf32>
    %138 = arith.addf %134, %137 : vector<16x32xf32>
    %139 = arith.addf %138, %120 : vector<16x32xf32>
    %c0_63 = arith.constant 0 : index
    %c0_64 = arith.constant 0 : index
    %c0_65 = arith.constant 0 : index
    %140 = vector.load %arg21[%c0_63, %c0_64, %c0_65] : memref<1x1x32xf32, #tpu.memory_space<vmem>>, vector<1x1x32xf32>
    %141 = vector.shape_cast %140 : vector<1x1x32xf32> to vector<1x32xf32>
    %c0_66 = arith.constant 0 : index
    %c0_67 = arith.constant 0 : index
    %c0_68 = arith.constant 0 : index
    %142 = vector.load %arg22[%c0_66, %c0_67, %c0_68] : memref<1x1x32xf32, #tpu.memory_space<vmem>>, vector<1x1x32xf32>
    %143 = vector.shape_cast %142 : vector<1x1x32xf32> to vector<1x32xf32>
    %cst_69 = arith.constant dense<0.000000e+00> : vector<16xf32>
    %144 = vector.multi_reduction <add>, %139, %cst_69 [1] : vector<16x32xf32> to vector<16xf32>
    %145 = vector.shape_cast %144 : vector<16xf32> to vector<16x1xf32>
    %cst_70 = arith.constant 3.200000e+01 : f32
    %146 = vector.broadcast %cst_70 : f32 to vector<16x1xf32>
    %147 = arith.divf %145, %146 : vector<16x1xf32>
    %148 = vector.broadcast %147 : vector<16x1xf32> to vector<16x32xf32>
    %149 = arith.subf %139, %148 : vector<16x32xf32>
    %150 = arith.mulf %149, %149 : vector<16x32xf32>
    %cst_71 = arith.constant dense<0.000000e+00> : vector<16xf32>
    %151 = vector.multi_reduction <add>, %150, %cst_71 [1] : vector<16x32xf32> to vector<16xf32>
    %152 = vector.shape_cast %151 : vector<16xf32> to vector<16x1xf32>
    %cst_72 = arith.constant 3.200000e+01 : f32
    %153 = vector.broadcast %cst_72 : f32 to vector<16x1xf32>
    %154 = arith.divf %152, %153 : vector<16x1xf32>
    %155 = vector.broadcast %147 : vector<16x1xf32> to vector<16x32xf32>
    %156 = arith.subf %139, %155 : vector<16x32xf32>
    %cst_73 = arith.constant 9.99999974E-6 : f32
    %157 = vector.broadcast %cst_73 : f32 to vector<16x1xf32>
    %158 = arith.addf %154, %157 : vector<16x1xf32>
    %159 = math.rsqrt %158 : vector<16x1xf32>
    %160 = vector.broadcast %159 : vector<16x1xf32> to vector<16x32xf32>
    %161 = arith.mulf %156, %160 : vector<16x32xf32>
    %162 = vector.broadcast %141 : vector<1x32xf32> to vector<16x32xf32>
    %163 = arith.mulf %161, %162 : vector<16x32xf32>
    %164 = vector.broadcast %143 : vector<1x32xf32> to vector<16x32xf32>
    %165 = arith.addf %163, %164 : vector<16x32xf32>
    %c0_74 = arith.constant 0 : index
    %c0_75 = arith.constant 0 : index
    %166 = vector.load %arg23[%c0_74, %c0_75] : memref<16x32xf32, #tpu.memory_space<vmem>>, vector<16x32xf32>
    tpu.vector_store %arg23[%c0_74, %c0_75], %165 {strides = array<i32>} : memref<16x32xf32, #tpu.memory_space<vmem>>, vector<16x32xf32>,
    return
  }
  func.func @transform_0(%arg0: i32, %arg1: i32) -> (i32, i32) {
    %c0_i32 = arith.constant 0 : i32
    %c0_i32_0 = arith.constant 0 : i32
    return %arg0, %c0_i32 : i32, i32
  }
  func.func @transform_1(%arg0: i32, %arg1: i32) -> (i32, i32) {
    %c0_i32 = arith.constant 0 : i32
    %c0_i32_0 = arith.constant 0 : i32
    %c0_i32_1 = arith.constant 0 : i32
    return %c0_i32, %c0_i32_0 : i32, i32
  }
  func.func @transform_2(%arg0: i32, %arg1: i32) -> (i32, i32) {
    %c0_i32 = arith.constant 0 : i32
    %c0_i32_0 = arith.constant 0 : i32
    %c0_i32_1 = arith.constant 0 : i32
    return %c0_i32, %c0_i32_0 : i32, i32
  }
  func.func @transform_3(%arg0: i32, %arg1: i32) -> (i32, i32) {
    %c0_i32 = arith.constant 0 : i32
    %c0_i32_0 = arith.constant 0 : i32
    %c0_i32_1 = arith.constant 0 : i32
    return %c0_i32, %c0_i32_0 : i32, i32
  }
  func.func @transform_4(%arg0: i32, %arg1: i32) -> (i32, i32) {
    %c0_i32 = arith.constant 0 : i32
    %c0_i32_0 = arith.constant 0 : i32
    %c0_i32_1 = arith.constant 0 : i32
    return %c0_i32, %c0_i32_0 : i32, i32
  }
  func.func @transform_5(%arg0: i32, %arg1: i32) -> (i32, i32, i32) {
    %c0_i32 = arith.constant 0 : i32
    %c0_i32_0 = arith.constant 0 : i32
    %c0_i32_1 = arith.constant 0 : i32
    return %arg1, %c0_i32, %c0_i32_0 : i32, i32, i32
  }
  func.func @transform_6(%arg0: i32, %arg1: i32) -> (i32, i32, i32) {
    %c0_i32 = arith.constant 0 : i32
    %c0_i32_0 = arith.constant 0 : i32
    %c0_i32_1 = arith.constant 0 : i32
    return %arg1, %c0_i32, %c0_i32_0 : i32, i32, i32
  }
  func.func @transform_7(%arg0: i32, %arg1: i32) -> (i32, i32, i32) {
    %c0_i32 = arith.constant 0 : i32
    %c0_i32_0 = arith.constant 0 : i32
    %c0_i32_1 = arith.constant 0 : i32
    return %arg1, %c0_i32, %c0_i32_0 : i32, i32, i32
  }
  func.func @transform_8(%arg0: i32, %arg1: i32) -> (i32, i32, i32) {
    %c0_i32 = arith.constant 0 : i32
    %c0_i32_0 = arith.constant 0 : i32
    %c0_i32_1 = arith.constant 0 : i32
    return %arg1, %c0_i32, %c0_i32_0 : i32, i32, i32
  }
  func.func @transform_9(%arg0: i32, %arg1: i32) -> (i32, i32, i32) {
    %c0_i32 = arith.constant 0 : i32
    %c0_i32_0 = arith.constant 0 : i32
    %c0_i32_1 = arith.constant 0 : i32
    return %arg1, %c0_i32, %c0_i32_0 : i32, i32, i32
  }
  func.func @transform_10(%arg0: i32, %arg1: i32) -> (i32, i32, i32) {
    %c0_i32 = arith.constant 0 : i32
    %c0_i32_0 = arith.constant 0 : i32
    %c0_i32_1 = arith.constant 0 : i32
    return %arg1, %c0_i32, %c0_i32_0 : i32, i32, i32
  }
  func.func @transform_11(%arg0: i32, %arg1: i32) -> (i32, i32, i32, i32) {
    %c0_i32 = arith.constant 0 : i32
    %c0_i32_0 = arith.constant 0 : i32
    %c0_i32_1 = arith.constant 0 : i32
    %c0_i32_2 = arith.constant 0 : i32
    return %arg1, %c0_i32, %c0_i32_0, %c0_i32_1 : i32, i32, i32, i32
  }
  func.func @transform_12(%arg0: i32, %arg1: i32) -> (i32, i32, i32) {
    %c0_i32 = arith.constant 0 : i32
    %c0_i32_0 = arith.constant 0 : i32
    %c0_i32_1 = arith.constant 0 : i32
    return %arg1, %c0_i32, %c0_i32_0 : i32, i32, i32
  }
  func.func @transform_13(%arg0: i32, %arg1: i32) -> (i32, i32, i32) {
    %c0_i32 = arith.constant 0 : i32
    %c0_i32_0 = arith.constant 0 : i32
    %c0_i32_1 = arith.constant 0 : i32
    return %arg1, %c0_i32, %c0_i32_0 : i32, i32, i32
  }
  func.func @transform_14(%arg0: i32, %arg1: i32) -> (i32, i32, i32) {
    %c0_i32 = arith.constant 0 : i32
    %c0_i32_0 = arith.constant 0 : i32
    %c0_i32_1 = arith.constant 0 : i32
    return %arg1, %c0_i32, %c0_i32_0 : i32, i32, i32
  }
  func.func @transform_15(%arg0: i32, %arg1: i32) -> (i32, i32, i32) {
    %c0_i32 = arith.constant 0 : i32
    %c0_i32_0 = arith.constant 0 : i32
    %c0_i32_1 = arith.constant 0 : i32
    return %arg1, %c0_i32, %c0_i32_0 : i32, i32, i32
  }
  func.func @transform_16(%arg0: i32, %arg1: i32) -> (i32, i32, i32) {
    %c0_i32 = arith.constant 0 : i32
    %c0_i32_0 = arith.constant 0 : i32
    %c0_i32_1 = arith.constant 0 : i32
    return %arg1, %c0_i32, %c0_i32_0 : i32, i32, i32
  }
  func.func @transform_17(%arg0: i32, %arg1: i32) -> (i32, i32, i32) {
    %c0_i32 = arith.constant 0 : i32
    %c0_i32_0 = arith.constant 0 : i32
    %c0_i32_1 = arith.constant 0 : i32
    return %arg1, %c0_i32, %c0_i32_0 : i32, i32, i32
  }
  func.func @transform_18(%arg0: i32, %arg1: i32) -> (i32, i32, i32) {
    %c0_i32 = arith.constant 0 : i32
    %c0_i32_0 = arith.constant 0 : i32
    %c0_i32_1 = arith.constant 0 : i32
    return %arg1, %c0_i32, %c0_i32_0 : i32, i32, i32
  }
  func.func @transform_19(%arg0: i32, %arg1: i32) -> (i32, i32, i32) {
    %c0_i32 = arith.constant 0 : i32
    %c0_i32_0 = arith.constant 0 : i32
    %c0_i32_1 = arith.constant 0 : i32
    return %arg1, %c0_i32, %c0_i32_0 : i32, i32, i32
  }
  func.func @transform_20(%arg0: i32, %arg1: i32) -> (i32, i32, i32) {
    %c0_i32 = arith.constant 0 : i32
    %c0_i32_0 = arith.constant 0 : i32
    %c0_i32_1 = arith.constant 0 : i32
    return %arg1, %c0_i32, %c0_i32_0 : i32, i32, i32
  }
  func.func @transform_21(%arg0: i32, %arg1: i32) -> (i32, i32) {
    %c0_i32 = arith.constant 0 : i32
    %c0_i32_0 = arith.constant 0 : i32
    return %arg0, %c0_i32 : i32, i32
  }
}

module attributes {stable_mosaic.version = 11 : i64} {
  func.func @fused_decoder_kernel(%arg0: i32, %arg1: i32, %arg2: memref<16x16xf32, #tpu.memory_space<vmem>>, %arg3: memref<16x32xf32, #tpu.memory_space<vmem>>, %arg4: memref<16x16xf32, #tpu.memory_space<vmem>>, %arg5: memref<16x32xbf16, #tpu.memory_space<vmem>>, %arg6: memref<1x32xf32, #tpu.memory_space<vmem>>, %arg7: memref<1x32x32xbf16, #tpu.memory_space<vmem>>, %arg8: memref<1x1x32xf32, #tpu.memory_space<vmem>>, %arg9: memref<1x32x32xbf16, #tpu.memory_space<vmem>>, %arg10: memref<1x1x32xf32, #tpu.memory_space<vmem>>, %arg11: memref<1x32x32xbf16, #tpu.memory_space<vmem>>, %arg12: memref<1x1x32xf32, #tpu.memory_space<vmem>>, %arg13: memref<1x4x8x32xbf16, #tpu.memory_space<vmem>>, %arg14: memref<1x1x32xf32, #tpu.memory_space<vmem>>, %arg15: memref<1x1x32xf32, #tpu.memory_space<vmem>>, %arg16: memref<1x1x32xf32, #tpu.memory_space<vmem>>, %arg17: memref<1x32x32xbf16, #tpu.memory_space<vmem>>, %arg18: memref<1x1x32xf32, #tpu.memory_space<vmem>>, %arg19: memref<1x32x32xbf16, #tpu.memory_space<vmem>>, %arg20: memref<1x1x32xf32, #tpu.memory_space<vmem>>, %arg21: memref<1x1x32xf32, #tpu.memory_space<vmem>>, %arg22: memref<1x1x32xf32, #tpu.memory_space<vmem>>, %arg23: memref<16x32xf32, #tpu.memory_space<vmem>>) attributes {dimension_semantics = [#tpu.dimension_semantics<parallel>, #tpu.dimension_semantics<arbitrary>], iteration_bounds = array<i64: 2, 2>, scalar_prefetch = 0 : i64, scratch_operands = 0 : i64, tpu.core_type = #tpu.core_type<tc>, window_params = [{transform_indices = @transform_0, window_bounds = array<i64: 16, 16>}, {pipeline_mode = #tpu.pipeline_mode<synchronous>, transform_indices = @transform_1, window_bounds = array<i64: 16, 32>}, {pipeline_mode = #tpu.pipeline_mode<synchronous>, transform_indices = @transform_2, window_bounds = array<i64: 16, 16>}, {pipeline_mode = #tpu.pipeline_mode<synchronous>, transform_indices = @transform_3, window_bounds = array<i64: 16, 32>}, {pipeline_mode = #tpu.pipeline_mode<synchronous>, transform_indices = @transform_4, window_bounds = array<i64: 1, 32>}, {transform_indices = @transform_5, window_bounds = array<i64: 1, 32, 32>}, {transform_indices = @transform_6, window_bounds = array<i64: 1, 1, 32>}, {transform_indices = @transform_7, window_bounds = array<i64: 1, 32, 32>}, {transform_indices = @transform_8, window_bounds = array<i64: 1, 1, 32>}, {transform_indices = @transform_9, window_bounds = array<i64: 1, 32, 32>}, {transform_indices = @transform_10, window_bounds = array<i64: 1, 1, 32>}, {transform_indices = @transform_11, window_bounds = array<i64: 1, 4, 8, 32>}, {transform_indices = @transform_12, window_bounds = array<i64: 1, 1, 32>}, {transform_indices = @transform_13, window_bounds = array<i64: 1, 1, 32>}, {transform_indices = @transform_14, window_bounds = array<i64: 1, 1, 32>}, {transform_indices = @transform_15, window_bounds = array<i64: 1, 32, 32>}, {transform_indices = @transform_16, window_bounds = array<i64: 1, 1, 32>}, {transform_indices = @transform_17, window_bounds = array<i64: 1, 32, 32>}, {transform_indices = @transform_18, window_bounds = array<i64: 1, 1, 32>}, {transform_indices = @transform_19, window_bounds = array<i64: 1, 1, 32>}, {transform_indices = @transform_20, window_bounds = array<i64: 1, 1, 32>}, {transform_indices = @transform_21, window_bounds = array<i64: 16, 32>}]} {
    %c0_i32 = arith.constant 0 : i32
    %0 = arith.cmpi eq, %arg1, %c0_i32 : i32
    %1 = arith.extui %0 : i1 to i32
    %c0_i32_0 = arith.constant 0 : i32
    %2 = arith.cmpi ne, %1, %c0_i32_0 : i32
    scf.if %2 {
      %c0_76 = arith.constant 0 : index
      %c0_77 = arith.constant 0 : index
      %167 = vector.load %arg2[%c0_76, %c0_77] : memref<16x16xf32, #tpu.memory_space<vmem>>, vector<16x16xf32>
      %168 = arith.truncf %167 : vector<16x16xf32> to vector<16x16xbf16>
      %c0_78 = arith.constant 0 : index
      %c0_79 = arith.constant 0 : index
      %169 = vector.load %arg5[%c0_78, %c0_79] : memref<16x32xbf16, #tpu.memory_space<vmem>>, vector<16x32xbf16>
      %cst_80 = arith.constant dense<0.000000e+00> : vector<16x32xf32>
      %170 = tpu.matmul %168, %169, %cst_80 {dimension_numbers = #tpu.dot_dimension_numbers<[1], [0], [0], [1], [0, 0, 1, 1], [], []>} : vector<16x16xbf16>, vector<16x32xbf16>, vector<16x32xf32> -> vector<16x32xf32>
      %c0_81 = arith.constant 0 : index
      %c0_82 = arith.constant 0 : index
      %171 = vector.load %arg6[%c0_81, %c0_82] : memref<1x32xf32, #tpu.memory_space<vmem>>, vector<1x32xf32>
      %172 = vector.broadcast %171 : vector<1x32xf32> to vector<16x32xf32>
      %173 = arith.addf %170, %172 : vector<16x32xf32>
      %c0_83 = arith.constant 0 : index
      %c0_84 = arith.constant 0 : index
      %174 = vector.load %arg3[%c0_83, %c0_84] : memref<16x32xf32, #tpu.memory_space<vmem>>, vector<16x32xf32>
      %175 = arith.addf %173, %174 : vector<16x32xf32>
      %c0_85 = arith.constant 0 : index
      %c0_86 = arith.constant 0 : index
      %176 = vector.load %arg23[%c0_85, %c0_86] : memref<16x32xf32, #tpu.memory_space<vmem>>, vector<16x32xf32>
      tpu.vector_store %arg23[%c0_85, %c0_86], %175 {strides = array<i32>} : memref<16x32xf32, #tpu.memory_space<vmem>>, vector<16x32xf32>,
    } else {
    }
    %c0 = arith.constant 0 : index
    %c0_1 = arith.constant 0 : index
    %3 = vector.load %arg23[%c0, %c0_1] : memref<16x32xf32, #tpu.memory_space<vmem>>, vector<16x32xf32>
    %4 = arith.truncf %3 : vector<16x32xf32> to vector<16x32xbf16>
    %c0_2 = arith.constant 0 : index
    %c0_3 = arith.constant 0 : index
    %c0_4 = arith.constant 0 : index
    %5 = vector.load %arg7[%c0_2, %c0_3, %c0_4] : memref<1x32x32xbf16, #tpu.memory_space<vmem>>, vector<1x32x32xbf16>
    %6 = vector.shape_cast %5 : vector<1x32x32xbf16> to vector<32x32xbf16>
    %cst = arith.constant dense<0.000000e+00> : vector<16x32xf32>
    %7 = tpu.matmul %4, %6, %cst {dimension_numbers = #tpu.dot_dimension_numbers<[1], [0], [0], [1], [0, 0, 1, 1], [], []>} : vector<16x32xbf16>, vector<32x32xbf16>, vector<16x32xf32> -> vector<16x32xf32>
    %c0_5 = arith.constant 0 : index
    %c0_6 = arith.constant 0 : index
    %c0_7 = arith.constant 0 : index
    %8 = vector.load %arg8[%c0_5, %c0_6, %c0_7] : memref<1x1x32xf32, #tpu.memory_space<vmem>>, vector<1x1x32xf32>
    %9 = vector.shape_cast %8 : vector<1x1x32xf32> to vector<1x32xf32>
    %10 = vector.broadcast %9 : vector<1x32xf32> to vector<16x32xf32>
    %11 = arith.addf %7, %10 : vector<16x32xf32>
    %c0_8 = arith.constant 0 : index
    %c0_9 = arith.constant 0 : index
    %c0_10 = arith.constant 0 : index
    %12 = vector.load %arg9[%c0_8, %c0_9, %c0_10] : memref<1x32x32xbf16, #tpu.memory_space<vmem>>, vector<1x32x32xbf16>
    %13 = vector.shape_cast %12 : vector<1x32x32xbf16> to vector<32x32xbf16>
    %cst_11 = arith.constant dense<0.000000e+00> : vector<16x32xf32>
    %14 = tpu.matmul %4, %13, %cst_11 {dimension_numbers = #tpu.dot_dimension_numbers<[1], [0], [0], [1], [0, 0, 1, 1], [], []>} : vector<16x32xbf16>, vector<32x32xbf16>, vector<16x32xf32> -> vector<16x32xf32>
    %c0_12 = arith.constant 0 : index
    %c0_13 = arith.constant 0 : index
    %c0_14 = arith.constant 0 : index
    %15 = vector.load %arg10[%c0_12, %c0_13, %c0_14] : memref<1x1x32xf32, #tpu.memory_space<vmem>>, vector<1x1x32xf32>
    %16 = vector.shape_cast %15 : vector<1x1x32xf32> to vector<1x32xf32>
    %17 = vector.broadcast %16 : vector<1x32xf32> to vector<16x32xf32>
    %18 = arith.addf %14, %17 : vector<16x32xf32>
    %c0_15 = arith.constant 0 : index
    %c0_16 = arith.constant 0 : index
    %c0_17 = arith.constant 0 : index
    %19 = vector.load %arg11[%c0_15, %c0_16, %c0_17] : memref<1x32x32xbf16, #tpu.memory_space<vmem>>, vector<1x32x32xbf16>
    %20 = vector.shape_cast %19 : vector<1x32x32xbf16> to vector<32x32xbf16>
    %cst_18 = arith.constant dense<0.000000e+00> : vector<16x32xf32>
    %21 = tpu.matmul %4, %20, %cst_18 {dimension_numbers = #tpu.dot_dimension_numbers<[1], [0], [0], [1], [0, 0, 1, 1], [], []>} : vector<16x32xbf16>, vector<32x32xbf16>, vector<16x32xf32> -> vector<16x32xf32>
    %c0_19 = arith.constant 0 : index
    %c0_20 = arith.constant 0 : index
    %c0_21 = arith.constant 0 : index
    %22 = vector.load %arg12[%c0_19, %c0_20, %c0_21] : memref<1x1x32xf32, #tpu.memory_space<vmem>>, vector<1x1x32xf32>
    %23 = vector.shape_cast %22 : vector<1x1x32xf32> to vector<1x32xf32>
    %24 = vector.broadcast %23 : vector<1x32xf32> to vector<16x32xf32>
    %25 = arith.addf %21, %24 : vector<16x32xf32>
    %26 = vector.extract_strided_slice %11 {offsets = [0, 0], sizes = [16, 8], strides = [1, 1]} : vector<16x32xf32> to vector<16x8xf32>
    %27 = vector.extract_strided_slice %11 {offsets = [0, 8], sizes = [16, 8], strides = [1, 1]} : vector<16x32xf32> to vector<16x8xf32>
    %28 = vector.extract_strided_slice %11 {offsets = [0, 16], sizes = [16, 8], strides = [1, 1]} : vector<16x32xf32> to vector<16x8xf32>
    %29 = vector.extract_strided_slice %11 {offsets = [0, 24], sizes = [16, 8], strides = [1, 1]} : vector<16x32xf32> to vector<16x8xf32>
    %30 = vector.shape_cast %26 : vector<16x8xf32> to vector<1x16x8xf32>
    %31 = vector.shape_cast %27 : vector<16x8xf32> to vector<1x16x8xf32>
    %32 = vector.shape_cast %28 : vector<16x8xf32> to vector<1x16x8xf32>
    %33 = vector.shape_cast %29 : vector<16x8xf32> to vector<1x16x8xf32>
    %34 = tpu.concatenate %30, %31, %32, %33 in 0 : vector<1x16x8xf32>, vector<1x16x8xf32>, vector<1x16x8xf32>, vector<1x16x8xf32> -> vector<4x16x8xf32>
    %35 = arith.truncf %34 : vector<4x16x8xf32> to vector<4x16x8xbf16>
    %36 = vector.extract_strided_slice %18 {offsets = [0, 0], sizes = [16, 8], strides = [1, 1]} : vector<16x32xf32> to vector<16x8xf32>
    %37 = vector.extract_strided_slice %18 {offsets = [0, 8], sizes = [16, 8], strides = [1, 1]} : vector<16x32xf32> to vector<16x8xf32>
    %38 = vector.extract_strided_slice %18 {offsets = [0, 16], sizes = [16, 8], strides = [1, 1]} : vector<16x32xf32> to vector<16x8xf32>
    %39 = vector.extract_strided_slice %18 {offsets = [0, 24], sizes = [16, 8], strides = [1, 1]} : vector<16x32xf32> to vector<16x8xf32>
    %40 = vector.shape_cast %36 : vector<16x8xf32> to vector<1x16x8xf32>
    %41 = vector.shape_cast %37 : vector<16x8xf32> to vector<1x16x8xf32>
    %42 = vector.shape_cast %38 : vector<16x8xf32> to vector<1x16x8xf32>
    %43 = vector.shape_cast %39 : vector<16x8xf32> to vector<1x16x8xf32>
    %44 = tpu.concatenate %40, %41, %42, %43 in 0 : vector<1x16x8xf32>, vector<1x16x8xf32>, vector<1x16x8xf32>, vector<1x16x8xf32> -> vector<4x16x8xf32>
    %45 = arith.truncf %44 : vector<4x16x8xf32> to vector<4x16x8xbf16>
    %46 = vector.extract_strided_slice %25 {offsets = [0, 0], sizes = [16, 8], strides = [1, 1]} : vector<16x32xf32> to vector<16x8xf32>
    %47 = vector.extract_strided_slice %25 {offsets = [0, 8], sizes = [16, 8], strides = [1, 1]} : vector<16x32xf32> to vector<16x8xf32>
    %48 = vector.extract_strided_slice %25 {offsets = [0, 16], sizes = [16, 8], strides = [1, 1]} : vector<16x32xf32> to vector<16x8xf32>
    %49 = vector.extract_strided_slice %25 {offsets = [0, 24], sizes = [16, 8], strides = [1, 1]} : vector<16x32xf32> to vector<16x8xf32>
    %50 = vector.shape_cast %46 : vector<16x8xf32> to vector<1x16x8xf32>
    %51 = vector.shape_cast %47 : vector<16x8xf32> to vector<1x16x8xf32>
    %52 = vector.shape_cast %48 : vector<16x8xf32> to vector<1x16x8xf32>
    %53 = vector.shape_cast %49 : vector<16x8xf32> to vector<1x16x8xf32>
    %54 = tpu.concatenate %50, %51, %52, %53 in 0 : vector<1x16x8xf32>, vector<1x16x8xf32>, vector<1x16x8xf32>, vector<1x16x8xf32> -> vector<4x16x8xf32>
    %55 = arith.truncf %54 : vector<4x16x8xf32> to vector<4x16x8xbf16>
    "tpu.trace_start"() <{level = 10 : i32, message = "hqd,hkd->hqk"}> : () -> ()
    %cst_22 = arith.constant dense<0.000000e+00> : vector<4x16x16xf32>
    %56 = tpu.matmul %35, %45, %cst_22 {dimension_numbers = #tpu.dot_dimension_numbers<[2], [2], [1], [1], [0, 0, 0, 1, 1, 1], [0], [0]>} : vector<4x16x8xbf16>, vector<4x16x8xbf16>, vector<4x16x16xf32> -> vector<4x16x16xf32>
    "tpu.trace_stop"() : () -> ()
    %cst_23 = arith.constant 0.353553385 : f32
    %57 = vector.broadcast %cst_23 : f32 to vector<4x16x16xf32>
    %58 = arith.mulf %56, %57 : vector<4x16x16xf32>
    %c0_24 = arith.constant 0 : index
    %c0_25 = arith.constant 0 : index
    %59 = vector.load %arg4[%c0_24, %c0_25] : memref<16x16xf32, #tpu.memory_space<vmem>>, vector<16x16xf32>
    %60 = vector.shape_cast %59 : vector<16x16xf32> to vector<1x16x16xf32>
    %61 = vector.broadcast %60 : vector<1x16x16xf32> to vector<4x16x16xf32>
    %62 = arith.addf %58, %61 : vector<4x16x16xf32>
    %cst_26 = arith.constant dense<0xFF800000> : vector<4x16xf32>
    %63 = vector.multi_reduction <maximumf>, %62, %cst_26 [2] : vector<4x16x16xf32> to vector<4x16xf32>
    %64 = vector.shape_cast %63 : vector<4x16xf32> to vector<4x16x1xf32>
    %65 = vector.broadcast %64 : vector<4x16x1xf32> to vector<4x16x16xf32>
    %66 = arith.subf %62, %65 : vector<4x16x16xf32>
    %67 = math.exp %66 : vector<4x16x16xf32>
    %cst_27 = arith.constant dense<0.000000e+00> : vector<4x16xf32>
    %68 = vector.multi_reduction <add>, %67, %cst_27 [2] : vector<4x16x16xf32> to vector<4x16xf32>
    %69 = vector.shape_cast %68 : vector<4x16xf32> to vector<4x16x1xf32>
    %70 = tpu.reciprocal %69 {approx = true} : vector<4x16x1xf32> -> vector<4x16x1xf32>
    %71 = vector.broadcast %70 : vector<4x16x1xf32> to vector<4x16x16xf32>
    %72 = arith.mulf %67, %71 : vector<4x16x16xf32>
    %73 = arith.truncf %72 : vector<4x16x16xf32> to vector<4x16x16xbf16>
    "tpu.trace_start"() <{level = 10 : i32, message = "hqk,hkd->hqd"}> : () -> ()
    %cst_28 = arith.constant dense<0.000000e+00> : vector<4x16x8xf32>
    %74 = tpu.matmul %73, %55, %cst_28 {dimension_numbers = #tpu.dot_dimension_numbers<[2], [1], [1], [2], [0, 0, 0, 1, 1, 2], [0], [0]>} : vector<4x16x16xbf16>, vector<4x16x8xbf16>, vector<4x16x8xf32> -> vector<4x16x8xf32>
    "tpu.trace_stop"() : () -> ()
    %75 = arith.truncf %74 : vector<4x16x8xf32> to vector<4x16x8xbf16>
    %c0_29 = arith.constant 0 : index
    %c0_30 = arith.constant 0 : index
    %c0_31 = arith.constant 0 : index
    %c0_32 = arith.constant 0 : index
    %76 = vector.load %arg13[%c0_29, %c0_30, %c0_31, %c0_32] : memref<1x4x8x32xbf16, #tpu.memory_space<vmem>>, vector<1x4x8x32xbf16>
    %77 = vector.shape_cast %76 : vector<1x4x8x32xbf16> to vector<4x8x32xbf16>
    "tpu.trace_start"() <{level = 10 : i32, message = "hqv,hvd->hqd"}> : () -> ()
    %cst_33 = arith.constant dense<0.000000e+00> : vector<4x16x32xf32>
    %78 = tpu.matmul %75, %77, %cst_33 {dimension_numbers = #tpu.dot_dimension_numbers<[2], [1], [1], [2], [0, 0, 0, 1, 1, 2], [0], [0]>} : vector<4x16x8xbf16>, vector<4x8x32xbf16>, vector<4x16x32xf32> -> vector<4x16x32xf32>
    "tpu.trace_stop"() : () -> ()
    %79 = vector.extract_strided_slice %78 {offsets = [0, 0, 0], sizes = [1, 16, 32], strides = [1, 1, 1]} : vector<4x16x32xf32> to vector<1x16x32xf32>
    %80 = vector.shape_cast %79 : vector<1x16x32xf32> to vector<16x32xf32>
    %81 = vector.extract_strided_slice %78 {offsets = [1, 0, 0], sizes = [1, 16, 32], strides = [1, 1, 1]} : vector<4x16x32xf32> to vector<1x16x32xf32>
    %82 = vector.shape_cast %81 : vector<1x16x32xf32> to vector<16x32xf32>
    %83 = arith.addf %80, %82 : vector<16x32xf32>
    %84 = vector.extract_strided_slice %78 {offsets = [2, 0, 0], sizes = [1, 16, 32], strides = [1, 1, 1]} : vector<4x16x32xf32> to vector<1x16x32xf32>
    %85 = vector.shape_cast %84 : vector<1x16x32xf32> to vector<16x32xf32>
    %86 = arith.addf %83, %85 : vector<16x32xf32>
    %87 = vector.extract_strided_slice %78 {offsets = [3, 0, 0], sizes = [1, 16, 32], strides = [1, 1, 1]} : vector<4x16x32xf32> to vector<1x16x32xf32>
    %88 = vector.shape_cast %87 : vector<1x16x32xf32> to vector<16x32xf32>
    %89 = arith.addf %86, %88 : vector<16x32xf32>
    %c0_34 = arith.constant 0 : index
    %c0_35 = arith.constant 0 : index
    %c0_36 = arith.constant 0 : index
    %90 = vector.load %arg14[%c0_34, %c0_35, %c0_36] : memref<1x1x32xf32, #tpu.memory_space<vmem>>, vector<1x1x32xf32>
    %91 = vector.shape_cast %90 : vector<1x1x32xf32> to vector<1x32xf32>
    %92 = vector.broadcast %91 : vector<1x32xf32> to vector<16x32xf32>
    %93 = arith.addf %89, %92 : vector<16x32xf32>
    %94 = arith.addf %93, %3 : vector<16x32xf32>
    %c0_37 = arith.constant 0 : index
    %c0_38 = arith.constant 0 : index
    %c0_39 = arith.constant 0 : index
    %95 = vector.load %arg15[%c0_37, %c0_38, %c0_39] : memref<1x1x32xf32, #tpu.memory_space<vmem>>, vector<1x1x32xf32>
    %96 = vector.shape_cast %95 : vector<1x1x32xf32> to vector<1x32xf32>
    %c0_40 = arith.constant 0 : index
    %c0_41 = arith.constant 0 : index
    %c0_42 = arith.constant 0 : index
    %97 = vector.load %arg16[%c0_40, %c0_41, %c0_42] : memref<1x1x32xf32, #tpu.memory_space<vmem>>, vector<1x1x32xf32>
    %98 = vector.shape_cast %97 : vector<1x1x32xf32> to vector<1x32xf32>
    %cst_43 = arith.constant dense<0.000000e+00> : vector<16xf32>
    %99 = vector.multi_reduction <add>, %94, %cst_43 [1] : vector<16x32xf32> to vector<16xf32>
    %100 = vector.shape_cast %99 : vector<16xf32> to vector<16x1xf32>
    %cst_44 = arith.constant 3.200000e+01 : f32
    %101 = vector.broadcast %cst_44 : f32 to vector<16x1xf32>
    %102 = arith.divf %100, %101 : vector<16x1xf32>
    %103 = vector.broadcast %102 : vector<16x1xf32> to vector<16x32xf32>
    %104 = arith.subf %94, %103 : vector<16x32xf32>
    %105 = arith.mulf %104, %104 : vector<16x32xf32>
    %cst_45 = arith.constant dense<0.000000e+00> : vector<16xf32>
    %106 = vector.multi_reduction <add>, %105, %cst_45 [1] : vector<16x32xf32> to vector<16xf32>
    %107 = vector.shape_cast %106 : vector<16xf32> to vector<16x1xf32>
    %cst_46 = arith.constant 3.200000e+01 : f32
    %108 = vector.broadcast %cst_46 : f32 to vector<16x1xf32>
    %109 = arith.divf %107, %108 : vector<16x1xf32>
    %110 = vector.broadcast %102 : vector<16x1xf32> to vector<16x32xf32>
    %111 = arith.subf %94, %110 : vector<16x32xf32>
    %cst_47 = arith.constant 9.99999974E-6 : f32
    %112 = vector.broadcast %cst_47 : f32 to vector<16x1xf32>
    %113 = arith.addf %109, %112 : vector<16x1xf32>
    %114 = math.rsqrt %113 : vector<16x1xf32>
    %115 = vector.broadcast %114 : vector<16x1xf32> to vector<16x32xf32>
    %116 = arith.mulf %111, %115 : vector<16x32xf32>
    %117 = vector.broadcast %96 : vector<1x32xf32> to vector<16x32xf32>
    %118 = arith.mulf %116, %117 : vector<16x32xf32>
    %119 = vector.broadcast %98 : vector<1x32xf32> to vector<16x32xf32>
    %120 = arith.addf %118, %119 : vector<16x32xf32>
    %121 = arith.truncf %120 : vector<16x32xf32> to vector<16x32xbf16>
    %c0_48 = arith.constant 0 : index
    %c0_49 = arith.constant 0 : index
    %c0_50 = arith.constant 0 : index
    %122 = vector.load %arg17[%c0_48, %c0_49, %c0_50] : memref<1x32x32xbf16, #tpu.memory_space<vmem>>, vector<1x32x32xbf16>
    %123 = vector.shape_cast %122 : vector<1x32x32xbf16> to vector<32x32xbf16>
    %cst_51 = arith.constant dense<0.000000e+00> : vector<16x32xf32>
    %124 = tpu.matmul %121, %123, %cst_51 {dimension_numbers = #tpu.dot_dimension_numbers<[1], [0], [0], [1], [0, 0, 1, 1], [], []>} : vector<16x32xbf16>, vector<32x32xbf16>, vector<16x32xf32> -> vector<16x32xf32>
    %c0_52 = arith.constant 0 : index
    %c0_53 = arith.constant 0 : index
    %c0_54 = arith.constant 0 : index
    %125 = vector.load %arg18[%c0_52, %c0_53, %c0_54] : memref<1x1x32xf32, #tpu.memory_space<vmem>>, vector<1x1x32xf32>
    %126 = vector.shape_cast %125 : vector<1x1x32xf32> to vector<1x32xf32>
    %127 = vector.broadcast %126 : vector<1x32xf32> to vector<16x32xf32>
    %128 = arith.addf %124, %127 : vector<16x32xf32>
    %cst_55 = arith.constant 0.000000e+00 : f32
    %129 = vector.broadcast %cst_55 : f32 to vector<16x32xf32>
    %130 = arith.maximumf %128, %129 : vector<16x32xf32>
    %131 = arith.truncf %130 : vector<16x32xf32> to vector<16x32xbf16>
    %c0_56 = arith.constant 0 : index
    %c0_57 = arith.constant 0 : index
    %c0_58 = arith.constant 0 : index
    %132 = vector.load %arg19[%c0_56, %c0_57, %c0_58] : memref<1x32x32xbf16, #tpu.memory_space<vmem>>, vector<1x32x32xbf16>
    %133 = vector.shape_cast %132 : vector<1x32x32xbf16> to vector<32x32xbf16>
    %cst_59 = arith.constant dense<0.000000e+00> : vector<16x32xf32>
    %134 = tpu.matmul %131, %133, %cst_59 {dimension_numbers = #tpu.dot_dimension_numbers<[1], [0], [0], [1], [0, 0, 1, 1], [], []>} : vector<16x32xbf16>, vector<32x32xbf16>, vector<16x32xf32> -> vector<16x32xf32>
    %c0_60 = arith.constant 0 : index
    %c0_61 = arith.constant 0 : index
    %c0_62 = arith.constant 0 : index
    %135 = vector.load %arg20[%c0_60, %c0_61, %c0_62] : memref<1x1x32xf32, #tpu.memory_space<vmem>>, vector<1x1x32xf32>
    %136 = vector.shape_cast %135 : vector<1x1x32xf32> to vector<1x32xf32>
    %137 = vector.broadcast %136 : vector<1x32xf32> to vector<16x32xf32>
    %138 = arith.addf %134, %137 : vector<16x32xf32>
    %139 = arith.addf %138, %120 : vector<16x32xf32>
    %c0_63 = arith.constant 0 : index
    %c0_64 = arith.constant 0 : index
    %c0_65 = arith.constant 0 : index
    %140 = vector.load %arg21[%c0_63, %c0_64, %c0_65] : memref<1x1x32xf32, #tpu.memory_space<vmem>>, vector<1x1x32xf32>
    %141 = vector.shape_cast %140 : vector<1x1x32xf32> to vector<1x32xf32>
    %c0_66 = arith.constant 0 : index
    %c0_67 = arith.constant 0 : index
    %c0_68 = arith.constant 0 : index
    %142 = vector.load %arg22[%c0_66, %c0_67, %c0_68] : memref<1x1x32xf32, #tpu.memory_space<vmem>>, vector<1x1x32xf32>
    %143 = vector.shape_cast %142 : vector<1x1x32xf32> to vector<1x32xf32>
    %cst_69 = arith.constant dense<0.000000e+00> : vector<16xf32>
    %144 = vector.multi_reduction <add>, %139, %cst_69 [1] : vector<16x32xf32> to vector<16xf32>
    %145 = vector.shape_cast %144 : vector<16xf32> to vector<16x1xf32>
    %cst_70 = arith.constant 3.200000e+01 : f32
    %146 = vector.broadcast %cst_70 : f32 to vector<16x1xf32>
    %147 = arith.divf %145, %146 : vector<16x1xf32>
    %148 = vector.broadcast %147 : vector<16x1xf32> to vector<16x32xf32>
    %149 = arith.subf %139, %148 : vector<16x32xf32>
    %150 = arith.mulf %149, %149 : vector<16x32xf32>
    %cst_71 = arith.constant dense<0.000000e+00> : vector<16xf32>
    %151 = vector.multi_reduction <add>, %150, %cst_71 [1] : vector<16x32xf32> to vector<16xf32>
    %152 = vector.shape_cast %151 : vector<16xf32> to vector<16x1xf32>
    %cst_72 = arith.constant 3.200000e+01 : f32
    %153 = vector.broadcast %cst_72 : f32 to vector<16x1xf32>
    %154 = arith.divf %152, %153 : vector<16x1xf32>
    %155 = vector.broadcast %147 : vector<16x1xf32> to vector<16x32xf32>
    %156 = arith.subf %139, %155 : vector<16x32xf32>
    %cst_73 = arith.constant 9.99999974E-6 : f32
    %157 = vector.broadcast %cst_73 : f32 to vector<16x1xf32>
    %158 = arith.addf %154, %157 : vector<16x1xf32>
    %159 = math.rsqrt %158 : vector<16x1xf32>
    %160 = vector.broadcast %159 : vector<16x1xf32> to vector<16x32xf32>
    %161 = arith.mulf %156, %160 : vector<16x32xf32>
    %162 = vector.broadcast %141 : vector<1x32xf32> to vector<16x32xf32>
    %163 = arith.mulf %161, %162 : vector<16x32xf32>
    %164 = vector.broadcast %143 : vector<1x32xf32> to vector<16x32xf32>
    %165 = arith.addf %163, %164 : vector<16x32xf32>
    %c0_74 = arith.constant 0 : index
    %c0_75 = arith.constant 0 : index
    %166 = vector.load %arg23[%c0_74, %c0_75] : memref<16x32xf32, #tpu.memory_space<vmem>>, vector<16x32xf32>
    tpu.vector_store %arg23[%c0_74, %c0_75], %165 {strides = array<i32>} : memref<16x32xf32, #tpu.memory_space<vmem>>, vector<16x32xf32>,
    return
  }
  func.func @transform_0(%arg0: i32, %arg1: i32) -> (i32, i32) {
    %c0_i32 = arith.constant 0 : i32
    %c0_i32_0 = arith.constant 0 : i32
    return %arg0, %c0_i32 : i32, i32
  }
  func.func @transform_1(%arg0: i32, %arg1: i32) -> (i32, i32) {
    %c0_i32 = arith.constant 0 : i32
    %c0_i32_0 = arith.constant 0 : i32
    %c0_i32_1 = arith.constant 0 : i32
    return %c0_i32, %c0_i32_0 : i32, i32
  }
  func.func @transform_2(%arg0: i32, %arg1: i32) -> (i32, i32) {
    %c0_i32 = arith.constant 0 : i32
    %c0_i32_0 = arith.constant 0 : i32
    %c0_i32_1 = arith.constant 0 : i32
    return %c0_i32, %c0_i32_0 : i32, i32
  }
  func.func @transform_3(%arg0: i32, %arg1: i32) -> (i32, i32) {
    %c0_i32 = arith.constant 0 : i32
    %c0_i32_0 = arith.constant 0 : i32
    %c0_i32_1 = arith.constant 0 : i32
    return %c0_i32, %c0_i32_0 : i32, i32
  }
  func.func @transform_4(%arg0: i32, %arg1: i32) -> (i32, i32) {
    %c0_i32 = arith.constant 0 : i32
    %c0_i32_0 = arith.constant 0 : i32
    %c0_i32_1 = arith.constant 0 : i32
    return %c0_i32, %c0_i32_0 : i32, i32
  }
  func.func @transform_5(%arg0: i32, %arg1: i32) -> (i32, i32, i32) {
    %c0_i32 = arith.constant 0 : i32
    %c0_i32_0 = arith.constant 0 : i32
    %c0_i32_1 = arith.constant 0 : i32
    return %arg1, %c0_i32, %c0_i32_0 : i32, i32, i32
  }
  func.func @transform_6(%arg0: i32, %arg1: i32) -> (i32, i32, i32) {
    %c0_i32 = arith.constant 0 : i32
    %c0_i32_0 = arith.constant 0 : i32
    %c0_i32_1 = arith.constant 0 : i32
    return %arg1, %c0_i32, %c0_i32_0 : i32, i32, i32
  }
  func.func @transform_7(%arg0: i32, %arg1: i32) -> (i32, i32, i32) {
    %c0_i32 = arith.constant 0 : i32
    %c0_i32_0 = arith.constant 0 : i32
    %c0_i32_1 = arith.constant 0 : i32
    return %arg1, %c0_i32, %c0_i32_0 : i32, i32, i32
  }
  func.func @transform_8(%arg0: i32, %arg1: i32) -> (i32, i32, i32) {
    %c0_i32 = arith.constant 0 : i32
    %c0_i32_0 = arith.constant 0 : i32
    %c0_i32_1 = arith.constant 0 : i32
    return %arg1, %c0_i32, %c0_i32_0 : i32, i32, i32
  }
  func.func @transform_9(%arg0: i32, %arg1: i32) -> (i32, i32, i32) {
    %c0_i32 = arith.constant 0 : i32
    %c0_i32_0 = arith.constant 0 : i32
    %c0_i32_1 = arith.constant 0 : i32
    return %arg1, %c0_i32, %c0_i32_0 : i32, i32, i32
  }
  func.func @transform_10(%arg0: i32, %arg1: i32) -> (i32, i32, i32) {
    %c0_i32 = arith.constant 0 : i32
    %c0_i32_0 = arith.constant 0 : i32
    %c0_i32_1 = arith.constant 0 : i32
    return %arg1, %c0_i32, %c0_i32_0 : i32, i32, i32
  }
  func.func @transform_11(%arg0: i32, %arg1: i32) -> (i32, i32, i32, i32) {
    %c0_i32 = arith.constant 0 : i32
    %c0_i32_0 = arith.constant 0 : i32
    %c0_i32_1 = arith.constant 0 : i32
    %c0_i32_2 = arith.constant 0 : i32
    return %arg1, %c0_i32, %c0_i32_0, %c0_i32_1 : i32, i32, i32, i32
  }
  func.func @transform_12(%arg0: i32, %arg1: i32) -> (i32, i32, i32) {
    %c0_i32 = arith.constant 0 : i32
    %c0_i32_0 = arith.constant 0 : i32
    %c0_i32_1 = arith.constant 0 : i32
    return %arg1, %c0_i32, %c0_i32_0 : i32, i32, i32
  }
  func.func @transform_13(%arg0: i32, %arg1: i32) -> (i32, i32, i32) {
    %c0_i32 = arith.constant 0 : i32
    %c0_i32_0 = arith.constant 0 : i32
    %c0_i32_1 = arith.constant 0 : i32
    return %arg1, %c0_i32, %c0_i32_0 : i32, i32, i32
  }
  func.func @transform_14(%arg0: i32, %arg1: i32) -> (i32, i32, i32) {
    %c0_i32 = arith.constant 0 : i32
    %c0_i32_0 = arith.constant 0 : i32
    %c0_i32_1 = arith.constant 0 : i32
    return %arg1, %c0_i32, %c0_i32_0 : i32, i32, i32
  }
  func.func @transform_15(%arg0: i32, %arg1: i32) -> (i32, i32, i32) {
    %c0_i32 = arith.constant 0 : i32
    %c0_i32_0 = arith.constant 0 : i32
    %c0_i32_1 = arith.constant 0 : i32
    return %arg1, %c0_i32, %c0_i32_0 : i32, i32, i32
  }
  func.func @transform_16(%arg0: i32, %arg1: i32) -> (i32, i32, i32) {
    %c0_i32 = arith.constant 0 : i32
    %c0_i32_0 = arith.constant 0 : i32
    %c0_i32_1 = arith.constant 0 : i32
    return %arg1, %c0_i32, %c0_i32_0 : i32, i32, i32
  }
  func.func @transform_17(%arg0: i32, %arg1: i32) -> (i32, i32, i32) {
    %c0_i32 = arith.constant 0 : i32
    %c0_i32_0 = arith.constant 0 : i32
    %c0_i32_1 = arith.constant 0 : i32
    return %arg1, %c0_i32, %c0_i32_0 : i32, i32, i32
  }
  func.func @transform_18(%arg0: i32, %arg1: i32) -> (i32, i32, i32) {
    %c0_i32 = arith.constant 0 : i32
    %c0_i32_0 = arith.constant 0 : i32
    %c0_i32_1 = arith.constant 0 : i32
    return %arg1, %c0_i32, %c0_i32_0 : i32, i32, i32
  }
  func.func @transform_19(%arg0: i32, %arg1: i32) -> (i32, i32, i32) {
    %c0_i32 = arith.constant 0 : i32
    %c0_i32_0 = arith.constant 0 : i32
    %c0_i32_1 = arith.constant 0 : i32
    return %arg1, %c0_i32, %c0_i32_0 : i32, i32, i32
  }
  func.func @transform_20(%arg0: i32, %arg1: i32) -> (i32, i32, i32) {
    %c0_i32 = arith.constant 0 : i32
    %c0_i32_0 = arith.constant 0 : i32
    %c0_i32_1 = arith.constant 0 : i32
    return %arg1, %c0_i32, %c0_i32_0 : i32, i32, i32
  }
  func.func @transform_21(%arg0: i32, %arg1: i32) -> (i32, i32) {
    %c0_i32 = arith.constant 0 : i32
    %c0_i32_0 = arith.constant 0 : i32
    return %arg0, %c0_i32 : i32, i32
  }
}

</mosaic_0001>

<bundles_post_ra>
// kernel: tpu_custom_call.1
= control target key start
LH: loop header
LB: loop body
LE: loop exit
PB: predicated region body
PF: predicated region fallthrough
CT: control target
= control target key end

     0   :  { %s4737_s0 = inlined_call_operand.vmem [shape: f32[32,16], index: 0, kind: input, shape index: {}]   ;;  %s4738_s1 = inlined_call_operand.hbm [shape: f32[16,32], index: 1, kind: input, shape index: {}]   ;;  %s4739_s2 = inlined_call_operand.hbm [shape: f32[16,16], index: 2, kind: input, shape index: {}]   ;;  %s4740_s3 = inlined_call_operand.hbm [shape: bf16[16,32], index: 3, kind: input, shape index: {}]   ;;  %s4741_s4 = inlined_call_operand.hbm [shape: f32[1,32], index: 4, kind: input, shape index: {}]   ;;  %s4742_s5 = inlined_call_operand.vmem [shape: bf16[2,32,32], index: 5, kind: input, shape index: {}]   ;;  %s4743_s6 = inlined_call_operand.hbm [shape: f32[2,1,32], index: 6, kind: input, shape index: {}]   ;;  %s4744_s7 = inlined_call_operand.vmem [shape: bf16[2,32,32], index: 7, kind: input, shape index: {}]   ;;  %s4745_s8 = inlined_call_operand.hbm [shape: f32[2,1,32], index: 8, kind: input, shape index: {}]   ;;  %s4746_s9 = inlined_call_operand.hbm [shape: bf16[2,32,32], index: 9, kind: input, shape index: {}]   ;;  %s4747_s10 = inlined_call_operand.hbm [shape: f32[2,1,32], index: 10, kind: input, shape index: {}]   ;;  %s4748_s11 = inlined_call_operand.hbm [shape: bf16[2,4,8,32], index: 11, kind: input, shape index: {}]   ;;  %s4749_s12 = inlined_call_operand.hbm [shape: f32[2,1,32], index: 12, kind: input, shape index: {}]   ;;  %s4750_s13 = inlined_call_operand.hbm [shape: f32[2,1,32], index: 13, kind: input, shape index: {}]   ;;  %s4751_s14 = inlined_call_operand.vmem [shape: f32[2,1,32], index: 14, kind: input, shape index: {}]   ;;  %s4752_s15 = inlined_call_operand.vmem [shape: bf16[2,32,32], index: 15, kind: input, shape index: {}]   ;;  %s4753_s16 = inlined_call_operand.vmem [shape: f32[2,1,32], index: 16, kind: input, shape index: {}]   ;;  %s4754_s17 = inlined_call_operand.hbm [shape: bf16[2,32,32], index: 17, kind: input, shape index: {}]   ;;  %s4755_s18 = inlined_call_operand.vmem [shape: f32[2,1,32], index: 18, kind: input, shape index: {}]   ;;  %s4756_s19 = inlined_call_operand.vmem [shape: f32[2,1,32], index: 19, kind: input, shape index: {}]   ;;  %s4757_s20 = inlined_call_operand.vmem [shape: f32[2,1,32], index: 20, kind: input, shape index: {}]   ;;  %s4758_s21 = inlined_call_operand.hbm [shape: f32[32,32], index: 21, kind: output, shape index: {}]  }
   0x1   :  { %4805 = sst [smem:[#allocation42_spill]] %s4737_s0 }
   0x2   :  { %4806 = sst [smem:[#allocation43_spill]] %s4738_s1 }
   0x3   :  { %4807 = sst [smem:[#allocation44_spill]] %s4739_s2 }
   0x4   :  { %4808 = sst [smem:[#allocation45_spill]] %s4740_s3 }
   0x5   :  { %4809 = sst [smem:[#allocation46_spill]] %s4741_s4 }
   0x6   :  { %4810 = sst [smem:[#allocation47_spill]] %s4742_s5 }
   0x7   :  { %4811 = sst [smem:[#allocation48_spill]] %s4743_s6 }
   0x8   :  { %4812 = sst [smem:[#allocation49_spill]] %s4744_s7 }
   0x9   :  { %4813 = sst [smem:[#allocation50_spill]] %s4745_s8 }
   0xa   :  { %4814 = sst [smem:[#allocation51_spill]] %s4746_s9 }
   0xb   :  { %4815 = sst [smem:[#allocation52_spill]] %s4747_s10 }
   0xc   :  { %4816 = sst [smem:[#allocation53_spill]] %s4748_s11 }
   0xd   :  { %4817 = sst [smem:[#allocation54_spill]] %s4749_s12 }
   0xe   :  { %4818 = sst [smem:[#allocation55_spill]] %s4750_s13 }
   0xf   :  { %4819 = sst [smem:[#allocation56_spill]] %s4751_s14 }
  0x10   :  { %4820 = sst [smem:[#allocation57_spill]] %s4752_s15 }
  0x11   :  { %4821 = sst [smem:[#allocation58_spill]] %s4753_s16 }
  0x12   :  { %4822 = sst [smem:[#allocation59_spill]] %s4754_s17 }
  0x13   :  { %4823 = sst [smem:[#allocation60_spill]] %s4755_s18 }
  0x14   :  { %4824 = sst [smem:[#allocation61_spill]] %s4756_s19 }
  0x15   :  { %4825 = sst [smem:[#allocation62_spill]] %s4757_s20 }
  0x16   :  { %4826 = sst [smem:[#allocation63_spill]] %s4758_s21 }
  0x17   :  { %26 = vsyncpa [#allocation3], 0 }
  0x18   :  { %27 = vsyncpa [#allocation6], 0 }
  0x19   :  { %28 = vsyncpa [#allocation9], 0 }
  0x1a   :  { %29 = vsyncpa [#allocation4], 0 }
  0x1b   :  { %31 = vsyncpa [#allocation4 + $0x1], 0  ;;  %s3906_s2 = smov 0   ;;  %s3908_s25 = smov 0  }
  0x1c   :  { %s3910_s26 = smov 0   ;;  %s3912_s27 = smov 0  }
  0x1d   :  { %s3914_s3 = smov 0   ;;  %s3916_s28 = smov 0  }
  0x1e   :  { %s3918_s29 = smov 0   ;;  %s3920_s0 = smov 0  }
  0x1f   :  { %s3922_s4 = smov 0   ;;  %s3924_s30 = smov 0  }
  0x20   :  { %s3926_s5 = smov 0  }
  0x21 LB: > { %4827 = sst [smem:[#allocation24_spill]] %s3728_s2  ;;  %s3960_s22 = sadd.s32 4294967295, %s3768_s5   ;;  %s3768_s5 = sphi %s3926_s5, %s37_s5   ;;  %s3764_s30 = sphi %s3924_s30, %s4929_s30   ;;  %s3760_s4 = sphi %s3922_s4, %s4928_s4   ;;  %s3756_s0 = sphi %s3920_s0, %s4927_s0   ;;  %s3752_s29 = sphi %s3918_s29, %s4926_s29   ;;  %s3748_s28 = sphi %s3916_s28, %s4925_s28   ;;  %s3744_s3 = sphi %s3914_s3, %s4924_s3   ;;  %s3740_s27 = sphi %s3912_s27, %s4923_s27   ;;  %s3736_s26 = sphi %s3910_s26, %s4922_s26   ;;  %s3732_s25 = sphi %s3908_s25, %s4921_s25   ;;  %s3728_s2 = sphi %s3906_s2, %s4920_s2  }
  0x22   : > { %4828 = sst [smem:[#allocation25_spill]] %s3732_s25  ;;  %s2745_s23 = sadd.s32 4294967294, %s3768_s5  }
  0x23   : > { %4829 = sst [smem:[#allocation26_spill]] %s3736_s26  ;;  %p205_p0 = scmp.ne.s32.totalorder %s3744_s3, %s3740_s27 }
  0x24   : > { %4830 = sst [smem:[#allocation27_spill]] %s3744_s3  ;;  %p4768_p1 = scmp.eq.s32.totalorder %s3960_s22, 0 }
  0x25   : > { %4831 = sst [smem:[#allocation28_spill]] %s3748_s28  ;;  %p592_p2 = scmp.ne.s32.totalorder %s3736_s26, %s3732_s25 }
  0x26   : > { %4832 = sst [smem:[#allocation29_spill]] %s3752_s29  ;;  %p3970_p3 = por %p4768_p1, %p205_p0 }
  0x27   : > { %4833 = sst [smem:[#allocation30_spill]] %s3756_s0  ;;  %p593_p4 = scmp.eq.s32.totalorder %s3960_s22, 3 }
  0x28   : > { %4834 = sst [smem:[#allocation31_spill]] %s3760_s4  ;;  %p598_p5 = scmp.ne.s32.totalorder %s3732_s25, %s3728_s2 }
  0x29   : > { %4835 = sst [smem:[#allocation32_spill]] %s3764_s30  ;;  %p599_p6 = scmp.eq.s32.totalorder %s2745_s23, 3 }
  0x2a   : > { %4836 = sst [smem:[#allocation33_spill]] %s3768_s5  ;;  %p3977_p7 = por %p593_p4, %p592_p2 }
  0x2b   : > { %4837 = sst [smem:[#allocation34_spill]] %s3960_s22  ;;  %p2746_p8 = scmp.ge.s32.totalorder %s3768_s5, 1 }
  0x2c   : > { %s4838_s24 = scalar_select %p3970_p3, 1, 0 }
  0x2d   : > { %s4840_s21 = scalar_select %p3977_p7, 1, 0 }
  0x2e   : > { %4839 = sst [smem:[#allocation35_spill]] %s4838_s24  ;;  %p3982_p9 = por %p599_p6, %p598_p5 }
  0x2f   : > { %4841 = sst [smem:[#allocation36_spill]] %s4840_s21  ;;  %p606_p10 = scmp.lt.s32.totalorder %s3768_s5, 5 }
  0x30   : > { %s4842_s20 = scalar_select %p3982_p9, 1, 0 }
  0x31   : > { %p3987_p11 = pnand %p2746_p8, %p606_p10  ;;  %s3770_s1 = smov [#allocation2]  }
  0x32   : > { %4843 = sst [smem:[#allocation37_spill]] %s4842_s20  ;;  %s618_s19 = sshll.u32 %s3770_s1, 4  ;;  %s619_s19 = int_to_ptr.vmem [resolvable:$true] %s618_s19 }
  0x33   : > { %s4844_s27 = scalar_select %p3987_p11, 1, 0 }
  0x34   : > { %p3029_p12 = pneg %p3987_p11  ;;  %s4846_s18 = sld [smem:[#allocation43_spill]] }
  0x36   : > { %p3995_p13 = pnand %p3029_p12, %p4768_p1 }
  0x38   : > { %s4845_s23 = scalar_select %p3995_p13, 1, 0 }
  0x39   : > { %p4007_p2 = pneg %p3995_p13 }
  0x3a   : > { %s3282_s20 = scalar_lea.hbm %s4846_s18, 256 }
  0x3b   : > { %p3283_p0 = scmp.ne.s32.totalorder %s4846_s18, %s3282_s20  ;;  %p3289_p6 = scmp.lt.u32.totalorder %s3282_s20, %s4846_s18 }
  0x3c   : > { %s4847_s1 = scalar_select %p4007_p2, 1, 0 }
  0x3d   : > { %p3285_p4 = pnand %p4007_p2, %p3283_p0 }
  0x3f   : > { %p3286_p5 = pneg %p3285_p4 }
  0x41   : > { %p3291_p8 = pnand %p3289_p6, %p3286_p5 }
  0x43   : > { %3294 = shalt.err (!%p3291_p8)
}
  0x44   : > { %s3295_s21 = scalar_lea.vmem %s619_s19, 256  ;;  %p3303_p9 = scmp.lt.s32.totalorder %s619_s19, %s619_s19 }
  0x45   : > { %p3296_p10 = scmp.ne.s32.totalorder %s619_s19, %s3295_s21  ;;  %p3304_p7 = scmp.lt.s32.totalorder %s3295_s21, %s3295_s21 }
  0x47   : > { %p3298_p12 = pnand %p3296_p10, %p4007_p2  ;;  %p3305_p3 = por %p3304_p7, %p3303_p9 }
  0x49   : > { %p3299_p1 = pneg %p3298_p12 }
  0x4b   : > { %p3306_p11 = pnand %p3305_p3, %p3299_p1 }
  0x4d   : > { %3309 = shalt.err (!%p3306_p11)
}
  0x4e   : > { %s4773_s15 = smov 128   ;;  %s4774_s7 = smov 8  }
  0x4f   : > { %3032 = dma.hbm_to_vmem [thread:$0]  (!%p3995_p13), %s4846_s18, 256, %s619_s19, [#allocation3], %s4773_s15, %s4773_s15, %s4774_s7  }
  0x50   : > { %s46_s20 = sadd.s32 1, %s3760_s4  ;;  %s49_s2 = sadd.s32 1, %s3764_s30 }
  0x51   : > { %p47_p1 = scmp.ge.s32.totalorder %s46_s20, 2  ;;  %s192_s21 = sadd.s32 1, %s3748_s28 }
  0x52   : > { %p199_p3 = scmp.ne.s32.totalorder %s3748_s28, %s3744_s3  ;;  %p200_p7 = scmp.eq.s32.totalorder %s3768_s5, 0 }
  0x53   : > { %s4931_s20 = smov (%p47_p1, %s46_s20), 0  ;;  %s4933_s2 = smov (!%p47_p1, %s49_s2), %s3764_s30 }
  0x54   : > { %4848 = sst [smem:[#allocation38_spill]] %s4931_s20  ;;  %s189_s29 = ssub.s32 %s3760_s4, %s4931_s20 }
  0x55   : > { %p51_p9 = scmp.ge.s32.totalorder %s4933_s2, 2  ;;  %p190_p11 = scmp.eq.s32.totalorder %s189_s29, 0 }
  0x56   : > { %p4037_p0 = por %p200_p7, %p199_p3  ;;  %p3075_p4 = scmp.lt.s32.totalorder %s3768_s5, 4 }
  0x57   : > { %s4935_s2 = smov (%p51_p9, %s4933_s2), 0  ;;  %s686_s15 = sand.u32 1, %s3768_s5  }
  0x58   : > { %4850 = sst [smem:[#allocation39_spill]] %s4935_s2  ;;  %s579_s16 = ssub.s32 %s3764_s30, %s4935_s2 }
  0x59   : > { %s4045_s14 = scalar_select %p190_p11, %s3748_s28, %s192_s21  }
  0x5a   : > { %p580_p5 = scmp.eq.s32.totalorder %s579_s16, 0  ;;  %s4051_s7 = sand.u32 1, %s3748_s28  }
  0x5b   : > { %4851 = sst [smem:[#allocation40_spill]] %s4045_s14  ;;  %s4054_s18 = sshll.u32 %s3760_s4, 4 }
  0x5c   : > { %s4852_s29 = sadd.s32 1, %s3736_s26  ;;  %s4854_s6 = sld [smem:[#allocation48_spill]] }
  0x5d   : > { %s4059_s20 = scalar_select %p580_p5, %s3736_s26, %s4852_s29  }
  0x5e   : > { %s689_s21 = scalar_lea.vmem [#allocation10], %s4051_s7  ;;  %p4070_p6 = pnand %p3075_p4, %p4037_p0 }
  0x5f   : > { %4853 = sst [smem:[#allocation41_spill]] %s4059_s20  ;;  %s696_s16 = sshll.u32 %s689_s21, 4  ;;  %s4074_s16 = int_to_ptr.vmem [resolvable:$true] %s696_s16 }
  0x60   : > { %s4855_s2 = scalar_select %p4070_p6, 1, 0 }
  0x61   : > { %s4856_s8 = sld [smem:[#allocation50_spill]]  ;;  %s4082_s0 = scalar_lea.sflag [#allocation3], %s686_s15 }
  0x62   : > { %s4065_s24 = scalar_lea.hbm %s4854_s6, %s4054_s18  ;;  %p4088_p10 = pneg %p4070_p6 }
  0x63   : > { %s3310_s14 = scalar_lea.hbm %s4065_s24, 16  ;;  %s3315_s20 = scalar_lea.hbm %s4854_s6, 32 }
  0x64   : > { %p3311_p8 = scmp.ne.s32.totalorder %s4065_s24, %s3310_s14  ;;  %p3316_p3 = scmp.lt.u32.totalorder %s4065_s24, %s4854_s6 }
  0x65   : > { %s4857_s21 = scalar_select %p4088_p10, 1, 0 }
  0x66   : > { %p3313_p12 = pnand %p4088_p10, %p3311_p8  ;;  %p3317_p7 = scmp.lt.u32.totalorder %s3315_s20, %s3310_s14 }
  0x67   : > { %s4080_s25 = scalar_lea.hbm %s4856_s8, %s4054_s18  ;;  %p3319_p11 = scmp.lt.u32.totalorder %s3310_s14, %s4065_s24 }
  0x68   : > { %p3314_p1 = pneg %p3313_p12  ;;  %p3318_p9 = por %p3317_p7, %p3316_p3 }
  0x6a   : > { %p3320_p0 = por %p3319_p11, %p3318_p9 }
  0x6c   : > { %p3321_p4 = pnand %p3320_p0, %p3314_p1 }
  0x6e   : > { %3324 = shalt.err (!%p3321_p4)
}
  0x6f   : > { %s3325_s15 = scalar_lea.vmem %s4074_s16, 16  ;;  %s3773_s28 = smov [#allocation10]  }
  0x70   : > { %p3326_p5 = scmp.ne.s32.totalorder %s4074_s16, %s3325_s15  ;;  %s3330_s19 = sshll.u32 %s3773_s28, 4  ;;  %s3331_s19 = int_to_ptr.vmem [resolvable:$false] %s3330_s19 }
  0x71   : > { %s3332_s30 = scalar_lea.vmem %s3331_s19, 32  ;;  %p3333_p13 = scmp.lt.s32.totalorder %s4074_s16, %s3331_s19 }
  0x72   : > { %p3328_p8 = pnand %p3326_p5, %p4088_p10  ;;  %p3334_p2 = scmp.lt.s32.totalorder %s3332_s30, %s3325_s15 }
  0x74   : > { %p3329_p12 = pneg %p3328_p8  ;;  %p3335_p3 = por %p3334_p2, %p3333_p13 }
  0x76   : > { %p3336_p7 = pnand %p3335_p3, %p3329_p12 }
  0x78   : > { %3339 = shalt.err (!%p3336_p7)
}
  0x79   : > { %3045 = dma.hbm_to_vmem [thread:$0]  (!%p4070_p6), %s4065_s24, 16, %s4074_s16, %s4082_s0  }
  0x7a   : > { %s714_s20 = scalar_lea.vmem [#allocation11], %s4051_s7  ;;  %s3340_s29 = scalar_lea.hbm %s4080_s25, 16 }
  0x7b   : > { %s721_s14 = sshll.u32 %s714_s20, 4  ;;  %p3341_p1 = scmp.ne.s32.totalorder %s4080_s25, %s3340_s29  ;;  %s722_s14 = int_to_ptr.vmem [resolvable:$true] %s721_s14 }
  0x7c   : > { %s3345_s19 = scalar_lea.hbm %s4856_s8, 32  ;;  %p3346_p9 = scmp.lt.u32.totalorder %s4080_s25, %s4856_s8 }
  0x7d   : > { %p3343_p13 = pnand %p3341_p1, %p4088_p10  ;;  %p3347_p11 = scmp.lt.u32.totalorder %s3345_s19, %s3340_s29 }
  0x7e   : > { %p3349_p4 = scmp.lt.u32.totalorder %s3340_s29, %s4080_s25 }
  0x7f   : > { %p3344_p2 = pneg %p3343_p13  ;;  %p3348_p0 = por %p3347_p11, %p3346_p9 }
  0x81   : > { %p3350_p5 = por %p3349_p4, %p3348_p0 }
  0x83   : > { %p3351_p8 = pnand %p3350_p5, %p3344_p2 }
  0x85   : > { %3354 = shalt.err (!%p3351_p8)
}
  0x86   : > { %s3355_s24 = scalar_lea.vmem %s722_s14, 16  ;;  %s3774_s16 = smov [#allocation11]  }
  0x87   : > { %p3356_p12 = scmp.ne.s32.totalorder %s722_s14, %s3355_s24  ;;  %s3360_s20 = sshll.u32 %s3774_s16, 4  ;;  %s3361_s20 = int_to_ptr.vmem [resolvable:$false] %s3360_s20 }
  0x88   : > { %s3362_s15 = scalar_lea.vmem %s3361_s20, 32  ;;  %p3363_p1 = scmp.lt.s32.totalorder %s722_s14, %s3361_s20 }
  0x89   : > { %p3358_p3 = pnand %p3356_p12, %p4088_p10  ;;  %p3364_p13 = scmp.lt.s32.totalorder %s3362_s15, %s3355_s24 }
  0x8b   : > { %p3359_p7 = pneg %p3358_p3  ;;  %p3365_p6 = por %p3364_p13, %p3363_p1 }
  0x8d   : > { %p3366_p9 = pnand %p3365_p6, %p3359_p7 }
  0x8f   : > { %3369 = shalt.err (!%p3366_p9)
}
  0x90   : > { %p4858_p11 = scmp.ne.s32.totalorder %s4855_s2, 0  ;;  %s4132_s6 = sshll.u32 %s4051_s7, 4 }
  0x91   : > { %s4135_s29 = sshll.u32 %s3760_s4, 8  ;;  %s4859_s9 = sld [smem:[#allocation51_spill]] }
  0x92   : > { %3048 = dma.hbm_to_vmem [thread:$0]  (!%p4858_p11), %s4080_s25, 16, %s722_s14, %s4082_s0  }
  0x93   : > { %s732_s24 = scalar_lea.vmem [#allocation12], %s4132_s6  ;;  %s4860_s10 = sld [smem:[#allocation52_spill]] }
  0x94   : > { %s739_s16 = sshll.u32 %s732_s24, 4  ;;  %s4144_s16 = int_to_ptr.vmem [resolvable:$true] %s739_s16 }
  0x97   : > { %s4141_s30 = scalar_lea.hbm %s4859_s9, %s4135_s29  ;;  %s3375_s8 = scalar_lea.hbm %s4859_s9, 512 }
  0x98   : > { %s3370_s15 = scalar_lea.hbm %s4141_s30, 256  ;;  %p3376_p4 = scmp.lt.u32.totalorder %s4141_s30, %s4859_s9 }
  0x99   : > { %s4150_s20 = scalar_lea.hbm %s4860_s10, %s4054_s18  ;;  %p3371_p6 = scmp.ne.s32.totalorder %s4141_s30, %s3370_s15 }
  0x9a   : > { %p3377_p5 = scmp.lt.u32.totalorder %s3375_s8, %s3370_s15  ;;  %p3379_p12 = scmp.lt.u32.totalorder %s3370_s15, %s4141_s30 }
  0x9b   : > { %p3373_p2 = pnand %p3371_p6, %p4088_p10 }
  0x9c   : > { %p3378_p8 = por %p3377_p5, %p3376_p4 }
  0x9d   : > { %p3374_p0 = pneg %p3373_p2 }
  0x9e   : > { %p3380_p3 = por %p3379_p12, %p3378_p8 }
  0xa0   : > { %p3381_p7 = pnand %p3380_p3, %p3374_p0 }
  0xa2   : > { %3384 = shalt.err (!%p3381_p7)
}
  0xa3   : > { %s3385_s24 = scalar_lea.vmem %s4144_s16, 256  ;;  %s3775_s25 = smov [#allocation12]  }
  0xa4   : > { %p3386_p1 = scmp.ne.s32.totalorder %s4144_s16, %s3385_s24  ;;  %s3390_s14 = sshll.u32 %s3775_s25, 4  ;;  %s3391_s14 = int_to_ptr.vmem [resolvable:$false] %s3390_s14 }
  0xa5   : > { %s3392_s26 = scalar_lea.vmem %s3391_s14, 512  ;;  %p3393_p6 = scmp.lt.s32.totalorder %s4144_s16, %s3391_s14 }
  0xa6   : > { %p3388_p13 = pnand %p3386_p1, %p4088_p10  ;;  %p3394_p2 = scmp.lt.s32.totalorder %s3392_s26, %s3385_s24 }
  0xa8   : > { %p3389_p9 = pneg %p3388_p13  ;;  %p3395_p4 = por %p3394_p2, %p3393_p6 }
  0xaa   : > { %p3396_p5 = pnand %p3395_p4, %p3389_p9 }
  0xac   : > { %3399 = shalt.err (!%p3396_p5)
}
  0xad   : > { %s3776_s8 = smov 64   ;;  %s3777_s4 = smov 4  }
  0xae   : > { %3051 = dma.hbm_to_vmem [thread:$0]  (!%p4858_p11), %s4141_s30, 256, %s4144_s16, %s4082_s0, %s3776_s8, %s3776_s8, %s3777_s4  }
  0xaf   : > { %s752_s15 = scalar_lea.vmem [#allocation13], %s4051_s7  ;;  %s4861_s11 = sld [smem:[#allocation53_spill]] }
  0xb0   : > { %s759_s28 = sshll.u32 %s752_s15, 4  ;;  %s3400_s14 = scalar_lea.hbm %s4150_s20, 16  ;;  %s760_s28 = int_to_ptr.vmem [resolvable:$true] %s759_s28 }
  0xb1   : > { %p3401_p0 = scmp.ne.s32.totalorder %s4150_s20, %s3400_s14  ;;  %s3405_s5 = scalar_lea.hbm %s4860_s10, 32 }
  0xb2   : > { %p3406_p3 = scmp.lt.u32.totalorder %s4150_s20, %s4860_s10  ;;  %p3407_p7 = scmp.lt.u32.totalorder %s3405_s5, %s3400_s14 }
  0xb3   : > { %p3403_p8 = pnand %p3401_p0, %p4088_p10  ;;  %p3409_p13 = scmp.lt.u32.totalorder %s3400_s14, %s4150_s20 }
  0xb4   : > { %p3408_p1 = por %p3407_p7, %p3406_p3 }
  0xb5   : > { %s4182_s25 = scalar_lea.hbm %s4861_s11, %s4135_s29  ;;  %p3404_p12 = pneg %p3403_p8 }
  0xb6   : > { %p3410_p9 = por %p3409_p13, %p3408_p1 }
  0xb8   : > { %p3411_p6 = pnand %p3410_p9, %p3404_p12 }
  0xba   : > { %3414 = shalt.err (!%p3411_p6)
}
  0xbb   : > { %s3415_s30 = scalar_lea.vmem %s760_s28, 16  ;;  %s3778_s16 = smov [#allocation13]  }
  0xbc   : > { %p3416_p2 = scmp.ne.s32.totalorder %s760_s28, %s3415_s30  ;;  %s3420_s15 = sshll.u32 %s3778_s16, 4  ;;  %s3421_s15 = int_to_ptr.vmem [resolvable:$false] %s3420_s15 }
  0xbd   : > { %s3422_s9 = scalar_lea.vmem %s3421_s15, 32  ;;  %p3423_p0 = scmp.lt.s32.totalorder %s760_s28, %s3421_s15 }
  0xbe   : > { %p3418_p4 = pnand %p3416_p2, %p4088_p10  ;;  %p3424_p8 = scmp.lt.s32.totalorder %s3422_s9, %s3415_s30 }
  0xc0   : > { %p3419_p5 = pneg %p3418_p4  ;;  %p3425_p11 = por %p3424_p8, %p3423_p0 }
  0xc2   : > { %p3426_p3 = pnand %p3425_p11, %p3419_p5 }
  0xc4   : > { %3429 = shalt.err (!%p3426_p3)
}
  0xc5   : > { %p4862_p7 = scmp.ne.s32.totalorder %s4855_s2, 0  ;;  %s770_s3 = scalar_lea.vmem [#allocation14], %s4132_s6 }
  0xc6   : > { %s777_s5 = sshll.u32 %s770_s3, 4  ;;  %s4863_s12 = sld [smem:[#allocation54_spill]]  ;;  %s4203_s5 = int_to_ptr.vmem [resolvable:$true] %s777_s5 }
  0xc7   : > { %3054 = dma.hbm_to_vmem [thread:$0]  (!%p4862_p7), %s4150_s20, 16, %s760_s28, %s4082_s0  }
  0xc8   : > { %s3430_s14 = scalar_lea.hbm %s4182_s25, 256  ;;  %s3435_s16 = scalar_lea.hbm %s4861_s11, 512 }
  0xc9   : > { %p3431_p11 = scmp.ne.s32.totalorder %s4182_s25, %s3430_s14  ;;  %p3436_p13 = scmp.lt.u32.totalorder %s4182_s25, %s4861_s11 }
  0xca   : > { %p3437_p9 = scmp.lt.u32.totalorder %s3435_s16, %s3430_s14  ;;  %p3439_p2 = scmp.lt.u32.totalorder %s3430_s14, %s4182_s25 }
  0xcb   : > { %p3433_p12 = pnand %p3431_p11, %p4088_p10 }
  0xcc   : > { %s4209_s24 = scalar_lea.hbm %s4863_s12, %s4054_s18  ;;  %p3438_p6 = por %p3437_p9, %p3436_p13 }
  0xcd   : > { %p3434_p1 = pneg %p3433_p12 }
  0xce   : > { %p3440_p4 = por %p3439_p2, %p3438_p6 }
  0xd0   : > { %p3441_p5 = pnand %p3440_p4, %p3434_p1 }
  0xd2   : > { %3444 = shalt.err (!%p3441_p5)
}
  0xd3   : > { %s3445_s28 = scalar_lea.vmem %s4203_s5, 256  ;;  %s3779_s9 = smov [#allocation14]  }
  0xd4   : > { %p3446_p0 = scmp.ne.s32.totalorder %s4203_s5, %s3445_s28  ;;  %s3450_s3 = sshll.u32 %s3779_s9, 4  ;;  %s3451_s3 = int_to_ptr.vmem [resolvable:$false] %s3450_s3 }
  0xd5   : > { %s3452_s22 = scalar_lea.vmem %s3451_s3, 512  ;;  %p3453_p11 = scmp.lt.s32.totalorder %s4203_s5, %s3451_s3 }
  0xd6   : > { %p3448_p8 = pnand %p3446_p0, %p4088_p10  ;;  %p3454_p12 = scmp.lt.s32.totalorder %s3452_s22, %s3445_s28 }
  0xd8   : > { %p3449_p3 = pneg %p3448_p8  ;;  %p3455_p13 = por %p3454_p12, %p3453_p11 }
  0xda   : > { %p3456_p9 = pnand %p3455_p13, %p3449_p3 }
  0xdc   : > { %3459 = shalt.err (!%p3456_p9)
}
  0xdd   : > { %3057 = dma.hbm_to_vmem [thread:$0]  (!%p4862_p7), %s4182_s25, 256, %s4203_s5, %s4082_s0, %s3776_s8, %s3776_s8, %s3777_s4  }
  0xde   : > { %s790_s19 = scalar_lea.vmem [#allocation15], %s4051_s7  ;;  %s3780_s26 = smov [#allocation5]  }
  0xdf   : > { %s797_s14 = sshll.u32 %s790_s19, 4  ;;  %s631_s30 = sshll.u32 %s3780_s26, 4  ;;  %s4237_s14 = int_to_ptr.vmem [resolvable:$true] %s797_s14  ;;  %s632_s30 = int_to_ptr.vmem [resolvable:$true] %s631_s30 }
  0xe0   : > { %s3460_s16 = scalar_lea.hbm %s4209_s24, 16  ;;  %s3465_s28 = scalar_lea.hbm %s4863_s12, 32 }
  0xe1   : > { %p3461_p1 = scmp.ne.s32.totalorder %s4209_s24, %s3460_s16  ;;  %p3466_p4 = scmp.lt.u32.totalorder %s4209_s24, %s4863_s12 }
  0xe2   : > { %p3467_p5 = scmp.lt.u32.totalorder %s3465_s28, %s3460_s16  ;;  %p3469_p8 = scmp.lt.u32.totalorder %s3460_s16, %s4209_s24 }
  0xe3   : > { %p3463_p6 = pnand %p3461_p1, %p4088_p10 }
  0xe4   : > { %p3468_p0 = por %p3467_p5, %p3466_p4 }
  0xe5   : > { %p3464_p2 = pneg %p3463_p6 }
  0xe6   : > { %p3470_p3 = por %p3469_p8, %p3468_p0 }
  0xe8   : > { %p3471_p11 = pnand %p3470_p3, %p3464_p2 }
  0xea   : > { %3474 = shalt.err (!%p3471_p11)
}
  0xeb   : > { %s3475_s25 = scalar_lea.vmem %s4237_s14, 16  ;;  %s3781_s5 = smov [#allocation15]  }
  0xec   : > { %p3476_p12 = scmp.ne.s32.totalorder %s4237_s14, %s3475_s25  ;;  %s3480_s22 = sshll.u32 %s3781_s5, 4  ;;  %s3481_s22 = int_to_ptr.vmem [resolvable:$false] %s3480_s22 }
  0xed   : > { %s3482_s19 = scalar_lea.vmem %s3481_s22, 32  ;;  %p3483_p1 = scmp.lt.s32.totalorder %s4237_s14, %s3481_s22 }
  0xee   : > { %p3478_p13 = pnand %p3476_p12, %p4088_p10  ;;  %p3484_p6 = scmp.lt.s32.totalorder %s3482_s19, %s3475_s25 }
  0xf0   : > { %p3479_p9 = pneg %p3478_p13  ;;  %p3485_p4 = por %p3484_p6, %p3483_p1 }
  0xf2   : > { %p3486_p5 = pnand %p3485_p4, %p3479_p9 }
  0xf4   : > { %3489 = shalt.err (!%p3486_p5)
}
  0xf5   : > { %3060 = dma.hbm_to_vmem [thread:$0]  (!%p4862_p7), %s4209_s24, 16, %s4237_s14, %s4082_s0  }
  0xf6   : > { %s4864_s15 = sld [smem:[#allocation44_spill]]  ;;  %p4865_p0 = scmp.ne.s32.totalorder %s4847_s1, 0 }
  0xfc   : > { %s3490_s20 = scalar_lea.hbm %s4864_s15, 256 }
  0xfd   : > { %p3491_p2 = scmp.ne.s32.totalorder %s4864_s15, %s3490_s20  ;;  %p3497_p11 = scmp.lt.u32.totalorder %s3490_s20, %s4864_s15 }
  0xff   : > { %p3493_p8 = pnand %p3491_p2, %p4865_p0 }
 0x101   : > { %p3494_p3 = pneg %p3493_p8 }
 0x103   : > { %p3499_p12 = pnand %p3497_p11, %p3494_p3 }
 0x105   : > { %3502 = shalt.err (!%p3499_p12)
}
 0x106   : > { %s3503_s5 = scalar_lea.vmem %s632_s30, 256  ;;  %p3511_p6 = scmp.lt.s32.totalorder %s632_s30, %s632_s30 }
 0x107   : > { %p3504_p13 = scmp.ne.s32.totalorder %s632_s30, %s3503_s5  ;;  %p3512_p4 = scmp.lt.s32.totalorder %s3503_s5, %s3503_s5 }
 0x109   : > { %p3506_p9 = pnand %p3504_p13, %p4865_p0  ;;  %p3513_p5 = por %p3512_p4, %p3511_p6 }
 0x10b   : > { %p3507_p1 = pneg %p3506_p9 }
 0x10d   : > { %p3514_p7 = pnand %p3513_p5, %p3507_p1 }
 0x10f   : > { %3517 = shalt.err (!%p3514_p7)
}
 0x110   : > { %p4866_p2 = scmp.ne.s32.totalorder %s4845_s23, 0  ;;  %s4867_s24 = smov 8  }
 0x111   : > { %s4868_s14 = smov 128   ;;  %s4869_s13 = sld [smem:[#allocation55_spill]] }
 0x112   : > { %3035 = dma.hbm_to_vmem [thread:$0]  (!%p4866_p2), %s4864_s15, 256, %s632_s30, [#allocation6], %s4868_s14, %s4868_s14, %s4867_s24  }
 0x113   : > { %s807_s28 = scalar_lea.vmem [#allocation16], %s4051_s7 }
 0x114   : > { %s814_s9 = sshll.u32 %s807_s28, 4  ;;  %s815_s9 = int_to_ptr.vmem [resolvable:$true] %s814_s9 }
 0x117   : > { %s4286_s20 = scalar_lea.hbm %s4869_s13, %s4054_s18  ;;  %s3523_s30 = scalar_lea.hbm %s4869_s13, 32 }
 0x118   : > { %s3518_s3 = scalar_lea.hbm %s4286_s20, 16  ;;  %p3524_p11 = scmp.lt.u32.totalorder %s4286_s20, %s4869_s13 }
 0x119   : > { %p3519_p7 = scmp.ne.s32.totalorder %s4286_s20, %s3518_s3  ;;  %p3525_p12 = scmp.lt.u32.totalorder %s3523_s30, %s3518_s3 }
 0x11a   : > { %p3527_p9 = scmp.lt.u32.totalorder %s3518_s3, %s4286_s20 }
 0x11b   : > { %p3521_p8 = pnand %p3519_p7, %p4088_p10  ;;  %p3526_p13 = por %p3525_p12, %p3524_p11 }
 0x11d   : > { %p3522_p3 = pneg %p3521_p8  ;;  %p3528_p1 = por %p3527_p9, %p3526_p13 }
 0x11f   : > { %p3529_p6 = pnand %p3528_p1, %p3522_p3 }
 0x121   : > { %3532 = shalt.err (!%p3529_p6)
}
 0x122   : > { %s3533_s18 = scalar_lea.vmem %s815_s9, 16  ;;  %s3782_s7 = smov [#allocation16]  }
 0x123   : > { %p3534_p4 = scmp.ne.s32.totalorder %s815_s9, %s3533_s18  ;;  %s3538_s22 = sshll.u32 %s3782_s7, 4  ;;  %s3539_s22 = int_to_ptr.vmem [resolvable:$false] %s3538_s22 }
 0x124   : > { %s3540_s19 = scalar_lea.vmem %s3539_s22, 32  ;;  %p3541_p8 = scmp.lt.s32.totalorder %s815_s9, %s3539_s22 }
 0x125   : > { %p3536_p5 = pnand %p3534_p4, %p4088_p10  ;;  %p3542_p2 = scmp.lt.s32.totalorder %s3540_s19, %s3533_s18 }
 0x127   : > { %p3537_p7 = pneg %p3536_p5  ;;  %p3543_p0 = por %p3542_p2, %p3541_p8 }
 0x129   : > { %p3544_p11 = pnand %p3543_p0, %p3537_p7 }
 0x12b   : > { %3547 = shalt.err (!%p3544_p11)
}
 0x12c   : > { %p4870_p12 = scmp.ne.s32.totalorder %s4855_s2, 0  ;;  %s3783_s26 = smov [#allocation7]  }
 0x12d   : > { %s644_s16 = sshll.u32 %s3783_s26, 4  ;;  %s3784_s28 = smov [#allocation8]   ;;  %s645_s16 = int_to_ptr.vmem [resolvable:$true] %s644_s16 }
 0x12e   : > { %3063 = dma.hbm_to_vmem [thread:$0]  (!%p4870_p12), %s4286_s20, 16, %s815_s9, %s4082_s0  }
 0x12f   : > { %s658_s3 = sshll.u32 %s3784_s28, 4  ;;  %s4871_s30 = sld [smem:[#allocation45_spill]]  ;;  %s659_s3 = int_to_ptr.vmem [resolvable:$true] %s658_s3 }
 0x130   : > { %p4873_p2 = scmp.ne.s32.totalorder %s4847_s1, 0 }
 0x135   : > { %s4872_s24 = smov %s4871_s30  ;;  %s3548_s14 = scalar_lea.hbm %s4871_s30, 128 }
 0x136   : > { %p3549_p0 = scmp.ne.s32.totalorder %s4872_s24, %s3548_s14  ;;  %p3555_p9 = scmp.lt.u32.totalorder %s3548_s14, %s4872_s24 }
 0x138   : > { %p3551_p3 = pnand %p3549_p0, %p4873_p2 }
 0x13a   : > { %p3552_p13 = pneg %p3551_p3 }
 0x13c   : > { %p3557_p1 = pnand %p3555_p9, %p3552_p13 }
 0x13e   : > { %3560 = shalt.err (!%p3557_p1)
}
 0x13f   : > { %s3561_s20 = scalar_lea.vmem %s645_s16, 128  ;;  %p3569_p7 = scmp.lt.s32.totalorder %s645_s16, %s645_s16 }
 0x140   : > { %p3562_p6 = scmp.ne.s32.totalorder %s645_s16, %s3561_s20  ;;  %p3570_p8 = scmp.lt.s32.totalorder %s3561_s20, %s3561_s20 }
 0x142   : > { %p3564_p4 = pnand %p3562_p6, %p4873_p2  ;;  %p3571_p11 = por %p3570_p8, %p3569_p7 }
 0x144   : > { %p3565_p5 = pneg %p3564_p4 }
 0x146   : > { %p3572_p12 = pnand %p3571_p11, %p3565_p5 }
 0x148   : > { %3575 = shalt.err (!%p3572_p12)
}
 0x149   : > { %p4874_p0 = scmp.ne.s32.totalorder %s4845_s23, 0  ;;  %s4875_s5 = sld [smem:[#allocation46_spill]] }
 0x14b   : > { %3038 = dma.hbm_to_vmem [thread:$0]  (!%p4874_p0), %s4872_s24, 128, %s645_s16, [#allocation6], %s3776_s8, %s3776_s8, %s3777_s4  }
 0x14f   : > { %s4876_s14 = smov %s4875_s5  ;;  %s3576_s30 = scalar_lea.hbm %s4875_s5, 16 }
 0x150   : > { %p3577_p3 = scmp.ne.s32.totalorder %s4876_s14, %s3576_s30  ;;  %p3583_p9 = scmp.lt.u32.totalorder %s3576_s30, %s4876_s14 }
 0x152   : > { %p3579_p12 = pnand %p3577_p3, %p4873_p2 }
 0x154   : > { %p3580_p13 = pneg %p3579_p12 }
 0x156   : > { %p3585_p1 = pnand %p3583_p9, %p3580_p13 }
 0x158   : > { %3588 = shalt.err (!%p3585_p1)
}
 0x159   : > { %s3589_s20 = scalar_lea.vmem %s659_s3, 16  ;;  %s3596_s16 = scalar_lea.vmem %s659_s3, 32 }
 0x15a   : > { %p3590_p6 = scmp.ne.s32.totalorder %s659_s3, %s3589_s20  ;;  %p3597_p7 = scmp.lt.s32.totalorder %s659_s3, %s659_s3 }
 0x15b   : > { %p3598_p8 = scmp.lt.s32.totalorder %s3596_s16, %s3589_s20 }
 0x15c   : > { %p3592_p4 = pnand %p3590_p6, %p4873_p2 }
 0x15d   : > { %p3599_p11 = por %p3598_p8, %p3597_p7 }
 0x15e   : > { %p3593_p5 = pneg %p3592_p4 }
 0x160   : > { %p3600_p10 = pnand %p3599_p11, %p3593_p5 }
 0x162   : > { %3603 = shalt.err (!%p3600_p10)
}
 0x163   : > { %3041 = dma.hbm_to_vmem [thread:$0]  (!%p4874_p0), %s4876_s14, 16, %s659_s3, [#allocation9]  }
 0x164   : > { %s4877_s17 = sld [smem:[#allocation59_spill]]  ;;  %s845_s5 = scalar_lea.vmem [#allocation17], %s4132_s6 }
 0x165   : > { %s852_s30 = sshll.u32 %s845_s5, 4  ;;  %p4878_p2 = scmp.ne.s32.totalorder %s4857_s21, 0  ;;  %s4353_s30 = int_to_ptr.vmem [resolvable:$true] %s852_s30 }
 0x16a   : > { %s4350_s1 = scalar_lea.hbm %s4877_s17, %s4135_s29  ;;  %s3609_s18 = scalar_lea.hbm %s4877_s17, 512 }
 0x16b   : > { %s3604_s23 = scalar_lea.hbm %s4350_s1, 256  ;;  %p3610_p0 = scmp.lt.u32.totalorder %s4350_s1, %s4877_s17 }
 0x16c   : > { %p3605_p10 = scmp.ne.s32.totalorder %s4350_s1, %s3604_s23  ;;  %p3611_p13 = scmp.lt.u32.totalorder %s3609_s18, %s3604_s23 }
 0x16d   : > { %p3613_p1 = scmp.lt.u32.totalorder %s3604_s23, %s4350_s1 }
 0x16e   : > { %p3607_p3 = pnand %p3605_p10, %p4878_p2  ;;  %p3612_p9 = por %p3611_p13, %p3610_p0 }
 0x170   : > { %p3608_p12 = pneg %p3607_p3  ;;  %p3614_p6 = por %p3613_p1, %p3612_p9 }
 0x172   : > { %p3615_p4 = pnand %p3614_p6, %p3608_p12 }
 0x174   : > { %3618 = shalt.err (!%p3615_p4)
}
 0x175   : > { %s3619_s6 = scalar_lea.vmem %s4353_s30, 256  ;;  %s3785_s19 = smov [#allocation17]  }
 0x176   : > { %p3620_p5 = scmp.ne.s32.totalorder %s4353_s30, %s3619_s6  ;;  %s3624_s20 = sshll.u32 %s3785_s19, 4  ;;  %s3625_s20 = int_to_ptr.vmem [resolvable:$false] %s3624_s20 }
 0x177   : > { %s3626_s16 = scalar_lea.vmem %s3625_s20, 512  ;;  %p3627_p11 = scmp.lt.s32.totalorder %s4353_s30, %s3625_s20 }
 0x178   : > { %p3622_p7 = pnand %p3620_p5, %p4878_p2  ;;  %p3628_p10 = scmp.lt.s32.totalorder %s3626_s16, %s3619_s6 }
 0x17a   : > { %p3623_p8 = pneg %p3622_p7  ;;  %p3629_p3 = por %p3628_p10, %p3627_p11 }
 0x17c   : > { %p3630_p0 = pnand %p3629_p3, %p3623_p8 }
 0x17e   : > { %3633 = shalt.err (!%p3630_p0)
}
 0x17f   : > { %p4879_p12 = scmp.ne.s32.totalorder %s4855_s2, 0  ;;  %p4880_p2 = scmp.ne.s32.totalorder %s4844_s27, 0 }
 0x180   : > { %s4881_s21 = sld [smem:[#allocation34_spill]] (!%p4880_p2) }
 0x181   : > { %3066 = dma.hbm_to_vmem [thread:$0]  (!%p4879_p12), %s4350_s1, 256, %s4353_s30, %s4082_s0, %s3776_s8, %s3776_s8, %s3777_s4  }
 0x182   : > { %882 = sbr.rel (%p4880_p2) target bundleno = 3070 (0xbfe), region = 104 }
 0x186   : > { %p4882_p13 = scmp.eq.s32.totalorder (!%p4880_p2), %s4881_s21, 0 }
 0x189   : > { %3707 = dma.done.wait (%p4882_p13), [#allocation3], 256   ;;  %p4883_p9 = pmov %p4882_p13 }
 0x18b   : > { %3709 = vsyncadd (%p4883_p9), [#allocation3], 4294967040  ;;  %p4884_p1 = pmov %p4883_p9 }
 0x18d   : > { %3711 = dma.done.wait (%p4884_p1), [#allocation6], 384   ;;  %p4885_p6 = pmov %p4884_p1 }
 0x18e   : > { %p4886_p4 = pmov %p4884_p1 }
 0x18f   : > { %3713 = vsyncadd (%p4885_p6), [#allocation6], 4294966912 }
 0x190   : > { %3715 = dma.done.wait (%p4886_p4), [#allocation9], 16   ;;  %p4887_p5 = pmov %p4884_p1 }
 0x191   : > { %s4888_s27 = sld [smem:[#allocation27_spill]]  ;;  %s4889_s2 = sld [smem:[#allocation35_spill]] }
 0x192   : > { %3717 = vsyncadd (%p4887_p5), [#allocation9], 4294967280  ;;  %s900_s0 = sand.u32 1, %s4881_s21  }
 0x193   : > { %s901_s4 = scalar_lea.sflag [#allocation3], %s900_s0 }
 0x197   : > { %s4396_s8 = sand.u32 1, %s4888_s27   ;;  %p4890_p7 = scmp.ne.s32.totalorder %s4889_s2, 0 }
 0x199   : > { %3719 = dma.done.wait (%p4890_p7), %s901_s4, 848  }
 0x19a   : > { %3721 = vsyncadd (%p4890_p7), %s901_s4, 4294966448  ;;  %s4891_s26 = sld [smem:[#allocation25_spill]]  ;;  %s4892_s28 = sld [smem:[#allocation30_spill]] }
 0x19b   : > { %s4893_s25 = sld [smem:[#allocation29_spill]]  ;;  %s4404_s1 = sshll.u32 %s4396_s8, 4 }
 0x19c   : > { %s4894_s29 = sld [smem:[#allocation42_spill]]  ;;  %s4895_s21 = sld [smem:[#allocation47_spill]] }
 0x19d   : > { %s4896_s4 = sld [smem:[#allocation49_spill]]  ;;  %s4899_s12 = sld [smem:[#allocation58_spill]] }
 0x19e   : > { %s4898_s22 = sld [smem:[#allocation57_spill]]  ;;  %s4900_s13 = sld [smem:[#allocation60_spill]] }
 0x19f   : > { %s911_s9 = scalar_lea.vmem [#allocation11], %s4396_s8  ;;  %s920_s10 = scalar_lea.vmem [#allocation12], %s4404_s1 }
 0x1a0   : > { %s4802_s5 = sand.u32 1, %s4891_s26   ;;  %s2775_s30 = sshll.u32 %s4892_s28, 1 }
 0x1a1   : > { %s2774_s23 = sshll.u32 %s4802_s5, 4  ;;  %p1087_p8 = scmp.lt.s32.totalorder %s2775_s30, 3 }
 0x1a2   : > { %p1092_p11 = scmp.lt.s32.totalorder %s4893_s25, 1  ;;  %s4902_s28 = sld [smem:[#allocation62_spill]] }
 0x1a3   : > { %s4937_s30 = smov (!%p1087_p8, %s2775_s30), 3  ;;  %s4457_s18 = scalar_lea.vmem [#allocation14], %s4404_s1 }
 0x1a4   : > { %s4412_s7 = scalar_select %p1092_p11, %s4893_s25, 1 }
 0x1a5   : > { %s2776_s3 = sshll.u32 %s4937_s30, 3  ;;  %s953_s11 = scalar_lea.vmem [#allocation16], %s4396_s8 }
 0x1a6   : > { %s1090_s6 = scalar_lea.vmem %s4894_s29, %s2776_s3  ;;  %s2832_s19 = sshll.u32 %s4412_s7, 4 }
 0x1a7   : > { %s4421_s27 = scalar_lea.vmem %s4895_s21, %s2832_s19  ;;  %s4426_s26 = scalar_lea.vmem %s4896_s4, %s2832_s19 }
 0x1a8   : > { %s4435_s3 = scalar_lea.vmem %s4898_s22, %s2832_s19  ;;  %s1112_s20 = scalar_lea.vmem %s4899_s12, %s4412_s7 }
 0x1a9   : > { %s1115_s14 = scalar_lea.vmem %s4900_s13, %s4412_s7  ;;  %s4901_s4 = sld [smem:[#allocation61_spill]] }
 0x1aa   : > { %s1121_s30 = scalar_lea.vmem %s4902_s28, %s4412_s7  ;;  %s928_s19 = scalar_lea.vmem [#allocation13], %s4396_s8 }
 0x1ab   : > { %s945_s22 = scalar_lea.vmem [#allocation15], %s4396_s8  ;;  %s962_s12 = scalar_lea.vmem [#allocation17], %s4404_s1 }
 0x1ac   : > { %s4462_s29 = scalar_lea.vmem [#allocation18], %s2774_s23  ;;  %p2783_p10 = scmp.ne.s32.totalorder %s4893_s25, 0 }
 0x1ad   : > { %v3186_v0 = vld [vmem:[#allocation7] sm:$0xff] (!%p2783_p10)   ;;  %v3786_v1 = vmov (!%p2783_p10), 0.0   ;;  %v1129_v3 = vld [vmem:[%s1090_s6 + $0x8] sm:$0xff] (!%p2783_p10)  ;;  %vm3787_vm0 = vmmov (!%p2783_p10), 0   ;;  %vm1146_vm1 = vcmask (!%p2783_p10), 130048   ;;  %vm1195_vm2 = vcmask (!%p2783_p10), 261120  }
 0x1ae   : > { %1127 = sbr.rel (%p2783_p10) target bundleno = 653 (0x28d), region = 156  ;;  %2877 = vmatprep.subr.bf16.mxu0 (!%p2783_p10), %v3786_v1  ;;  %v1128_v2 = vld [vmem:[%s1090_s6] sm:$0xff] (!%p2783_p10)  ;;  %2879 = vmatprep.mubr.msk.bf16.mxu0 (!%p2783_p10), %vm3787_vm0, %v3786_v1  ;;  %v2784_v5 = vld [vmem:[#allocation8] ss:$0 sm:$0xff] (!%p2783_p10) }
 0x1af   : > { %s1118_s15 = scalar_lea.vmem %s4901_s4, %s4412_s7  ;;  %2878 = vmatpush3.bf16.msra.mxu0 (!%p2783_p10), %v3186_v0  ;;  %v1130_v4 = vpack.c.bf16 (!%p2783_p10), %v1129_v3, %v1128_v2  ;;  %v1191_v7 = vld [vmem:[#allocation2] sm:$0xff] (!%p2783_p10)  ;;  %v1192_v11 = vld [vmem:[#allocation2 + $0x8] sm:$0xff] (!%p2783_p10) }
 0x1b2   : > { %2880 = vmatmul.mubr.msk.bf16.vlgmr.msra.gmra.mrb[0].mxu0 (!%p2783_p10), %vm1146_vm1, %v1130_v4 }
 0x285   : > { %v1184_v6 = vpop.f32.mrb[0].mxu0 }
 0x286   : > { %v1185_v8 = vadd.f32 %v2784_v5, %v1184_v6  ;;  %v2881_v9 = vpop.f32.mrb[1].mxu0 }
 0x287   : > { %v1187_v10 = vpop.f32.mrb[2].mxu0 }
 0x288   : > { %v1193_v12 = vadd.f32 %v1191_v7, %v1185_v8  ;;  %v1188_v13 = vadd.f32 %v2784_v5, %v1187_v10  ;;  %v2882_v14 = vpop.f32.mrb[3].mxu0 }
 0x28a   : > { %1196 = vst.msk [vmem:[%s4462_s29] sm:$0xff] %vm1195_vm2, %v1193_v12  ;;  %v1194_v15 = vadd.f32 %v1192_v11, %v1188_v13 }
 0x28c   : > { %1197 = vst.msk [vmem:[%s4462_s29 + $0x8] sm:$0xff] %vm1195_vm2, %v1194_v15 }
 0x28d PF: > { %v3232_v16 = vld [vmem:[%s4421_s27] sm:$0xff]   ;;  %v3788_v17 = vmov 0.0   ;;  %v3234_v19 = vld [vmem:[%s4421_s27 + $0x8] sm:$0xff]   ;;  %vm3789_vm3 = vmmov 0   ;;  %vm1224_vm4 = vcmask 261120   ;;  %s4903_s13 = scalar_lea.vmem [#allocation10], %s4396_s8 }
 0x28e   : > { %2883 = vmatprep.subr.bf16.mxu0 %v3788_v17  ;;  %2891 = vmatprep.subr.bf16.mxu1 %v3788_v17  ;;  %v3233_v18 = vld [vmem:[%s4426_s26] sm:$0xff]   ;;  %v3235_v20 = vld [vmem:[%s4426_s26 + $0x8] sm:$0xff]   ;;  %vm1469_vm5 = vcmask 64512   ;;  %s3790_s17 = smov 120   ;;  %s3792_s25 = smov 112   ;;  %vm1676_vm6 = vcmask 130048  }
 0x28f   : > { %2884 = vmatpush3.bf16.msra.mxu0 %v3232_v16  ;;  %2887 = vmatprep.mubr.msk.bf16.mxu0 %vm3789_vm3, %v3788_v17  ;;  %v3236_v24 = vld [vmem:[%s920_s10] sm:$0xff]   ;;  %v3237_v25 = vld [vmem:[%s920_s10 + $0x8] sm:$0xff]   ;;  %vm1956_vm7 = vcmask 1043456   ;;  %s4904_s27 = sld [smem:[#allocation56_spill]] }
 0x290   : > { %2892 = vmatpush3.bf16.msra.mxu1 %v3233_v18  ;;  %2885 = vmatprep.subr.bf16.mxu0 %v3788_v17  ;;  %v2787_v26 = vld [vmem:[%s4903_s13] ss:$0 sm:$0xff]  ;;  %v1666_v18 = vld [vmem:[#allocation5] sm:$0xff]  ;;  %s4910_s5 = sld [smem:[#allocation25_spill]] }
 0x291   : > { %2893 = vmatprep.subr.bf16.mxu1 %v3788_v17  ;;  %2895 = vmatprep.mubr.msk.bf16.mxu1 %vm3789_vm3, %v3788_v17  ;;  %v4480_v21 = vld [vmem:[%s4462_s29] sm:$0xff]  ;;  %v2791_v29 = vld [vmem:[%s911_s9] ss:$0 sm:$0xff]  ;;  %s3791_s9 = smov 104  }
 0x292   : > { %v2795_v0 = vld [vmem:[%s928_s19] ss:$0 sm:$0xff] }
 0x293   : > { %v4483_v22 = vld [vmem:[%s4462_s29 + $0x8] sm:$0xff]  ;;  %2886 = vmatpush3.bf16.msra.mxu0 %v3234_v19 }
 0x294   : > { %v1200_v23 = vpack.c.bf16 %v4483_v22, %v4480_v21  ;;  %2894 = vmatpush3.bf16.msra.mxu1 %v3235_v20  ;;  %2899 = vmatprep.subr.bf16.mxu0 %v3788_v17 }
 0x295   : > { %2907 = vmatprep.subr.bf16.mxu1 %v3788_v17  ;;  %s4905_s26 = scalar_lea.vmem %s4904_s27, %s4412_s7 }
 0x296   : > { %2888 = vmatmul.mubr.msk.bf16.vlgmr.msra.gmra.mrb[0].mxu0 %vm1224_vm4, %v1200_v23 }
 0x297   : > { %2896 = vmatmul.mubr.msk.bf16.vlgmr.msra.gmra.mrb[0].mxu1 %vm1224_vm4, %v1200_v23  ;;  %2903 = vmatprep.mubr.msk.bf16.mxu0 %vm3789_vm3, %v3788_v17 }
 0x298   : > { %2909 = vmatprep.mubr.msk.bf16.mxu1 %vm3789_vm3, %v3788_v17  ;;  %2900 = vmatpush3.bf16.msra.mxu0 %v3236_v24  ;;  %v1667_v24 = vld [vmem:[#allocation5 + $0x8] sm:$0xff] }
 0x299   : > { %2901 = vmatprep.subr.bf16.mxu0 %v3788_v17 }
 0x29c   : > { %2902 = vmatpush3.bf16.msra.mxu0 %v3237_v25 }
 0x29d   : > { %2913 = vmatprep.subr.bf16.mxu0 %v3788_v17 }
 0x29f   : > { %2904 = vmatmul.mubr.msk.bf16.vlgmr.msra.gmra.mrb[4].mxu0 %vm1224_vm4, %v1200_v23 }
 0x2a0   : > { %2915 = vmatprep.mubr.msk.bf16.mxu0 %vm3789_vm3, %v3788_v17 }
 0x369   : > { %v1262_v27 = vpop.f32.mrb[0].mxu0 }
 0x36a   : > { %v1263_v28 = vadd.f32 %v2787_v26, %v1262_v27  ;;  %v1326_v30 = vpop.f32.mrb[0].mxu1  ;;  %v2889_v31 = vpop.f32.mrb[1].mxu0 }
 0x36b   : > { %v2897_v32 = vpop.f32.mrb[1].mxu1  ;;  %v1265_v33 = vpop.f32.mrb[2].mxu0  ;;  %v1327_v37 = vadd.f32 %v2791_v29, %v1326_v30 }
 0x36c   : > { %v1266_v34 = vadd.f32 %v2787_v26, %v1265_v33  ;;  %v1329_v35 = vpop.f32.mrb[2].mxu1  ;;  %v2890_v36 = vpop.f32.mrb[3].mxu0 }
 0x36d   : > { %v1330_v38 = vadd.f32 %v2791_v29, %v1329_v35  ;;  %v2898_v39 = vpop.f32.mrb[3].mxu1 }
 0x36e   : > { %v1417_v40 = vpack.c.bf16 %v1266_v34, %v1263_v28  ;;  %v3197_v41 = vpack.i.bf16 %v1266_v34, %v1263_v28 }
 0x36f   : > { %v3187_v42 = vpack.i.bf16 %v1330_v38, %v1327_v37  ;;  %v1441_v43 = vpack.c.bf16 %v1330_v38, %v1327_v37 }
 0x370   : > { %3198 = vrot.lane.b32.xlu1 %v3197_v41, %s3790_s17 }
 0x371   : > { %3188 = vrot.lane.b32.xlu0 %v3187_v42, %s3790_s17  ;;  %v1474_v44 = vsel %vm1469_vm5, %v1441_v43, 0 }
 0x372   : > { %2908 = vmatpush3.bf16.xpose.msra.mxu1 %v1474_v44  ;;  %v1390_v45 = vpop.f32.mrb[4].mxu0 }
 0x373   : > { %2919 = vmatprep.subr.bf16.mxu1 %v3788_v17  ;;  %v2905_v46 = vpop.f32.mrb[5].mxu0  ;;  %v4524_v4 = vadd.f32 %v2795_v0, %v1390_v45 }
 0x374   : > { %3203 = vrot.lane.b32.xlu1 %v3187_v42, %s3791_s9  ;;  %v1393_v47 = vpop.f32.mrb[6].mxu0 }
 0x375   : > { %3193 = vrot.lane.b32.xlu0 %v3187_v42, %s3792_s25  ;;  %v2906_v48 = vpop.f32.mrb[7].mxu0  ;;  %v4526_v5 = vadd.f32 %v2795_v0, %v1393_v47 }
 0x377   : > { %v1465_v11 = vpack.c.bf16 %v4526_v5, %v4524_v4 }
 0x378   : > { %3213 = vrot.lane.b32.xlu1 %v3197_v41, %s3791_s9 }
 0x379   : > { %3208 = vrot.lane.b32.xlu0 %v3197_v41, %s3792_s25  ;;  %2910 = vmatmul.mubr.msk.bf16.vlgmr.msra.gmra.mrb[4].mxu1 %vm1469_vm5, %v1417_v40 }
 0x37a   : > { %2921 = vmatprep.mubr.msk.bf16.mxu1 %vm3789_vm3, %v3788_v17 }
 0x3e2   : > { %v3199_v49 = vpop.permute.xlu1 %3198 }
 0x3e3   : > { %v3189_v50 = vpop.permute.xlu0 %3188  ;;  %v3201_v61 = vunpack.i.h.bf16 %v3199_v49  ;;  %v3200_v62 = vunpack.i.l.bf16 %v3199_v49 }
 0x3e4   : > { %v3191_v51 = vunpack.i.h.bf16 %v3189_v50  ;;  %v3190_v52 = vunpack.i.l.bf16 %v3189_v50 }
 0x3e5   : > { %v1418_v6 = vpack.c.bf16 %v3201_v61, %v3200_v62  ;;  %v4553_v61 = vpack.i.bf16 %v4526_v5, %v4524_v4 }
 0x3e6   : > { %v1442_v53 = vpack.c.bf16 %v3191_v51, %v3190_v52  ;;  %v3204_v54 = vpop.permute.xlu1 %3203 }
 0x3e7   : > { %v3194_v55 = vpop.permute.xlu0 %3193  ;;  %v3206_v56 = vunpack.i.h.bf16 %v3204_v54  ;;  %v3205_v59 = vunpack.i.l.bf16 %v3204_v54 }
 0x3e8   : > { %v3196_v57 = vunpack.i.h.bf16 %v3194_v55  ;;  %v3195_v58 = vunpack.i.l.bf16 %v3194_v55  ;;  %v1521_v60 = vsel %vm1469_vm5, %v1442_v53, 0 }
 0x3e9   : > { %2914 = vmatpush3.bf16.xpose.msra.mxu0 %v1521_v60  ;;  %v1444_v2 = vpack.c.bf16 %v3206_v56, %v3205_v59 }
 0x3ea   : > { %v1443_v63 = vpack.c.bf16 %v3196_v57, %v3195_v58  ;;  %2925 = vmatprep.subr.bf16.mxu0 %v3788_v17  ;;  %v3214_v9 = vpop.permute.xlu1 %3213 }
 0x3eb   : > { %v3209_v1 = vpop.permute.xlu0 %3208  ;;  %v1615_v10 = vsel %vm1469_vm5, %v1444_v2, 0  ;;  %v3216_v13 = vunpack.i.h.bf16 %v3214_v9  ;;  %v3215_v14 = vunpack.i.l.bf16 %v3214_v9 }
 0x3ec   : > { %v1568_v3 = vsel %vm1469_vm5, %v1443_v63, 0  ;;  %v3211_v7 = vunpack.i.h.bf16 %v3209_v1  ;;  %v3210_v8 = vunpack.i.l.bf16 %v3209_v1 }
 0x3ed   : > { %2920 = vmatpush3.bf16.xpose.msra.mxu1 %v1568_v3  ;;  %v1420_v15 = vpack.c.bf16 %v3216_v13, %v3215_v14 }
 0x3ee   : > { %2931 = vmatprep.subr.bf16.mxu1 %v3788_v17  ;;  %v1419_v12 = vpack.c.bf16 %v3211_v7, %v3210_v8 }
 0x3f0   : > { %2916 = vmatmul.mubr.msk.bf16.vlgmr.msra.gmra.mrb[8].mxu0 %vm1469_vm5, %v1418_v6 }
 0x3f1   : > { %2926 = vmatpush3.bf16.xpose.msra.mxu0 %v1615_v10  ;;  %2927 = vmatprep.mubr.msk.bf16.mxu0 %vm3789_vm3, %v3788_v17 }
 0x3f2   : > { %2937 = vmatprep.subr.bf16.mxu0 %v3788_v17 }
 0x3f4   : > { %2922 = vmatmul.mubr.msk.bf16.vlgmr.msra.gmra.mrb[8].mxu1 %vm1469_vm5, %v1419_v12 }
 0x3f5   : > { %2932 = vmatpush3.bf16.msra.mxu1 %v1465_v11  ;;  %2933 = vmatprep.mubr.msk.bf16.mxu1 %vm3789_vm3, %v3788_v17 }
 0x3f6   : > { %2943 = vmatprep.subr.bf16.mxu1 %v3788_v17 }
 0x3f8   : > { %2928 = vmatmul.mubr.msk.bf16.vlgmr.msra.gmra.mrb[12].mxu0 %vm1469_vm5, %v1420_v15 }
 0x3f9   : > { %2939 = vmatprep.mubr.msk.bf16.mxu0 %vm3789_vm3, %v3788_v17 }
 0x44c   : > { %v1510_v16 = vpop.f32.mrb[4].mxu1 }
 0x44d   : > { %v1658_v19 = vmul.f32 0.35355338, %v1510_v16  ;;  %v2911_v20 = vpop.f32.mrb[5].mxu1 }
 0x44e   : > { %v1513_v23 = vpop.f32.mrb[6].mxu1 }
 0x44f   : > { %v1659_v25 = vmul.f32 0.35355338, %v1513_v23  ;;  %v2912_v26 = vpop.f32.mrb[7].mxu1  ;;  %v1668_v27 = vadd.f32 %v1666_v18, %v1658_v19 }
 0x451   : > { %v1677_v28 = vsel %vm1676_vm6, %v1668_v27, -inf  ;;  %v1669_v29 = vadd.f32 %v1667_v24, %v1659_v25 }
 0x452   : > { %1678 = vmax.xlane.f32.xlu0 %v1677_v28 }
 0x453   : > { %v1680_v30 = vsel %vm1676_vm6, %v1669_v29, -inf }
 0x454   : > { %1681 = vmax.xlane.f32.xlu1 %v1680_v30 }
 0x4c3   : > { %v1557_v31 = vpop.f32.mrb[8].mxu0 }
 0x4c4   : > { %v1660_v32 = vmul.f32 0.35355338, %v1557_v31  ;;  %v2917_v33 = vpop.f32.mrb[9].mxu0 }
 0x4c5   : > { %v1560_v34 = vpop.f32.mrb[10].mxu0 }
 0x4c6   : > { %v1661_v35 = vmul.f32 0.35355338, %v1560_v34  ;;  %v2918_v36 = vpop.f32.mrb[11].mxu0  ;;  %v1670_v37 = vadd.f32 %v1666_v18, %v1660_v32 }
 0x4c7   : > { %v1604_v38 = vpop.f32.mrb[8].mxu1 }
 0x4c8   : > { %v1662_v39 = vmul.f32 0.35355338, %v1604_v38  ;;  %v2923_v40 = vpop.f32.mrb[9].mxu1  ;;  %v1683_v41 = vsel %vm1676_vm6, %v1670_v37, -inf  ;;  %v1671_v42 = vadd.f32 %v1667_v24, %v1661_v35 }
 0x4c9   : > { %v1607_v43 = vpop.f32.mrb[10].mxu1  ;;  %1684 = vmax.xlane.f32.xlu0 %v1683_v41 }
 0x4ca   : > { %v1663_v44 = vmul.f32 0.35355338, %v1607_v43  ;;  %v2924_v45 = vpop.f32.mrb[11].mxu1  ;;  %v1672_v46 = vadd.f32 %v1666_v18, %v1662_v39  ;;  %v1686_v51 = vsel %vm1676_vm6, %v1671_v42, -inf }
 0x4cb   : > { %v1651_v47 = vpop.f32.mrb[12].mxu0 }
 0x4cc   : > { %v1664_v48 = vmul.f32 0.35355338, %v1651_v47  ;;  %v2929_v49 = vpop.f32.mrb[13].mxu0  ;;  %v1689_v50 = vsel %vm1676_vm6, %v1672_v46, -inf  ;;  %v1673_v52 = vadd.f32 %v1667_v24, %v1663_v44 }
 0x4cd   : > { %1690 = vmax.xlane.f32.xlu1 %v1689_v50  ;;  %1687 = vmax.xlane.f32.xlu0 %v1686_v51  ;;  %v1654_v53 = vpop.f32.mrb[14].mxu0 }
 0x4ce   : > { %v1665_v54 = vmul.f32 0.35355338, %v1654_v53  ;;  %v2930_v55 = vpop.f32.mrb[15].mxu0  ;;  %v1674_v56 = vadd.f32 %v1666_v18, %v1664_v48  ;;  %v1692_v57 = vsel %vm1676_vm6, %v1673_v52, -inf }
 0x4d0   : > { %v1695_v58 = vsel %vm1676_vm6, %v1674_v56, -inf  ;;  %v1675_v59 = vadd.f32 %v1667_v24, %v1665_v54 }
 0x4d1   : > { %1693 = vmax.xlane.f32.xlu0 %v1692_v57  ;;  %1696 = vmax.xlane.f32.xlu1 %v1695_v58 }
 0x4d2   : > { %v1698_v60 = vsel %vm1676_vm6, %v1675_v59, -inf }
 0x4d5   : > { %1699 = vmax.xlane.f32.xlu0 %v1698_v60 }
 0x4df   : > { %v1679_v1 = vpop.xlane.xlu0 %1678 }
 0x4e0   : > { %v1701_v3 = vsub.f32 %v1668_v27, %v1679_v1 }
 0x4e1   : > { %v1682_v62 = vpop.xlane.xlu1 %1681 }
 0x4e2   : > { %v1702_v63 = vsub.f32 %v1669_v29, %v1682_v62  ;;  %3218 = vrot.lane.b32.xlu1 %v4553_v61, %s3790_s17  ;;  %v1709_v7 = vmul.f32 1.442695, %v1701_v3  ;;  %s4913_s17 = sld [smem:[#allocation63_spill]] }
 0x4e4   : > { %v1711_v0 = vmul.f32 1.442695, %v1702_v63 }
 0x4e6   : > { %3242 = vpow2.f32 %v1711_v0 }
 0x4e7   : > { %3244 = vpow2.f32 %v1709_v7 }
 0x4f0   : > { %v4557_v2 = vpop.eup %3242 }
 0x4f1   : > { %v1728_v6 = vsel %vm1676_vm6, %v4557_v2, 0.0  ;;  %v3245_v8 = vpop.eup %3244 }
 0x4f2   : > { %1729 = vadd.xlane.f32.xlu0 %v1728_v6  ;;  %v1725_v4 = vsel %vm1676_vm6, %v3245_v8, 0.0 }
 0x506   : > { %1726 = vadd.xlane.f32.xlu1 %v1725_v4 }
 0x556   : > { %v1685_v5 = vpop.xlane.xlu0 %1684 }
 0x557   : > { %v1703_v9 = vsub.f32 %v1670_v37, %v1685_v5 }
 0x559   : > { %v1713_v10 = vmul.f32 1.442695, %v1703_v9  ;;  %v1949_v9 = vld [vmem:[%s4457_s18] sm:$0xf] }
 0x55a   : > { %v1691_v11 = vpop.xlane.xlu1 %1690  ;;  %v1688_v12 = vpop.xlane.xlu0 %1687 }
 0x55b   : > { %3246 = vpow2.f32 %v1713_v10  ;;  %v1705_v13 = vsub.f32 %v1672_v46, %v1691_v11  ;;  %v1704_v14 = vsub.f32 %v1671_v42, %v1688_v12 }
 0x55d   : > { %v1717_v15 = vmul.f32 1.442695, %v1705_v13  ;;  %v1715_v16 = vmul.f32 1.442695, %v1704_v14 }
 0x55e   : > { %v1694_v18 = vpop.xlane.xlu0 %1693  ;;  %v1697_v19 = vpop.xlane.xlu1 %1696 }
 0x55f   : > { %3248 = vpow2.f32 %v1717_v15  ;;  %v1706_v20 = vsub.f32 %v1673_v52, %v1694_v18  ;;  %v1707_v23 = vsub.f32 %v1674_v56, %v1697_v19  ;;  %v1958_v15 = vsel %vm1956_vm7, %v1949_v9, 0 }
 0x560   : > { %3250 = vpow2.f32 %v1715_v16 }
 0x561   : > { %v1719_v24 = vmul.f32 1.442695, %v1706_v20  ;;  %v1721_v25 = vmul.f32 1.442695, %v1707_v23  ;;  %v1950_v20 = vld [vmem:[%s4457_s18 + $0x4] sm:$0xf] }
 0x562   : > { %v3219_v26 = vpop.permute.xlu1 %3218  ;;  %v1700_v27 = vpop.xlane.xlu0 %1699  ;;  %v2005_v23 = vsel %vm1956_vm7, %v1950_v20, 0 }
 0x563   : > { %3252 = vpow2.f32 %v1719_v24  ;;  %v3221_v28 = vunpack.i.h.bf16 %v3219_v26  ;;  %v3220_v29 = vunpack.i.l.bf16 %v3219_v26  ;;  %v1708_v30 = vsub.f32 %v1675_v59, %v1700_v27 }
 0x564   : > { %3254 = vpow2.f32 %v1721_v25  ;;  %v1951_v25 = vld [vmem:[%s4457_s18 + $0x8] sm:$0xf] }
 0x565   : > { %v3247_v31 = vpop.eup %3246  ;;  %v1466_v32 = vpack.c.bf16 %v3221_v28, %v3220_v29  ;;  %v1723_v33 = vmul.f32 1.442695, %v1708_v30  ;;  %v2052_v30 = vsel %vm1956_vm7, %v1951_v25, 0  ;;  %v3239_v25 = vld [vmem:[%s4435_s3 + $0x8] sm:$0xff]  }
 0x566   : > { %v1731_v34 = vsel %vm1676_vm6, %v3247_v31, 0.0 }
 0x567   : > { %3256 = vpow2.f32 %v1723_v33  ;;  %1732 = vadd.xlane.f32.xlu1 %v1731_v34  ;;  %2938 = vmatpush3.bf16.msra.mxu0 %v1466_v32  ;;  %v1952_v32 = vld [vmem:[%s4457_s18 + $0xc] sm:$0xf]  ;;  %s4912_s18 = sld [smem:[#allocation36_spill]] }
 0x568   : > { %2949 = vmatprep.subr.bf16.mxu0 %v3788_v17 }
 0x569   : > { %v3249_v35 = vpop.eup %3248 }
 0x56a   : > { %v3251_v36 = vpop.eup %3250  ;;  %v1737_v37 = vsel %vm1676_vm6, %v3249_v35, 0.0 }
 0x56b   : > { %1738 = vadd.xlane.f32.xlu1 %v1737_v37  ;;  %v1734_v38 = vsel %vm1676_vm6, %v3251_v36, 0.0  ;;  %v2099_v37 = vsel %vm1956_vm7, %v1952_v32, 0 }
 0x56c   : > { %1735 = vadd.xlane.f32.xlu0 %v1734_v38 }
 0x56d   : > { %v3253_v39 = vpop.eup %3252  ;;  %p4915_p0 = scmp.ne.s32.totalorder %s4912_s18, 0 }
 0x56e   : > { %v3255_v40 = vpop.eup %3254  ;;  %v1740_v41 = vsel %vm1676_vm6, %v3253_v39, 0.0 }
 0x56f   : > { %v1743_v42 = vsel %vm1676_vm6, %v3255_v40, 0.0 }
 0x570   : > { %1744 = vadd.xlane.f32.xlu1 %v1743_v42  ;;  %1741 = vadd.xlane.f32.xlu0 %v1740_v41 }
 0x571   : > { %v3257_v43 = vpop.eup %3256 }
 0x572   : > { %v1746_v44 = vsel %vm1676_vm6, %v3257_v43, 0.0 }
 0x574   : > { %1747 = vadd.xlane.f32.xlu0 %v1746_v44 }
 0x57f   : > { %v1730_v45 = vpop.xlane.xlu0 %1729 }
 0x580   : > { %3258 = vrcp.f32 %v1730_v45 }
 0x581   : > { %3228 = vrot.lane.b32.xlu1 %v4553_v61, %s3791_s9 }
 0x58a   : > { %3223 = vrot.lane.b32.xlu0 %v4553_v61, %s3792_s25  ;;  %v3259_v47 = vpop.eup %3258  ;;  %s3793_s25 = smov [#allocation18]  }
 0x58b   : > { %v1758_v49 = vmul.f32 %v3259_v47, %v4557_v2  ;;  %s3638_s23 = sshll.u32 %s3793_s25, 4  ;;  %s3639_s23 = int_to_ptr.vmem [resolvable:$false] %s3638_s23 }
 0x58c   : > { %s3640_s6 = scalar_lea.vmem %s3639_s23, 512 }
 0x593   : > { %v1727_v46 = vpop.xlane.xlu1 %1726 }
 0x594   : > { %3260 = vrcp.f32 %v1727_v46 }
 0x59e   : > { %v3261_v48 = vpop.eup %3260 }
 0x59f   : > { %v1757_v50 = vmul.f32 %v3261_v48, %v3245_v8 }
 0x5a1   : > { %v1765_v51 = vpack.c.bf16 %v1758_v49, %v1757_v50 }
 0x5a3   : > { %2934 = vmatmul.mubr.msk.bf16.vlgmr.msra.gmra.mrb[12].mxu1 %vm1676_vm6, %v1765_v51 }
 0x5a4   : > { %2945 = vmatprep.mubr.msk.bf16.mxu1 %vm3789_vm3, %v3788_v17 }
 0x5f4   : > { %v1733_v52 = vpop.xlane.xlu1 %1732 }
 0x5f5   : > { %3262 = vrcp.f32 %v1733_v52 }
 0x5f8   : > { %v1739_v53 = vpop.xlane.xlu1 %1738 }
 0x5f9   : > { %v1736_v54 = vpop.xlane.xlu0 %1735 }
 0x5fa   : > { %3264 = vrcp.f32 %v1736_v54 }
 0x5fb   : > { %3266 = vrcp.f32 %v1739_v53 }
 0x5fd   : > { %v1745_v55 = vpop.xlane.xlu1 %1744  ;;  %v1742_v56 = vpop.xlane.xlu0 %1741 }
 0x5fe   : > { %3268 = vrcp.f32 %v1742_v56 }
 0x5ff   : > { %3270 = vrcp.f32 %v1745_v55  ;;  %v3263_v59 = vpop.eup %3262 }
 0x600   : > { %v1759_v63 = vmul.f32 %v3263_v59, %v3247_v31 }
 0x601   : > { %v3229_v57 = vpop.permute.xlu1 %3228  ;;  %v1748_v58 = vpop.xlane.xlu0 %1747 }
 0x602   : > { %3272 = vrcp.f32 %v1748_v58  ;;  %v3231_v61 = vunpack.i.h.bf16 %v3229_v57  ;;  %v3230_v62 = vunpack.i.l.bf16 %v3229_v57 }
 0x604   : > { %v3265_v60 = vpop.eup %3264  ;;  %v1468_v8 = vpack.c.bf16 %v3231_v61, %v3230_v62 }
 0x605   : > { %v1760_v0 = vmul.f32 %v3265_v60, %v3251_v36  ;;  %v3224_v1 = vpop.permute.xlu0 %3223  ;;  %v3267_v6 = vpop.eup %3266 }
 0x606   : > { %v3226_v2 = vunpack.i.h.bf16 %v3224_v1  ;;  %v3225_v3 = vunpack.i.l.bf16 %v3224_v1  ;;  %v1761_v11 = vmul.f32 %v3267_v6, %v3249_v35  ;;  %v2811_v1 = vld [vmem:[%s945_s22] ss:$0 sm:$0xff] }
 0x607   : > { %v1766_v7 = vpack.c.bf16 %v1760_v0, %v1759_v63 }
 0x608   : > { %v1467_v4 = vpack.c.bf16 %v3226_v2, %v3225_v3  ;;  %v3269_v5 = vpop.eup %3268 }
 0x609   : > { %2940 = vmatmul.mubr.msk.bf16.vlgmr.msra.gmra.mrb[16].mxu0 %vm1676_vm6, %v1766_v7  ;;  %v3271_v10 = vpop.eup %3270  ;;  %v1762_v12 = vmul.f32 %v3269_v5, %v3253_v39 }
 0x60a   : > { %2950 = vmatpush3.bf16.msra.mxu0 %v1468_v8  ;;  %2944 = vmatpush3.bf16.msra.mxu1 %v1467_v4  ;;  %v1763_v16 = vmul.f32 %v3271_v10, %v3255_v40 }
 0x60b   : > { %2951 = vmatprep.mubr.msk.bf16.mxu0 %vm3789_vm3, %v3788_v17  ;;  %2955 = vmatprep.subr.bf16.mxu1 %v3788_v17  ;;  %v1767_v14 = vpack.c.bf16 %v1762_v12, %v1761_v11 }
 0x60c   : > { %v3273_v13 = vpop.eup %3272  ;;  %2961 = vmatprep.subr.bf16.mxu0 %v3788_v17 }
 0x60d   : > { %v1764_v18 = vmul.f32 %v3273_v13, %v3257_v43  ;;  %2946 = vmatmul.mubr.msk.bf16.vlgmr.msra.gmra.mrb[16].mxu1 %vm1676_vm6, %v1767_v14 }
 0x60e   : > { %2956 = vmatpush3.bf16.msra.mxu1 %v1958_v15  ;;  %2957 = vmatprep.mubr.msk.bf16.mxu1 %vm3789_vm3, %v3788_v17 }
 0x60f   : > { %v1768_v19 = vpack.c.bf16 %v1764_v18, %v1763_v16  ;;  %2967 = vmatprep.subr.bf16.mxu1 %v3788_v17 }
 0x611   : > { %2952 = vmatmul.mubr.msk.bf16.vlgmr.msra.gmra.mrb[20].mxu0 %vm1676_vm6, %v1768_v19 }
 0x612   : > { %2963 = vmatprep.mubr.msk.bf16.mxu0 %vm3789_vm3, %v3788_v17  ;;  %2962 = vmatpush3.bf16.msra.mxu0 %v2005_v23 }
 0x613   : > { %2973 = vmatprep.subr.bf16.mxu0 %v3788_v17 }
 0x676   : > { %v1806_v24 = vpop.f32.mrb[12].mxu1 }
 0x677   : > { %v2935_v26 = vpop.f32.mrb[13].mxu1 }
 0x678   : > { %v1809_v27 = vpop.f32.mrb[14].mxu1 }
 0x679   : > { %v1945_v28 = vpack.c.bf16 %v1809_v27, %v1806_v24  ;;  %v2936_v29 = vpop.f32.mrb[15].mxu1 }
 0x67b   : > { %2958 = vmatmul.mubr.msk.bf16.vlgmr.msra.gmra.mrb[20].mxu1 %vm1469_vm5, %v1945_v28 }
 0x67c   : > { %2968 = vmatpush3.bf16.msra.mxu1 %v2052_v30  ;;  %2969 = vmatprep.mubr.msk.bf16.mxu1 %vm3789_vm3, %v3788_v17 }
 0x67d   : > { %2979 = vmatprep.subr.bf16.mxu1 %v3788_v17 }
 0x6dc   : > { %v1850_v31 = vpop.f32.mrb[16].mxu0 }
 0x6dd   : > { %v2941_v33 = vpop.f32.mrb[17].mxu0 }
 0x6de   : > { %v1853_v34 = vpop.f32.mrb[18].mxu0  ;;  %v2812_v33 = vld [vmem:[%s953_s11] ss:$0 sm:$0xff]  ;;  %s2404_s11 = sshll.u32 %s4462_s29, 4  ;;  %s4668_s11 = int_to_ptr.vmem [resolvable:$true] %s2404_s11 }
 0x6df   : > { %v1946_v35 = vpack.c.bf16 %v1853_v34, %v1850_v31  ;;  %v2942_v36 = vpop.f32.mrb[19].mxu0  ;;  %p3641_p13 = scmp.lt.s32.totalorder %s4668_s11, %s3639_s23 }
 0x6e0   : > { %v1894_v38 = vpop.f32.mrb[16].mxu1 }
 0x6e1   : > { %2964 = vmatmul.mubr.msk.bf16.vlgmr.msra.gmra.mrb[24].mxu0 %vm1469_vm5, %v1946_v35  ;;  %v2947_v39 = vpop.f32.mrb[17].mxu1 }
 0x6e2   : > { %2974 = vmatpush3.bf16.msra.mxu0 %v2099_v37  ;;  %2975 = vmatprep.mubr.msk.bf16.mxu0 %vm3789_vm3, %v3788_v17  ;;  %v1897_v40 = vpop.f32.mrb[18].mxu1 }
 0x6e3   : > { %2987 = vmatprep.subr.bf16.mxu0 %v3788_v17  ;;  %v1947_v41 = vpack.c.bf16 %v1897_v40, %v1894_v38  ;;  %v2948_v42 = vpop.f32.mrb[19].mxu1  ;;  %v2813_v38 = vld [vmem:[%s4905_s26] ss:$0 sm:$0xff] }
 0x6e4   : > { %v1938_v43 = vpop.f32.mrb[20].mxu0 }
 0x6e5   : > { %v2953_v44 = vpop.f32.mrb[21].mxu0  ;;  %2970 = vmatmul.mubr.msk.bf16.vlgmr.msra.gmra.mrb[24].mxu1 %vm1469_vm5, %v1947_v41 }
 0x6e6   : > { %v1941_v45 = vpop.f32.mrb[22].mxu0  ;;  %2983 = vmatprep.mubr.msk.bf16.mxu1 %vm3789_vm3, %v3788_v17  ;;  %v3241_v44 = vld [vmem:[%s962_s12 + $0x8] sm:$0xff]  }
 0x6e7   : > { %v1948_v46 = vpack.c.bf16 %v1941_v45, %v1938_v43  ;;  %v2954_v47 = vpop.f32.mrb[23].mxu0  ;;  %v3240_v43 = vld [vmem:[%s962_s12] sm:$0xff]   ;;  %v2814_v45 = vld [vmem:[%s1112_s20] ss:$0 sm:$0xff] }
 0x6e9   : > { %2976 = vmatmul.mubr.msk.bf16.vlgmr.msra.gmra.mrb[28].mxu0 %vm1469_vm5, %v1948_v46 }
 0x6ea   : > { %2991 = vmatprep.mubr.msk.bf16.mxu0 %vm3789_vm3, %v3788_v17  ;;  %2988 = vmatpush3.bf16.msra.mxu0 %v3240_v43 }
 0x6eb   : > { %2989 = vmatprep.subr.bf16.mxu0 %v3788_v17 }
 0x6ee   : > { %2990 = vmatpush3.bf16.msra.mxu0 %v3241_v44 }
 0x74e   : > { %v1994_v48 = vpop.f32.mrb[20].mxu1 }
 0x74f   : > { %v2959_v49 = vpop.f32.mrb[21].mxu1 }
 0x750   : > { %v1997_v50 = vpop.f32.mrb[22].mxu1 }
 0x751   : > { %v2960_v51 = vpop.f32.mrb[23].mxu1 }
 0x7b4   : > { %v2041_v52 = vpop.f32.mrb[24].mxu0 }
 0x7b5   : > { %v2142_v53 = vadd.f32 %v2041_v52, %v1994_v48  ;;  %v2965_v54 = vpop.f32.mrb[25].mxu0 }
 0x7b6   : > { %v2044_v55 = vpop.f32.mrb[26].mxu0 }
 0x7b7   : > { %v2143_v56 = vadd.f32 %v2044_v55, %v1997_v50  ;;  %v2966_v57 = vpop.f32.mrb[27].mxu0 }
 0x7b8   : > { %v2088_v58 = vpop.f32.mrb[24].mxu1 }
 0x7b9   : > { %v2144_v59 = vadd.f32 %v2142_v53, %v2088_v58  ;;  %v2971_v60 = vpop.f32.mrb[25].mxu1 }
 0x7ba   : > { %v2091_v61 = vpop.f32.mrb[26].mxu1 }
 0x7bb   : > { %v2145_v62 = vadd.f32 %v2143_v56, %v2091_v61  ;;  %v2972_v63 = vpop.f32.mrb[27].mxu1 }
 0x7bc   : > { %v2135_v0 = vpop.f32.mrb[28].mxu0 }
 0x7bd   : > { %v2146_v2 = vadd.f32 %v2144_v59, %v2135_v0  ;;  %v2977_v3 = vpop.f32.mrb[29].mxu0 }
 0x7be   : > { %v2138_v6 = vpop.f32.mrb[30].mxu0 }
 0x7bf   : > { %v2155_v7 = vadd.f32 %v2811_v1, %v2146_v2  ;;  %v2147_v8 = vadd.f32 %v2145_v62, %v2138_v6  ;;  %v2978_v4 = vpop.f32.mrb[31].mxu0 }
 0x7c1   : > { %v2156_v5 = vadd.f32 %v2811_v1, %v2147_v8  ;;  %v2157_v9 = vadd.f32 %v2155_v7, %v4480_v21 }
 0x7c3   : > { %v2161_v10 = vsel %vm1224_vm4, %v2157_v9, 0.0  ;;  %v2158_v11 = vadd.f32 %v2156_v5, %v4483_v22  ;;  %v3238_v22 = vld [vmem:[%s4435_s3] sm:$0xff]  }
 0x7c4   : > { %2162 = vadd.xlane.f32.xlu1 %v2161_v10  ;;  %2980 = vmatpush3.bf16.msra.mxu1 %v3238_v22 }
 0x7c5   : > { %v2164_v12 = vsel %vm1224_vm4, %v2158_v11, 0.0  ;;  %2981 = vmatprep.subr.bf16.mxu1 %v3788_v17  ;;  %v2818_v17 = vld [vmem:[%s1115_s14] ss:$0 sm:$0xff]  ;;  %s4908_s14 = sld [smem:[#allocation30_spill]] }
 0x7c6   : > { %2165 = vadd.xlane.f32.xlu0 %v2164_v12 }
 0x7c8   : > { %2982 = vmatpush3.bf16.msra.mxu1 %v3239_v25 }
 0x7cb   : > { %s2835_s22 = sshll.u32 %s4908_s14, 8 }
 0x7cc   : > { %s4666_s9 = scalar_lea.hbm %s4913_s17, %s2835_s22 }
 0x851   : > { %v2163_v13 = vpop.xlane.xlu1 %2162 }
 0x852   : > { %v2168_v14 = vmul.f32 0.03125, %v2163_v13 }
 0x853   : > { %v2166_v15 = vpop.xlane.xlu0 %2165 }
 0x854   : > { %v2170_v16 = vsub.f32 %v2157_v9, %v2168_v14  ;;  %v2169_v18 = vmul.f32 0.03125, %v2166_v15 }
 0x856   : > { %v2171_v19 = vsub.f32 %v2158_v11, %v2169_v18  ;;  %v2172_v20 = vmul.f32 %v2170_v16, %v2170_v16 }
 0x858   : > { %v2174_v23 = vsel %vm1224_vm4, %v2172_v20, 0.0  ;;  %v2173_v21 = vmul.f32 %v2171_v19, %v2171_v19 }
 0x859   : > { %2175 = vadd.xlane.f32.xlu0 %v2174_v23 }
 0x85a   : > { %v2177_v24 = vsel %vm1224_vm4, %v2173_v21, 0.0  ;;  %v2823_v21 = vld [vmem:[%s1121_s30] ss:$0 sm:$0xff]  ;;  %s3634_s30 = scalar_lea.vmem %s4668_s11, 256 }
 0x85b   : > { %2178 = vadd.xlane.f32.xlu1 %v2177_v24  ;;  %p3635_p3 = scmp.ne.s32.totalorder %s4668_s11, %s3634_s30  ;;  %p3642_p9 = scmp.lt.s32.totalorder %s3640_s6, %s3634_s30 }
 0x85d   : > { %p3636_p12 = pnand %p3635_p3, %p4915_p0  ;;  %p3643_p1 = por %p3642_p9, %p3641_p13 }
 0x85f   : > { %p3637_p2 = pneg %p3636_p12 }
 0x861   : > { %p3644_p6 = pnand %p3643_p1, %p3637_p2 }
 0x8e6   : > { %v2176_v26 = vpop.xlane.xlu0 %2175 }
 0x8e7   : > { %v2180_v27 = vmul.f32 0.03125, %v2176_v26 }
 0x8e8   : > { %v2179_v28 = vpop.xlane.xlu1 %2178 }
 0x8e9   : > { %v2182_v29 = vadd.f32 1e-05, %v2180_v27  ;;  %v2181_v30 = vmul.f32 0.03125, %v2179_v28 }
 0x8eb   : > { %3274 = vrsqrt.f32 %v2182_v29  ;;  %v2183_v31 = vadd.f32 1e-05, %v2181_v30 }
 0x8ed   : > { %3276 = vrsqrt.f32 %v2183_v31 }
 0x8f5   : > { %v3275_v32 = vpop.eup %3274 }
 0x8f6   : > { %v2186_v34 = vmul.f32 %v3275_v32, %v2170_v16 }
 0x8f7   : > { %v3277_v35 = vpop.eup %3276 }
 0x8f8   : > { %v2194_v36 = vmul.f32 %v2812_v33, %v2186_v34  ;;  %v2187_v37 = vmul.f32 %v3277_v35, %v2171_v19  ;;  %v2822_v19 = vld [vmem:[%s1118_s15] ss:$0 sm:$0xff]  ;;  %s4914_s15 = sand.u32 1, %s4910_s5  }
 0x8f9   : > { %s4676_s7 = scalar_lea.sflag [#allocation4], %s4914_s15 }
 0x8fa   : > { %v2195_v39 = vmul.f32 %v2812_v33, %v2187_v37  ;;  %v2202_v40 = vadd.f32 %v2813_v38, %v2194_v36 }
 0x8fc   : > { %v2203_v41 = vadd.f32 %v2813_v38, %v2195_v39 }
 0x8fe   : > { %v2204_v42 = vpack.c.bf16 %v2203_v41, %v2202_v40 }
 0x900   : > { %2984 = vmatmul.mubr.msk.bf16.vlgmr.msra.gmra.mrb[28].mxu1 %vm1224_vm4, %v2204_v42 }
 0x9d3   : > { %v2265_v46 = vpop.f32.mrb[28].mxu1 }
 0x9d4   : > { %v2266_v47 = vadd.f32 %v2814_v45, %v2265_v46  ;;  %v2985_v48 = vpop.f32.mrb[29].mxu1 }
 0x9d5   : > { %v2268_v49 = vpop.f32.mrb[30].mxu1 }
 0x9d6   : > { %v2269_v50 = vadd.f32 %v2814_v45, %v2268_v49  ;;  %v2986_v51 = vpop.f32.mrb[31].mxu1  ;;  %v2272_v52 = vmax.f32 %v2266_v47, 0.0 }
 0x9d8   : > { %v2273_v53 = vmax.f32 %v2269_v50, 0.0 }
 0x9da   : > { %v2274_v54 = vpack.c.bf16 %v2273_v53, %v2272_v52 }
 0x9dc   : > { %2992 = vmatmul.mubr.msk.bf16.vlgmr.msra.gmra.mrb[32].mxu0 %vm1224_vm4, %v2274_v54 }
 0xaaf   : > { %v2335_v55 = vpop.f32.mrb[32].mxu0 }
 0xab0   : > { %v2336_v56 = vadd.f32 %v2818_v17, %v2335_v55  ;;  %v2993_v57 = vpop.f32.mrb[33].mxu0 }
 0xab1   : > { %v2338_v58 = vpop.f32.mrb[34].mxu0 }
 0xab2   : > { %v2339_v59 = vadd.f32 %v2818_v17, %v2338_v58  ;;  %v2994_v60 = vpop.f32.mrb[35].mxu0  ;;  %v2342_v61 = vadd.f32 %v2336_v56, %v2202_v40 }
 0xab4   : > { %v2346_v62 = vsel %vm1224_vm4, %v2342_v61, 0.0  ;;  %v2343_v63 = vadd.f32 %v2339_v59, %v2203_v41 }
 0xab5   : > { %2347 = vadd.xlane.f32.xlu0 %v2346_v62 }
 0xab6   : > { %v2349_v0 = vsel %vm1224_vm4, %v2343_v63, 0.0 }
 0xab7   : > { %2350 = vadd.xlane.f32.xlu1 %v2349_v0 }
 0xb42   : > { %v2348_v1 = vpop.xlane.xlu0 %2347 }
 0xb43   : > { %v2352_v2 = vmul.f32 0.03125, %v2348_v1 }
 0xb44   : > { %v2351_v3 = vpop.xlane.xlu1 %2350 }
 0xb45   : > { %v2354_v6 = vsub.f32 %v2342_v61, %v2352_v2  ;;  %v2353_v7 = vmul.f32 0.03125, %v2351_v3 }
 0xb47   : > { %v2355_v8 = vsub.f32 %v2343_v63, %v2353_v7  ;;  %v2356_v4 = vmul.f32 %v2354_v6, %v2354_v6 }
 0xb49   : > { %v2358_v5 = vsel %vm1224_vm4, %v2356_v4, 0.0  ;;  %v2357_v9 = vmul.f32 %v2355_v8, %v2355_v8 }
 0xb4a   : > { %2359 = vadd.xlane.f32.xlu0 %v2358_v5 }
 0xb4b   : > { %v2361_v10 = vsel %vm1224_vm4, %v2357_v9, 0.0 }
 0xb4c   : > { %2362 = vadd.xlane.f32.xlu1 %v2361_v10 }
 0xbd7   : > { %v2360_v11 = vpop.xlane.xlu0 %2359 }
 0xbd8   : > { %v2364_v12 = vmul.f32 0.03125, %v2360_v11 }
 0xbd9   : > { %v2363_v13 = vpop.xlane.xlu1 %2362 }
 0xbda   : > { %v2366_v14 = vadd.f32 1e-05, %v2364_v12  ;;  %v2365_v15 = vmul.f32 0.03125, %v2363_v13 }
 0xbdc   : > { %3278 = vrsqrt.f32 %v2366_v14  ;;  %v2367_v16 = vadd.f32 1e-05, %v2365_v15 }
 0xbde   : > { %3280 = vrsqrt.f32 %v2367_v16 }
 0xbe6   : > { %v3279_v18 = vpop.eup %3278 }
 0xbe7   : > { %v2370_v20 = vmul.f32 %v3279_v18, %v2354_v6 }
 0xbe8   : > { %v3281_v23 = vpop.eup %3280 }
 0xbe9   : > { %v2378_v24 = vmul.f32 %v2822_v19, %v2370_v20  ;;  %v2371_v22 = vmul.f32 %v3281_v23, %v2355_v8 }
 0xbeb   : > { %v2386_v25 = vadd.f32 %v2823_v21, %v2378_v24  ;;  %v2379_v26 = vmul.f32 %v2822_v19, %v2371_v22 }
 0xbed   : > { %2388 = vst.msk [vmem:[%s4462_s29] sm:$0xff] %vm1224_vm4, %v2386_v25  ;;  %v2387_v27 = vadd.f32 %v2823_v21, %v2379_v26 }
 0xbef   : > { %2389 = vst.msk [vmem:[%s4462_s29 + $0x8] sm:$0xff] %vm1224_vm4, %v2387_v27 }
 0xbf0   : > { %3647 = shalt.err (!%p3644_p6)
}
 0xbf1   : > { %s3648_s29 = scalar_lea.hbm %s4666_s9, 256  ;;  %s3652_s8 = scalar_lea.hbm %s4913_s17, 512 }
 0xbf2   : > { %p3649_p4 = scmp.ne.s32.totalorder %s4666_s9, %s3648_s29  ;;  %p3653_p8 = scmp.lt.u32.totalorder %s4666_s9, %s4913_s17 }
 0xbf3   : > { %p3654_p11 = scmp.lt.u32.totalorder %s3652_s8, %s3648_s29  ;;  %p3656_p3 = scmp.lt.u32.totalorder %s3648_s29, %s4666_s9 }
 0xbf4   : > { %p3650_p5 = pnand %p3649_p4, %p4915_p0 }
 0xbf5   : > { %p3655_p10 = por %p3654_p11, %p3653_p8 }
 0xbf6   : > { %p3651_p7 = pneg %p3650_p5 }
 0xbf7   : > { %p3657_p12 = por %p3656_p3, %p3655_p10 }
 0xbf9   : > { %p3658_p2 = pnand %p3657_p12, %p3651_p7 }
 0xbfb   : > { %3661 = shalt.err (!%p3658_p2)
}
 0xbfc   : > { %s3794_s21 = smov 128   ;;  %s3795_s1 = smov 8  }
 0xbfd   : > { %3027 = dma.vmem_to_hbm [thread:$0]  (%p4915_p0), %s4668_s11, 256, %s4666_s9, %s4676_s7, %s3794_s21, %s3794_s21, %s3795_s1  }
 0xbfe PF: > { %s4916_s2 = sld [smem:[#allocation33_spill]]  ;;  %s4917_s14 = sld [smem:[#allocation24_spill]] }
 0xbff   : > { %s4918_s20 = sld [smem:[#allocation37_spill]] }
 0xc04   : > { %p3080_p13 = scmp.ge.s32.totalorder %s4916_s2, 2  ;;  %s2419_s0 = sand.u32 1, %s4917_s14  }
 0xc05   : > { %p4919_p9 = scmp.ne.s32.totalorder %s4918_s20, 0  ;;  %s2420_s4 = scalar_lea.sflag [#allocation4], %s2419_s0 }
 0xc07   : > { %p3068_p1 = pnand %p3080_p13, %p4919_p9 }
 0xc09   : > { %3723 = dma.done.wait (!%p3068_p1), %s2420_s4, 256  }
 0xc0a   : > { %3725 = vsyncadd (!%p3068_p1), %s2420_s4, 4294967040  ;;  %s37_s5 = sadd.s32 1, %s4916_s2   ;;  %s4920_s2 = sld [smem:[#allocation25_spill]] }
 0xc0b   : > { %p34_p6 = scmp.ge.s32.totalorder %s37_s5, 6   ;;  %s4921_s25 = sld [smem:[#allocation26_spill]] }
 0xc0c   : > { %s4922_s26 = sld [smem:[#allocation41_spill]]  ;;  %s4923_s27 = sld [smem:[#allocation27_spill]] }
 0xc0d   : > { %s4924_s3 = sld [smem:[#allocation28_spill]]  ;;  %s4925_s28 = sld [smem:[#allocation40_spill]] }
 0xc0e   : > { %s4926_s29 = sld [smem:[#allocation31_spill]]  ;;  %s4927_s0 = sld [smem:[#allocation32_spill]] }
 0xc0f   : > { %s4928_s4 = sld [smem:[#allocation38_spill]]  ;;  %s4929_s30 = sld [smem:[#allocation39_spill]] }
 0xc10   :  { %36 = sbr.rel (!%p34_p6) target bundleno = 33 (0x21), region = 272 }
 0xc17   :  { %2425 = vsyncpa [#allocation3], 1 }
 0xc18   :  { %2427 = vsyncpa [#allocation3 + $0x1], 1 }
 0xc19   :  { %2428 = vsyncpa [#allocation6], 1 }
 0xc1a   :  { %2429 = vsyncpa [#allocation9], 1 }
 0xc1b   :  { %2430 = vsyncpa [#allocation4], 1 }
 0xc1c   :  { %2432 = vsyncpa [#allocation4 + $0x1], 1 }

// kernel: tpu_custom_call.1
= control target key start
LH: loop header
LB: loop body
LE: loop exit
PB: predicated region body
PF: predicated region fallthrough
CT: control target
= control target key end

     0   :  { %s4737_s0 = inlined_call_operand.vmem [shape: f32[32,16], index: 0, kind: input, shape index: {}]   ;;  %s4738_s1 = inlined_call_operand.hbm [shape: f32[16,32], index: 1, kind: input, shape index: {}]   ;;  %s4739_s2 = inlined_call_operand.hbm [shape: f32[16,16], index: 2, kind: input, shape index: {}]   ;;  %s4740_s3 = inlined_call_operand.hbm [shape: bf16[16,32], index: 3, kind: input, shape index: {}]   ;;  %s4741_s4 = inlined_call_operand.hbm [shape: f32[1,32], index: 4, kind: input, shape index: {}]   ;;  %s4742_s5 = inlined_call_operand.vmem [shape: bf16[2,32,32], index: 5, kind: input, shape index: {}]   ;;  %s4743_s6 = inlined_call_operand.hbm [shape: f32[2,1,32], index: 6, kind: input, shape index: {}]   ;;  %s4744_s7 = inlined_call_operand.vmem [shape: bf16[2,32,32], index: 7, kind: input, shape index: {}]   ;;  %s4745_s8 = inlined_call_operand.hbm [shape: f32[2,1,32], index: 8, kind: input, shape index: {}]   ;;  %s4746_s9 = inlined_call_operand.hbm [shape: bf16[2,32,32], index: 9, kind: input, shape index: {}]   ;;  %s4747_s10 = inlined_call_operand.hbm [shape: f32[2,1,32], index: 10, kind: input, shape index: {}]   ;;  %s4748_s11 = inlined_call_operand.hbm [shape: bf16[2,4,8,32], index: 11, kind: input, shape index: {}]   ;;  %s4749_s12 = inlined_call_operand.hbm [shape: f32[2,1,32], index: 12, kind: input, shape index: {}]   ;;  %s4750_s13 = inlined_call_operand.hbm [shape: f32[2,1,32], index: 13, kind: input, shape index: {}]   ;;  %s4751_s14 = inlined_call_operand.vmem [shape: f32[2,1,32], index: 14, kind: input, shape index: {}]   ;;  %s4752_s15 = inlined_call_operand.vmem [shape: bf16[2,32,32], index: 15, kind: input, shape index: {}]   ;;  %s4753_s16 = inlined_call_operand.vmem [shape: f32[2,1,32], index: 16, kind: input, shape index: {}]   ;;  %s4754_s17 = inlined_call_operand.hbm [shape: bf16[2,32,32], index: 17, kind: input, shape index: {}]   ;;  %s4755_s18 = inlined_call_operand.vmem [shape: f32[2,1,32], index: 18, kind: input, shape index: {}]   ;;  %s4756_s19 = inlined_call_operand.vmem [shape: f32[2,1,32], index: 19, kind: input, shape index: {}]   ;;  %s4757_s20 = inlined_call_operand.vmem [shape: f32[2,1,32], index: 20, kind: input, shape index: {}]   ;;  %s4758_s21 = inlined_call_operand.hbm [shape: f32[32,32], index: 21, kind: output, shape index: {}]  }
   0x1   :  { %4805 = sst [smem:[#allocation42_spill]] %s4737_s0 }
   0x2   :  { %4806 = sst [smem:[#allocation43_spill]] %s4738_s1 }
   0x3   :  { %4807 = sst [smem:[#allocation44_spill]] %s4739_s2 }
   0x4   :  { %4808 = sst [smem:[#allocation45_spill]] %s4740_s3 }
   0x5   :  { %4809 = sst [smem:[#allocation46_spill]] %s4741_s4 }
   0x6   :  { %4810 = sst [smem:[#allocation47_spill]] %s4742_s5 }
   0x7   :  { %4811 = sst [smem:[#allocation48_spill]] %s4743_s6 }
   0x8   :  { %4812 = sst [smem:[#allocation49_spill]] %s4744_s7 }
   0x9   :  { %4813 = sst [smem:[#allocation50_spill]] %s4745_s8 }
   0xa   :  { %4814 = sst [smem:[#allocation51_spill]] %s4746_s9 }
   0xb   :  { %4815 = sst [smem:[#allocation52_spill]] %s4747_s10 }
   0xc   :  { %4816 = sst [smem:[#allocation53_spill]] %s4748_s11 }
   0xd   :  { %4817 = sst [smem:[#allocation54_spill]] %s4749_s12 }
   0xe   :  { %4818 = sst [smem:[#allocation55_spill]] %s4750_s13 }
   0xf   :  { %4819 = sst [smem:[#allocation56_spill]] %s4751_s14 }
  0x10   :  { %4820 = sst [smem:[#allocation57_spill]] %s4752_s15 }
  0x11   :  { %4821 = sst [smem:[#allocation58_spill]] %s4753_s16 }
  0x12   :  { %4822 = sst [smem:[#allocation59_spill]] %s4754_s17 }
  0x13   :  { %4823 = sst [smem:[#allocation60_spill]] %s4755_s18 }
  0x14   :  { %4824 = sst [smem:[#allocation61_spill]] %s4756_s19 }
  0x15   :  { %4825 = sst [smem:[#allocation62_spill]] %s4757_s20 }
  0x16   :  { %4826 = sst [smem:[#allocation63_spill]] %s4758_s21 }
  0x17   :  { %26 = vsyncpa [#allocation3], 0 }
  0x18   :  { %27 = vsyncpa [#allocation6], 0 }
  0x19   :  { %28 = vsyncpa [#allocation9], 0 }
  0x1a   :  { %29 = vsyncpa [#allocation4], 0 }
  0x1b   :  { %31 = vsyncpa [#allocation4 + $0x1], 0  ;;  %s3906_s2 = smov 0   ;;  %s3908_s25 = smov 0  }
  0x1c   :  { %s3910_s26 = smov 0   ;;  %s3912_s27 = smov 0  }
  0x1d   :  { %s3914_s3 = smov 0   ;;  %s3916_s28 = smov 0  }
  0x1e   :  { %s3918_s29 = smov 0   ;;  %s3920_s0 = smov 0  }
  0x1f   :  { %s3922_s4 = smov 0   ;;  %s3924_s30 = smov 0  }
  0x20   :  { %s3926_s5 = smov 0  }
  0x21 LB: > { %4827 = sst [smem:[#allocation24_spill]] %s3728_s2  ;;  %s3960_s22 = sadd.s32 4294967295, %s3768_s5   ;;  %s3768_s5 = sphi %s3926_s5, %s37_s5   ;;  %s3764_s30 = sphi %s3924_s30, %s4929_s30   ;;  %s3760_s4 = sphi %s3922_s4, %s4928_s4   ;;  %s3756_s0 = sphi %s3920_s0, %s4927_s0   ;;  %s3752_s29 = sphi %s3918_s29, %s4926_s29   ;;  %s3748_s28 = sphi %s3916_s28, %s4925_s28   ;;  %s3744_s3 = sphi %s3914_s3, %s4924_s3   ;;  %s3740_s27 = sphi %s3912_s27, %s4923_s27   ;;  %s3736_s26 = sphi %s3910_s26, %s4922_s26   ;;  %s3732_s25 = sphi %s3908_s25, %s4921_s25   ;;  %s3728_s2 = sphi %s3906_s2, %s4920_s2  }
  0x22   : > { %4828 = sst [smem:[#allocation25_spill]] %s3732_s25  ;;  %s2745_s23 = sadd.s32 4294967294, %s3768_s5  }
  0x23   : > { %4829 = sst [smem:[#allocation26_spill]] %s3736_s26  ;;  %p205_p0 = scmp.ne.s32.totalorder %s3744_s3, %s3740_s27 }
  0x24   : > { %4830 = sst [smem:[#allocation27_spill]] %s3744_s3  ;;  %p4768_p1 = scmp.eq.s32.totalorder %s3960_s22, 0 }
  0x25   : > { %4831 = sst [smem:[#allocation28_spill]] %s3748_s28  ;;  %p592_p2 = scmp.ne.s32.totalorder %s3736_s26, %s3732_s25 }
  0x26   : > { %4832 = sst [smem:[#allocation29_spill]] %s3752_s29  ;;  %p3970_p3 = por %p4768_p1, %p205_p0 }
  0x27   : > { %4833 = sst [smem:[#allocation30_spill]] %s3756_s0  ;;  %p593_p4 = scmp.eq.s32.totalorder %s3960_s22, 3 }
  0x28   : > { %4834 = sst [smem:[#allocation31_spill]] %s3760_s4  ;;  %p598_p5 = scmp.ne.s32.totalorder %s3732_s25, %s3728_s2 }
  0x29   : > { %4835 = sst [smem:[#allocation32_spill]] %s3764_s30  ;;  %p599_p6 = scmp.eq.s32.totalorder %s2745_s23, 3 }
  0x2a   : > { %4836 = sst [smem:[#allocation33_spill]] %s3768_s5  ;;  %p3977_p7 = por %p593_p4, %p592_p2 }
  0x2b   : > { %4837 = sst [smem:[#allocation34_spill]] %s3960_s22  ;;  %p2746_p8 = scmp.ge.s32.totalorder %s3768_s5, 1 }
  0x2c   : > { %s4838_s24 = scalar_select %p3970_p3, 1, 0 }
  0x2d   : > { %s4840_s21 = scalar_select %p3977_p7, 1, 0 }
  0x2e   : > { %4839 = sst [smem:[#allocation35_spill]] %s4838_s24  ;;  %p3982_p9 = por %p599_p6, %p598_p5 }
  0x2f   : > { %4841 = sst [smem:[#allocation36_spill]] %s4840_s21  ;;  %p606_p10 = scmp.lt.s32.totalorder %s3768_s5, 5 }
  0x30   : > { %s4842_s20 = scalar_select %p3982_p9, 1, 0 }
  0x31   : > { %p3987_p11 = pnand %p2746_p8, %p606_p10  ;;  %s3770_s1 = smov [#allocation2]  }
  0x32   : > { %4843 = sst [smem:[#allocation37_spill]] %s4842_s20  ;;  %s618_s19 = sshll.u32 %s3770_s1, 4  ;;  %s619_s19 = int_to_ptr.vmem [resolvable:$true] %s618_s19 }
  0x33   : > { %s4844_s27 = scalar_select %p3987_p11, 1, 0 }
  0x34   : > { %p3029_p12 = pneg %p3987_p11  ;;  %s4846_s18 = sld [smem:[#allocation43_spill]] }
  0x36   : > { %p3995_p13 = pnand %p3029_p12, %p4768_p1 }
  0x38   : > { %s4845_s23 = scalar_select %p3995_p13, 1, 0 }
  0x39   : > { %p4007_p2 = pneg %p3995_p13 }
  0x3a   : > { %s3282_s20 = scalar_lea.hbm %s4846_s18, 256 }
  0x3b   : > { %p3283_p0 = scmp.ne.s32.totalorder %s4846_s18, %s3282_s20  ;;  %p3289_p6 = scmp.lt.u32.totalorder %s3282_s20, %s4846_s18 }
  0x3c   : > { %s4847_s1 = scalar_select %p4007_p2, 1, 0 }
  0x3d   : > { %p3285_p4 = pnand %p4007_p2, %p3283_p0 }
  0x3f   : > { %p3286_p5 = pneg %p3285_p4 }
  0x41   : > { %p3291_p8 = pnand %p3289_p6, %p3286_p5 }
  0x43   : > { %3294 = shalt.err (!%p3291_p8)
}
  0x44   : > { %s3295_s21 = scalar_lea.vmem %s619_s19, 256  ;;  %p3303_p9 = scmp.lt.s32.totalorder %s619_s19, %s619_s19 }
  0x45   : > { %p3296_p10 = scmp.ne.s32.totalorder %s619_s19, %s3295_s21  ;;  %p3304_p7 = scmp.lt.s32.totalorder %s3295_s21, %s3295_s21 }
  0x47   : > { %p3298_p12 = pnand %p3296_p10, %p4007_p2  ;;  %p3305_p3 = por %p3304_p7, %p3303_p9 }
  0x49   : > { %p3299_p1 = pneg %p3298_p12 }
  0x4b   : > { %p3306_p11 = pnand %p3305_p3, %p3299_p1 }
  0x4d   : > { %3309 = shalt.err (!%p3306_p11)
}
  0x4e   : > { %s4773_s15 = smov 128   ;;  %s4774_s7 = smov 8  }
  0x4f   : > { %3032 = dma.hbm_to_vmem [thread:$0]  (!%p3995_p13), %s4846_s18, 256, %s619_s19, [#allocation3], %s4773_s15, %s4773_s15, %s4774_s7  }
  0x50   : > { %s46_s20 = sadd.s32 1, %s3760_s4  ;;  %s49_s2 = sadd.s32 1, %s3764_s30 }
  0x51   : > { %p47_p1 = scmp.ge.s32.totalorder %s46_s20, 2  ;;  %s192_s21 = sadd.s32 1, %s3748_s28 }
  0x52   : > { %p199_p3 = scmp.ne.s32.totalorder %s3748_s28, %s3744_s3  ;;  %p200_p7 = scmp.eq.s32.totalorder %s3768_s5, 0 }
  0x53   : > { %s4931_s20 = smov (%p47_p1, %s46_s20), 0  ;;  %s4933_s2 = smov (!%p47_p1, %s49_s2), %s3764_s30 }
  0x54   : > { %4848 = sst [smem:[#allocation38_spill]] %s4931_s20  ;;  %s189_s29 = ssub.s32 %s3760_s4, %s4931_s20 }
  0x55   : > { %p51_p9 = scmp.ge.s32.totalorder %s4933_s2, 2  ;;  %p190_p11 = scmp.eq.s32.totalorder %s189_s29, 0 }
  0x56   : > { %p4037_p0 = por %p200_p7, %p199_p3  ;;  %p3075_p4 = scmp.lt.s32.totalorder %s3768_s5, 4 }
  0x57   : > { %s4935_s2 = smov (%p51_p9, %s4933_s2), 0  ;;  %s686_s15 = sand.u32 1, %s3768_s5  }
  0x58   : > { %4850 = sst [smem:[#allocation39_spill]] %s4935_s2  ;;  %s579_s16 = ssub.s32 %s3764_s30, %s4935_s2 }
  0x59   : > { %s4045_s14 = scalar_select %p190_p11, %s3748_s28, %s192_s21  }
  0x5a   : > { %p580_p5 = scmp.eq.s32.totalorder %s579_s16, 0  ;;  %s4051_s7 = sand.u32 1, %s3748_s28  }
  0x5b   : > { %4851 = sst [smem:[#allocation40_spill]] %s4045_s14  ;;  %s4054_s18 = sshll.u32 %s3760_s4, 4 }
  0x5c   : > { %s4852_s29 = sadd.s32 1, %s3736_s26  ;;  %s4854_s6 = sld [smem:[#allocation48_spill]] }
  0x5d   : > { %s4059_s20 = scalar_select %p580_p5, %s3736_s26, %s4852_s29  }
  0x5e   : > { %s689_s21 = scalar_lea.vmem [#allocation10], %s4051_s7  ;;  %p4070_p6 = pnand %p3075_p4, %p4037_p0 }
  0x5f   : > { %4853 = sst [smem:[#allocation41_spill]] %s4059_s20  ;;  %s696_s16 = sshll.u32 %s689_s21, 4  ;;  %s4074_s16 = int_to_ptr.vmem [resolvable:$true] %s696_s16 }
  0x60   : > { %s4855_s2 = scalar_select %p4070_p6, 1, 0 }
  0x61   : > { %s4856_s8 = sld [smem:[#allocation50_spill]]  ;;  %s4082_s0 = scalar_lea.sflag [#allocation3], %s686_s15 }
  0x62   : > { %s4065_s24 = scalar_lea.hbm %s4854_s6, %s4054_s18  ;;  %p4088_p10 = pneg %p4070_p6 }
  0x63   : > { %s3310_s14 = scalar_lea.hbm %s4065_s24, 16  ;;  %s3315_s20 = scalar_lea.hbm %s4854_s6, 32 }
  0x64   : > { %p3311_p8 = scmp.ne.s32.totalorder %s4065_s24, %s3310_s14  ;;  %p3316_p3 = scmp.lt.u32.totalorder %s4065_s24, %s4854_s6 }
  0x65   : > { %s4857_s21 = scalar_select %p4088_p10, 1, 0 }
  0x66   : > { %p3313_p12 = pnand %p4088_p10, %p3311_p8  ;;  %p3317_p7 = scmp.lt.u32.totalorder %s3315_s20, %s3310_s14 }
  0x67   : > { %s4080_s25 = scalar_lea.hbm %s4856_s8, %s4054_s18  ;;  %p3319_p11 = scmp.lt.u32.totalorder %s3310_s14, %s4065_s24 }
  0x68   : > { %p3314_p1 = pneg %p3313_p12  ;;  %p3318_p9 = por %p3317_p7, %p3316_p3 }
  0x6a   : > { %p3320_p0 = por %p3319_p11, %p3318_p9 }
  0x6c   : > { %p3321_p4 = pnand %p3320_p0, %p3314_p1 }
  0x6e   : > { %3324 = shalt.err (!%p3321_p4)
}
  0x6f   : > { %s3325_s15 = scalar_lea.vmem %s4074_s16, 16  ;;  %s3773_s28 = smov [#allocation10]  }
  0x70   : > { %p3326_p5 = scmp.ne.s32.totalorder %s4074_s16, %s3325_s15  ;;  %s3330_s19 = sshll.u32 %s3773_s28, 4  ;;  %s3331_s19 = int_to_ptr.vmem [resolvable:$false] %s3330_s19 }
  0x71   : > { %s3332_s30 = scalar_lea.vmem %s3331_s19, 32  ;;  %p3333_p13 = scmp.lt.s32.totalorder %s4074_s16, %s3331_s19 }
  0x72   : > { %p3328_p8 = pnand %p3326_p5, %p4088_p10  ;;  %p3334_p2 = scmp.lt.s32.totalorder %s3332_s30, %s3325_s15 }
  0x74   : > { %p3329_p12 = pneg %p3328_p8  ;;  %p3335_p3 = por %p3334_p2, %p3333_p13 }
  0x76   : > { %p3336_p7 = pnand %p3335_p3, %p3329_p12 }
  0x78   : > { %3339 = shalt.err (!%p3336_p7)
}
  0x79   : > { %3045 = dma.hbm_to_vmem [thread:$0]  (!%p4070_p6), %s4065_s24, 16, %s4074_s16, %s4082_s0  }
  0x7a   : > { %s714_s20 = scalar_lea.vmem [#allocation11], %s4051_s7  ;;  %s3340_s29 = scalar_lea.hbm %s4080_s25, 16 }
  0x7b   : > { %s721_s14 = sshll.u32 %s714_s20, 4  ;;  %p3341_p1 = scmp.ne.s32.totalorder %s4080_s25, %s3340_s29  ;;  %s722_s14 = int_to_ptr.vmem [resolvable:$true] %s721_s14 }
  0x7c   : > { %s3345_s19 = scalar_lea.hbm %s4856_s8, 32  ;;  %p3346_p9 = scmp.lt.u32.totalorder %s4080_s25, %s4856_s8 }
  0x7d   : > { %p3343_p13 = pnand %p3341_p1, %p4088_p10  ;;  %p3347_p11 = scmp.lt.u32.totalorder %s3345_s19, %s3340_s29 }
  0x7e   : > { %p3349_p4 = scmp.lt.u32.totalorder %s3340_s29, %s4080_s25 }
  0x7f   : > { %p3344_p2 = pneg %p3343_p13  ;;  %p3348_p0 = por %p3347_p11, %p3346_p9 }
  0x81   : > { %p3350_p5 = por %p3349_p4, %p3348_p0 }
  0x83   : > { %p3351_p8 = pnand %p3350_p5, %p3344_p2 }
  0x85   : > { %3354 = shalt.err (!%p3351_p8)
}
  0x86   : > { %s3355_s24 = scalar_lea.vmem %s722_s14, 16  ;;  %s3774_s16 = smov [#allocation11]  }
  0x87   : > { %p3356_p12 = scmp.ne.s32.totalorder %s722_s14, %s3355_s24  ;;  %s3360_s20 = sshll.u32 %s3774_s16, 4  ;;  %s3361_s20 = int_to_ptr.vmem [resolvable:$false] %s3360_s20 }
  0x88   : > { %s3362_s15 = scalar_lea.vmem %s3361_s20, 32  ;;  %p3363_p1 = scmp.lt.s32.totalorder %s722_s14, %s3361_s20 }
  0x89   : > { %p3358_p3 = pnand %p3356_p12, %p4088_p10  ;;  %p3364_p13 = scmp.lt.s32.totalorder %s3362_s15, %s3355_s24 }
  0x8b   : > { %p3359_p7 = pneg %p3358_p3  ;;  %p3365_p6 = por %p3364_p13, %p3363_p1 }
  0x8d   : > { %p3366_p9 = pnand %p3365_p6, %p3359_p7 }
  0x8f   : > { %3369 = shalt.err (!%p3366_p9)
}
  0x90   : > { %p4858_p11 = scmp.ne.s32.totalorder %s4855_s2, 0  ;;  %s4132_s6 = sshll.u32 %s4051_s7, 4 }
  0x91   : > { %s4135_s29 = sshll.u32 %s3760_s4, 8  ;;  %s4859_s9 = sld [smem:[#allocation51_spill]] }
  0x92   : > { %3048 = dma.hbm_to_vmem [thread:$0]  (!%p4858_p11), %s4080_s25, 16, %s722_s14, %s4082_s0  }
  0x93   : > { %s732_s24 = scalar_lea.vmem [#allocation12], %s4132_s6  ;;  %s4860_s10 = sld [smem:[#allocation52_spill]] }
  0x94   : > { %s739_s16 = sshll.u32 %s732_s24, 4  ;;  %s4144_s16 = int_to_ptr.vmem [resolvable:$true] %s739_s16 }
  0x97   : > { %s4141_s30 = scalar_lea.hbm %s4859_s9, %s4135_s29  ;;  %s3375_s8 = scalar_lea.hbm %s4859_s9, 512 }
  0x98   : > { %s3370_s15 = scalar_lea.hbm %s4141_s30, 256  ;;  %p3376_p4 = scmp.lt.u32.totalorder %s4141_s30, %s4859_s9 }
  0x99   : > { %s4150_s20 = scalar_lea.hbm %s4860_s10, %s4054_s18  ;;  %p3371_p6 = scmp.ne.s32.totalorder %s4141_s30, %s3370_s15 }
  0x9a   : > { %p3377_p5 = scmp.lt.u32.totalorder %s3375_s8, %s3370_s15  ;;  %p3379_p12 = scmp.lt.u32.totalorder %s3370_s15, %s4141_s30 }
  0x9b   : > { %p3373_p2 = pnand %p3371_p6, %p4088_p10 }
  0x9c   : > { %p3378_p8 = por %p3377_p5, %p3376_p4 }
  0x9d   : > { %p3374_p0 = pneg %p3373_p2 }
  0x9e   : > { %p3380_p3 = por %p3379_p12, %p3378_p8 }
  0xa0   : > { %p3381_p7 = pnand %p3380_p3, %p3374_p0 }
  0xa2   : > { %3384 = shalt.err (!%p3381_p7)
}
  0xa3   : > { %s3385_s24 = scalar_lea.vmem %s4144_s16, 256  ;;  %s3775_s25 = smov [#allocation12]  }
  0xa4   : > { %p3386_p1 = scmp.ne.s32.totalorder %s4144_s16, %s3385_s24  ;;  %s3390_s14 = sshll.u32 %s3775_s25, 4  ;;  %s3391_s14 = int_to_ptr.vmem [resolvable:$false] %s3390_s14 }
  0xa5   : > { %s3392_s26 = scalar_lea.vmem %s3391_s14, 512  ;;  %p3393_p6 = scmp.lt.s32.totalorder %s4144_s16, %s3391_s14 }
  0xa6   : > { %p3388_p13 = pnand %p3386_p1, %p4088_p10  ;;  %p3394_p2 = scmp.lt.s32.totalorder %s3392_s26, %s3385_s24 }
  0xa8   : > { %p3389_p9 = pneg %p3388_p13  ;;  %p3395_p4 = por %p3394_p2, %p3393_p6 }
  0xaa   : > { %p3396_p5 = pnand %p3395_p4, %p3389_p9 }
  0xac   : > { %3399 = shalt.err (!%p3396_p5)
}
  0xad   : > { %s3776_s8 = smov 64   ;;  %s3777_s4 = smov 4  }
  0xae   : > { %3051 = dma.hbm_to_vmem [thread:$0]  (!%p4858_p11), %s4141_s30, 256, %s4144_s16, %s4082_s0, %s3776_s8, %s3776_s8, %s3777_s4  }
  0xaf   : > { %s752_s15 = scalar_lea.vmem [#allocation13], %s4051_s7  ;;  %s4861_s11 = sld [smem:[#allocation53_spill]] }
  0xb0   : > { %s759_s28 = sshll.u32 %s752_s15, 4  ;;  %s3400_s14 = scalar_lea.hbm %s4150_s20, 16  ;;  %s760_s28 = int_to_ptr.vmem [resolvable:$true] %s759_s28 }
  0xb1   : > { %p3401_p0 = scmp.ne.s32.totalorder %s4150_s20, %s3400_s14  ;;  %s3405_s5 = scalar_lea.hbm %s4860_s10, 32 }
  0xb2   : > { %p3406_p3 = scmp.lt.u32.totalorder %s4150_s20, %s4860_s10  ;;  %p3407_p7 = scmp.lt.u32.totalorder %s3405_s5, %s3400_s14 }
  0xb3   : > { %p3403_p8 = pnand %p3401_p0, %p4088_p10  ;;  %p3409_p13 = scmp.lt.u32.totalorder %s3400_s14, %s4150_s20 }
  0xb4   : > { %p3408_p1 = por %p3407_p7, %p3406_p3 }
  0xb5   : > { %s4182_s25 = scalar_lea.hbm %s4861_s11, %s4135_s29  ;;  %p3404_p12 = pneg %p3403_p8 }
  0xb6   : > { %p3410_p9 = por %p3409_p13, %p3408_p1 }
  0xb8   : > { %p3411_p6 = pnand %p3410_p9, %p3404_p12 }
  0xba   : > { %3414 = shalt.err (!%p3411_p6)
}
  0xbb   : > { %s3415_s30 = scalar_lea.vmem %s760_s28, 16  ;;  %s3778_s16 = smov [#allocation13]  }
  0xbc   : > { %p3416_p2 = scmp.ne.s32.totalorder %s760_s28, %s3415_s30  ;;  %s3420_s15 = sshll.u32 %s3778_s16, 4  ;;  %s3421_s15 = int_to_ptr.vmem [resolvable:$false] %s3420_s15 }
  0xbd   : > { %s3422_s9 = scalar_lea.vmem %s3421_s15, 32  ;;  %p3423_p0 = scmp.lt.s32.totalorder %s760_s28, %s3421_s15 }
  0xbe   : > { %p3418_p4 = pnand %p3416_p2, %p4088_p10  ;;  %p3424_p8 = scmp.lt.s32.totalorder %s3422_s9, %s3415_s30 }
  0xc0   : > { %p3419_p5 = pneg %p3418_p4  ;;  %p3425_p11 = por %p3424_p8, %p3423_p0 }
  0xc2   : > { %p3426_p3 = pnand %p3425_p11, %p3419_p5 }
  0xc4   : > { %3429 = shalt.err (!%p3426_p3)
}
  0xc5   : > { %p4862_p7 = scmp.ne.s32.totalorder %s4855_s2, 0  ;;  %s770_s3 = scalar_lea.vmem [#allocation14], %s4132_s6 }
  0xc6   : > { %s777_s5 = sshll.u32 %s770_s3, 4  ;;  %s4863_s12 = sld [smem:[#allocation54_spill]]  ;;  %s4203_s5 = int_to_ptr.vmem [resolvable:$true] %s777_s5 }
  0xc7   : > { %3054 = dma.hbm_to_vmem [thread:$0]  (!%p4862_p7), %s4150_s20, 16, %s760_s28, %s4082_s0  }
  0xc8   : > { %s3430_s14 = scalar_lea.hbm %s4182_s25, 256  ;;  %s3435_s16 = scalar_lea.hbm %s4861_s11, 512 }
  0xc9   : > { %p3431_p11 = scmp.ne.s32.totalorder %s4182_s25, %s3430_s14  ;;  %p3436_p13 = scmp.lt.u32.totalorder %s4182_s25, %s4861_s11 }
  0xca   : > { %p3437_p9 = scmp.lt.u32.totalorder %s3435_s16, %s3430_s14  ;;  %p3439_p2 = scmp.lt.u32.totalorder %s3430_s14, %s4182_s25 }
  0xcb   : > { %p3433_p12 = pnand %p3431_p11, %p4088_p10 }
  0xcc   : > { %s4209_s24 = scalar_lea.hbm %s4863_s12, %s4054_s18  ;;  %p3438_p6 = por %p3437_p9, %p3436_p13 }
  0xcd   : > { %p3434_p1 = pneg %p3433_p12 }
  0xce   : > { %p3440_p4 = por %p3439_p2, %p3438_p6 }
  0xd0   : > { %p3441_p5 = pnand %p3440_p4, %p3434_p1 }
  0xd2   : > { %3444 = shalt.err (!%p3441_p5)
}
  0xd3   : > { %s3445_s28 = scalar_lea.vmem %s4203_s5, 256  ;;  %s3779_s9 = smov [#allocation14]  }
  0xd4   : > { %p3446_p0 = scmp.ne.s32.totalorder %s4203_s5, %s3445_s28  ;;  %s3450_s3 = sshll.u32 %s3779_s9, 4  ;;  %s3451_s3 = int_to_ptr.vmem [resolvable:$false] %s3450_s3 }
  0xd5   : > { %s3452_s22 = scalar_lea.vmem %s3451_s3, 512  ;;  %p3453_p11 = scmp.lt.s32.totalorder %s4203_s5, %s3451_s3 }
  0xd6   : > { %p3448_p8 = pnand %p3446_p0, %p4088_p10  ;;  %p3454_p12 = scmp.lt.s32.totalorder %s3452_s22, %s3445_s28 }
  0xd8   : > { %p3449_p3 = pneg %p3448_p8  ;;  %p3455_p13 = por %p3454_p12, %p3453_p11 }
  0xda   : > { %p3456_p9 = pnand %p3455_p13, %p3449_p3 }
  0xdc   : > { %3459 = shalt.err (!%p3456_p9)
}
  0xdd   : > { %3057 = dma.hbm_to_vmem [thread:$0]  (!%p4862_p7), %s4182_s25, 256, %s4203_s5, %s4082_s0, %s3776_s8, %s3776_s8, %s3777_s4  }
  0xde   : > { %s790_s19 = scalar_lea.vmem [#allocation15], %s4051_s7  ;;  %s3780_s26 = smov [#allocation5]  }
  0xdf   : > { %s797_s14 = sshll.u32 %s790_s19, 4  ;;  %s631_s30 = sshll.u32 %s3780_s26, 4  ;;  %s4237_s14 = int_to_ptr.vmem [resolvable:$true] %s797_s14  ;;  %s632_s30 = int_to_ptr.vmem [resolvable:$true] %s631_s30 }
  0xe0   : > { %s3460_s16 = scalar_lea.hbm %s4209_s24, 16  ;;  %s3465_s28 = scalar_lea.hbm %s4863_s12, 32 }
  0xe1   : > { %p3461_p1 = scmp.ne.s32.totalorder %s4209_s24, %s3460_s16  ;;  %p3466_p4 = scmp.lt.u32.totalorder %s4209_s24, %s4863_s12 }
  0xe2   : > { %p3467_p5 = scmp.lt.u32.totalorder %s3465_s28, %s3460_s16  ;;  %p3469_p8 = scmp.lt.u32.totalorder %s3460_s16, %s4209_s24 }
  0xe3   : > { %p3463_p6 = pnand %p3461_p1, %p4088_p10 }
  0xe4   : > { %p3468_p0 = por %p3467_p5, %p3466_p4 }
  0xe5   : > { %p3464_p2 = pneg %p3463_p6 }
  0xe6   : > { %p3470_p3 = por %p3469_p8, %p3468_p0 }
  0xe8   : > { %p3471_p11 = pnand %p3470_p3, %p3464_p2 }
  0xea   : > { %3474 = shalt.err (!%p3471_p11)
}
  0xeb   : > { %s3475_s25 = scalar_lea.vmem %s4237_s14, 16  ;;  %s3781_s5 = smov [#allocation15]  }
  0xec   : > { %p3476_p12 = scmp.ne.s32.totalorder %s4237_s14, %s3475_s25  ;;  %s3480_s22 = sshll.u32 %s3781_s5, 4  ;;  %s3481_s22 = int_to_ptr.vmem [resolvable:$false] %s3480_s22 }
  0xed   : > { %s3482_s19 = scalar_lea.vmem %s3481_s22, 32  ;;  %p3483_p1 = scmp.lt.s32.totalorder %s4237_s14, %s3481_s22 }
  0xee   : > { %p3478_p13 = pnand %p3476_p12, %p4088_p10  ;;  %p3484_p6 = scmp.lt.s32.totalorder %s3482_s19, %s3475_s25 }
  0xf0   : > { %p3479_p9 = pneg %p3478_p13  ;;  %p3485_p4 = por %p3484_p6, %p3483_p1 }
  0xf2   : > { %p3486_p5 = pnand %p3485_p4, %p3479_p9 }
  0xf4   : > { %3489 = shalt.err (!%p3486_p5)
}
  0xf5   : > { %3060 = dma.hbm_to_vmem [thread:$0]  (!%p4862_p7), %s4209_s24, 16, %s4237_s14, %s4082_s0  }
  0xf6   : > { %s4864_s15 = sld [smem:[#allocation44_spill]]  ;;  %p4865_p0 = scmp.ne.s32.totalorder %s4847_s1, 0 }
  0xfc   : > { %s3490_s20 = scalar_lea.hbm %s4864_s15, 256 }
  0xfd   : > { %p3491_p2 = scmp.ne.s32.totalorder %s4864_s15, %s3490_s20  ;;  %p3497_p11 = scmp.lt.u32.totalorder %s3490_s20, %s4864_s15 }
  0xff   : > { %p3493_p8 = pnand %p3491_p2, %p4865_p0 }
 0x101   : > { %p3494_p3 = pneg %p3493_p8 }
 0x103   : > { %p3499_p12 = pnand %p3497_p11, %p3494_p3 }
 0x105   : > { %3502 = shalt.err (!%p3499_p12)
}
 0x106   : > { %s3503_s5 = scalar_lea.vmem %s632_s30, 256  ;;  %p3511_p6 = scmp.lt.s32.totalorder %s632_s30, %s632_s30 }
 0x107   : > { %p3504_p13 = scmp.ne.s32.totalorder %s632_s30, %s3503_s5  ;;  %p3512_p4 = scmp.lt.s32.totalorder %s3503_s5, %s3503_s5 }
 0x109   : > { %p3506_p9 = pnand %p3504_p13, %p4865_p0  ;;  %p3513_p5 = por %p3512_p4, %p3511_p6 }
 0x10b   : > { %p3507_p1 = pneg %p3506_p9 }
 0x10d   : > { %p3514_p7 = pnand %p3513_p5, %p3507_p1 }
 0x10f   : > { %3517 = shalt.err (!%p3514_p7)
}
 0x110   : > { %p4866_p2 = scmp.ne.s32.totalorder %s4845_s23, 0  ;;  %s4867_s24 = smov 8  }
 0x111   : > { %s4868_s14 = smov 128   ;;  %s4869_s13 = sld [smem:[#allocation55_spill]] }
 0x112   : > { %3035 = dma.hbm_to_vmem [thread:$0]  (!%p4866_p2), %s4864_s15, 256, %s632_s30, [#allocation6], %s4868_s14, %s4868_s14, %s4867_s24  }
 0x113   : > { %s807_s28 = scalar_lea.vmem [#allocation16], %s4051_s7 }
 0x114   : > { %s814_s9 = sshll.u32 %s807_s28, 4  ;;  %s815_s9 = int_to_ptr.vmem [resolvable:$true] %s814_s9 }
 0x117   : > { %s4286_s20 = scalar_lea.hbm %s4869_s13, %s4054_s18  ;;  %s3523_s30 = scalar_lea.hbm %s4869_s13, 32 }
 0x118   : > { %s3518_s3 = scalar_lea.hbm %s4286_s20, 16  ;;  %p3524_p11 = scmp.lt.u32.totalorder %s4286_s20, %s4869_s13 }
 0x119   : > { %p3519_p7 = scmp.ne.s32.totalorder %s4286_s20, %s3518_s3  ;;  %p3525_p12 = scmp.lt.u32.totalorder %s3523_s30, %s3518_s3 }
 0x11a   : > { %p3527_p9 = scmp.lt.u32.totalorder %s3518_s3, %s4286_s20 }
 0x11b   : > { %p3521_p8 = pnand %p3519_p7, %p4088_p10  ;;  %p3526_p13 = por %p3525_p12, %p3524_p11 }
 0x11d   : > { %p3522_p3 = pneg %p3521_p8  ;;  %p3528_p1 = por %p3527_p9, %p3526_p13 }
 0x11f   : > { %p3529_p6 = pnand %p3528_p1, %p3522_p3 }
 0x121   : > { %3532 = shalt.err (!%p3529_p6)
}
 0x122   : > { %s3533_s18 = scalar_lea.vmem %s815_s9, 16  ;;  %s3782_s7 = smov [#allocation16]  }
 0x123   : > { %p3534_p4 = scmp.ne.s32.totalorder %s815_s9, %s3533_s18  ;;  %s3538_s22 = sshll.u32 %s3782_s7, 4  ;;  %s3539_s22 = int_to_ptr.vmem [resolvable:$false] %s3538_s22 }
 0x124   : > { %s3540_s19 = scalar_lea.vmem %s3539_s22, 32  ;;  %p3541_p8 = scmp.lt.s32.totalorder %s815_s9, %s3539_s22 }
 0x125   : > { %p3536_p5 = pnand %p3534_p4, %p4088_p10  ;;  %p3542_p2 = scmp.lt.s32.totalorder %s3540_s19, %s3533_s18 }
 0x127   : > { %p3537_p7 = pneg %p3536_p5  ;;  %p3543_p0 = por %p3542_p2, %p3541_p8 }
 0x129   : > { %p3544_p11 = pnand %p3543_p0, %p3537_p7 }
 0x12b   : > { %3547 = shalt.err (!%p3544_p11)
}
 0x12c   : > { %p4870_p12 = scmp.ne.s32.totalorder %s4855_s2, 0  ;;  %s3783_s26 = smov [#allocation7]  }
 0x12d   : > { %s644_s16 = sshll.u32 %s3783_s26, 4  ;;  %s3784_s28 = smov [#allocation8]   ;;  %s645_s16 = int_to_ptr.vmem [resolvable:$true] %s644_s16 }
 0x12e   : > { %3063 = dma.hbm_to_vmem [thread:$0]  (!%p4870_p12), %s4286_s20, 16, %s815_s9, %s4082_s0  }
 0x12f   : > { %s658_s3 = sshll.u32 %s3784_s28, 4  ;;  %s4871_s30 = sld [smem:[#allocation45_spill]]  ;;  %s659_s3 = int_to_ptr.vmem [resolvable:$true] %s658_s3 }
 0x130   : > { %p4873_p2 = scmp.ne.s32.totalorder %s4847_s1, 0 }
 0x135   : > { %s4872_s24 = smov %s4871_s30  ;;  %s3548_s14 = scalar_lea.hbm %s4871_s30, 128 }
 0x136   : > { %p3549_p0 = scmp.ne.s32.totalorder %s4872_s24, %s3548_s14  ;;  %p3555_p9 = scmp.lt.u32.totalorder %s3548_s14, %s4872_s24 }
 0x138   : > { %p3551_p3 = pnand %p3549_p0, %p4873_p2 }
 0x13a   : > { %p3552_p13 = pneg %p3551_p3 }
 0x13c   : > { %p3557_p1 = pnand %p3555_p9, %p3552_p13 }
 0x13e   : > { %3560 = shalt.err (!%p3557_p1)
}
 0x13f   : > { %s3561_s20 = scalar_lea.vmem %s645_s16, 128  ;;  %p3569_p7 = scmp.lt.s32.totalorder %s645_s16, %s645_s16 }
 0x140   : > { %p3562_p6 = scmp.ne.s32.totalorder %s645_s16, %s3561_s20  ;;  %p3570_p8 = scmp.lt.s32.totalorder %s3561_s20, %s3561_s20 }
 0x142   : > { %p3564_p4 = pnand %p3562_p6, %p4873_p2  ;;  %p3571_p11 = por %p3570_p8, %p3569_p7 }
 0x144   : > { %p3565_p5 = pneg %p3564_p4 }
 0x146   : > { %p3572_p12 = pnand %p3571_p11, %p3565_p5 }
 0x148   : > { %3575 = shalt.err (!%p3572_p12)
}
 0x149   : > { %p4874_p0 = scmp.ne.s32.totalorder %s4845_s23, 0  ;;  %s4875_s5 = sld [smem:[#allocation46_spill]] }
 0x14b   : > { %3038 = dma.hbm_to_vmem [thread:$0]  (!%p4874_p0), %s4872_s24, 128, %s645_s16, [#allocation6], %s3776_s8, %s3776_s8, %s3777_s4  }
 0x14f   : > { %s4876_s14 = smov %s4875_s5  ;;  %s3576_s30 = scalar_lea.hbm %s4875_s5, 16 }
 0x150   : > { %p3577_p3 = scmp.ne.s32.totalorder %s4876_s14, %s3576_s30  ;;  %p3583_p9 = scmp.lt.u32.totalorder %s3576_s30, %s4876_s14 }
 0x152   : > { %p3579_p12 = pnand %p3577_p3, %p4873_p2 }
 0x154   : > { %p3580_p13 = pneg %p3579_p12 }
 0x156   : > { %p3585_p1 = pnand %p3583_p9, %p3580_p13 }
 0x158   : > { %3588 = shalt.err (!%p3585_p1)
}
 0x159   : > { %s3589_s20 = scalar_lea.vmem %s659_s3, 16  ;;  %s3596_s16 = scalar_lea.vmem %s659_s3, 32 }
 0x15a   : > { %p3590_p6 = scmp.ne.s32.totalorder %s659_s3, %s3589_s20  ;;  %p3597_p7 = scmp.lt.s32.totalorder %s659_s3, %s659_s3 }
 0x15b   : > { %p3598_p8 = scmp.lt.s32.totalorder %s3596_s16, %s3589_s20 }
 0x15c   : > { %p3592_p4 = pnand %p3590_p6, %p4873_p2 }
 0x15d   : > { %p3599_p11 = por %p3598_p8, %p3597_p7 }
 0x15e   : > { %p3593_p5 = pneg %p3592_p4 }
 0x160   : > { %p3600_p10 = pnand %p3599_p11, %p3593_p5 }
 0x162   : > { %3603 = shalt.err (!%p3600_p10)
}
 0x163   : > { %3041 = dma.hbm_to_vmem [thread:$0]  (!%p4874_p0), %s4876_s14, 16, %s659_s3, [#allocation9]  }
 0x164   : > { %s4877_s17 = sld [smem:[#allocation59_spill]]  ;;  %s845_s5 = scalar_lea.vmem [#allocation17], %s4132_s6 }
 0x165   : > { %s852_s30 = sshll.u32 %s845_s5, 4  ;;  %p4878_p2 = scmp.ne.s32.totalorder %s4857_s21, 0  ;;  %s4353_s30 = int_to_ptr.vmem [resolvable:$true] %s852_s30 }
 0x16a   : > { %s4350_s1 = scalar_lea.hbm %s4877_s17, %s4135_s29  ;;  %s3609_s18 = scalar_lea.hbm %s4877_s17, 512 }
 0x16b   : > { %s3604_s23 = scalar_lea.hbm %s4350_s1, 256  ;;  %p3610_p0 = scmp.lt.u32.totalorder %s4350_s1, %s4877_s17 }
 0x16c   : > { %p3605_p10 = scmp.ne.s32.totalorder %s4350_s1, %s3604_s23  ;;  %p3611_p13 = scmp.lt.u32.totalorder %s3609_s18, %s3604_s23 }
 0x16d   : > { %p3613_p1 = scmp.lt.u32.totalorder %s3604_s23, %s4350_s1 }
 0x16e   : > { %p3607_p3 = pnand %p3605_p10, %p4878_p2  ;;  %p3612_p9 = por %p3611_p13, %p3610_p0 }
 0x170   : > { %p3608_p12 = pneg %p3607_p3  ;;  %p3614_p6 = por %p3613_p1, %p3612_p9 }
 0x172   : > { %p3615_p4 = pnand %p3614_p6, %p3608_p12 }
 0x174   : > { %3618 = shalt.err (!%p3615_p4)
}
 0x175   : > { %s3619_s6 = scalar_lea.vmem %s4353_s30, 256  ;;  %s3785_s19 = smov [#allocation17]  }
 0x176   : > { %p3620_p5 = scmp.ne.s32.totalorder %s4353_s30, %s3619_s6  ;;  %s3624_s20 = sshll.u32 %s3785_s19, 4  ;;  %s3625_s20 = int_to_ptr.vmem [resolvable:$false] %s3624_s20 }
 0x177   : > { %s3626_s16 = scalar_lea.vmem %s3625_s20, 512  ;;  %p3627_p11 = scmp.lt.s32.totalorder %s4353_s30, %s3625_s20 }
 0x178   : > { %p3622_p7 = pnand %p3620_p5, %p4878_p2  ;;  %p3628_p10 = scmp.lt.s32.totalorder %s3626_s16, %s3619_s6 }
 0x17a   : > { %p3623_p8 = pneg %p3622_p7  ;;  %p3629_p3 = por %p3628_p10, %p3627_p11 }
 0x17c   : > { %p3630_p0 = pnand %p3629_p3, %p3623_p8 }
 0x17e   : > { %3633 = shalt.err (!%p3630_p0)
}
 0x17f   : > { %p4879_p12 = scmp.ne.s32.totalorder %s4855_s2, 0  ;;  %p4880_p2 = scmp.ne.s32.totalorder %s4844_s27, 0 }
 0x180   : > { %s4881_s21 = sld [smem:[#allocation34_spill]] (!%p4880_p2) }
 0x181   : > { %3066 = dma.hbm_to_vmem [thread:$0]  (!%p4879_p12), %s4350_s1, 256, %s4353_s30, %s4082_s0, %s3776_s8, %s3776_s8, %s3777_s4  }
 0x182   : > { %882 = sbr.rel (%p4880_p2) target bundleno = 3070 (0xbfe), region = 104 }
 0x186   : > { %p4882_p13 = scmp.eq.s32.totalorder (!%p4880_p2), %s4881_s21, 0 }
 0x189   : > { %3707 = dma.done.wait (%p4882_p13), [#allocation3], 256   ;;  %p4883_p9 = pmov %p4882_p13 }
 0x18b   : > { %3709 = vsyncadd (%p4883_p9), [#allocation3], 4294967040  ;;  %p4884_p1 = pmov %p4883_p9 }
 0x18d   : > { %3711 = dma.done.wait (%p4884_p1), [#allocation6], 384   ;;  %p4885_p6 = pmov %p4884_p1 }
 0x18e   : > { %p4886_p4 = pmov %p4884_p1 }
 0x18f   : > { %3713 = vsyncadd (%p4885_p6), [#allocation6], 4294966912 }
 0x190   : > { %3715 = dma.done.wait (%p4886_p4), [#allocation9], 16   ;;  %p4887_p5 = pmov %p4884_p1 }
 0x191   : > { %s4888_s27 = sld [smem:[#allocation27_spill]]  ;;  %s4889_s2 = sld [smem:[#allocation35_spill]] }
 0x192   : > { %3717 = vsyncadd (%p4887_p5), [#allocation9], 4294967280  ;;  %s900_s0 = sand.u32 1, %s4881_s21  }
 0x193   : > { %s901_s4 = scalar_lea.sflag [#allocation3], %s900_s0 }
 0x197   : > { %s4396_s8 = sand.u32 1, %s4888_s27   ;;  %p4890_p7 = scmp.ne.s32.totalorder %s4889_s2, 0 }
 0x199   : > { %3719 = dma.done.wait (%p4890_p7), %s901_s4, 848  }
 0x19a   : > { %3721 = vsyncadd (%p4890_p7), %s901_s4, 4294966448  ;;  %s4891_s26 = sld [smem:[#allocation25_spill]]  ;;  %s4892_s28 = sld [smem:[#allocation30_spill]] }
 0x19b   : > { %s4893_s25 = sld [smem:[#allocation29_spill]]  ;;  %s4404_s1 = sshll.u32 %s4396_s8, 4 }
 0x19c   : > { %s4894_s29 = sld [smem:[#allocation42_spill]]  ;;  %s4895_s21 = sld [smem:[#allocation47_spill]] }
 0x19d   : > { %s4896_s4 = sld [smem:[#allocation49_spill]]  ;;  %s4899_s12 = sld [smem:[#allocation58_spill]] }
 0x19e   : > { %s4898_s22 = sld [smem:[#allocation57_spill]]  ;;  %s4900_s13 = sld [smem:[#allocation60_spill]] }
 0x19f   : > { %s911_s9 = scalar_lea.vmem [#allocation11], %s4396_s8  ;;  %s920_s10 = scalar_lea.vmem [#allocation12], %s4404_s1 }
 0x1a0   : > { %s4802_s5 = sand.u32 1, %s4891_s26   ;;  %s2775_s30 = sshll.u32 %s4892_s28, 1 }
 0x1a1   : > { %s2774_s23 = sshll.u32 %s4802_s5, 4  ;;  %p1087_p8 = scmp.lt.s32.totalorder %s2775_s30, 3 }
 0x1a2   : > { %p1092_p11 = scmp.lt.s32.totalorder %s4893_s25, 1  ;;  %s4902_s28 = sld [smem:[#allocation62_spill]] }
 0x1a3   : > { %s4937_s30 = smov (!%p1087_p8, %s2775_s30), 3  ;;  %s4457_s18 = scalar_lea.vmem [#allocation14], %s4404_s1 }
 0x1a4   : > { %s4412_s7 = scalar_select %p1092_p11, %s4893_s25, 1 }
 0x1a5   : > { %s2776_s3 = sshll.u32 %s4937_s30, 3  ;;  %s953_s11 = scalar_lea.vmem [#allocation16], %s4396_s8 }
 0x1a6   : > { %s1090_s6 = scalar_lea.vmem %s4894_s29, %s2776_s3  ;;  %s2832_s19 = sshll.u32 %s4412_s7, 4 }
 0x1a7   : > { %s4421_s27 = scalar_lea.vmem %s4895_s21, %s2832_s19  ;;  %s4426_s26 = scalar_lea.vmem %s4896_s4, %s2832_s19 }
 0x1a8   : > { %s4435_s3 = scalar_lea.vmem %s4898_s22, %s2832_s19  ;;  %s1112_s20 = scalar_lea.vmem %s4899_s12, %s4412_s7 }
 0x1a9   : > { %s1115_s14 = scalar_lea.vmem %s4900_s13, %s4412_s7  ;;  %s4901_s4 = sld [smem:[#allocation61_spill]] }
 0x1aa   : > { %s1121_s30 = scalar_lea.vmem %s4902_s28, %s4412_s7  ;;  %s928_s19 = scalar_lea.vmem [#allocation13], %s4396_s8 }
 0x1ab   : > { %s945_s22 = scalar_lea.vmem [#allocation15], %s4396_s8  ;;  %s962_s12 = scalar_lea.vmem [#allocation17], %s4404_s1 }
 0x1ac   : > { %s4462_s29 = scalar_lea.vmem [#allocation18], %s2774_s23  ;;  %p2783_p10 = scmp.ne.s32.totalorder %s4893_s25, 0 }
 0x1ad   : > { %v3186_v0 = vld [vmem:[#allocation7] sm:$0xff] (!%p2783_p10)   ;;  %v3786_v1 = vmov (!%p2783_p10), 0.0   ;;  %v1129_v3 = vld [vmem:[%s1090_s6 + $0x8] sm:$0xff] (!%p2783_p10)  ;;  %vm3787_vm0 = vmmov (!%p2783_p10), 0   ;;  %vm1146_vm1 = vcmask (!%p2783_p10), 130048   ;;  %vm1195_vm2 = vcmask (!%p2783_p10), 261120  }
 0x1ae   : > { %1127 = sbr.rel (%p2783_p10) target bundleno = 653 (0x28d), region = 156  ;;  %2877 = vmatprep.subr.bf16.mxu0 (!%p2783_p10), %v3786_v1  ;;  %v1128_v2 = vld [vmem:[%s1090_s6] sm:$0xff] (!%p2783_p10)  ;;  %2879 = vmatprep.mubr.msk.bf16.mxu0 (!%p2783_p10), %vm3787_vm0, %v3786_v1  ;;  %v2784_v5 = vld [vmem:[#allocation8] ss:$0 sm:$0xff] (!%p2783_p10) }
 0x1af   : > { %s1118_s15 = scalar_lea.vmem %s4901_s4, %s4412_s7  ;;  %2878 = vmatpush3.bf16.msra.mxu0 (!%p2783_p10), %v3186_v0  ;;  %v1130_v4 = vpack.c.bf16 (!%p2783_p10), %v1129_v3, %v1128_v2  ;;  %v1191_v7 = vld [vmem:[#allocation2] sm:$0xff] (!%p2783_p10)  ;;  %v1192_v11 = vld [vmem:[#allocation2 + $0x8] sm:$0xff] (!%p2783_p10) }
 0x1b2   : > { %2880 = vmatmul.mubr.msk.bf16.vlgmr.msra.gmra.mrb[0].mxu0 (!%p2783_p10), %vm1146_vm1, %v1130_v4 }
 0x285   : > { %v1184_v6 = vpop.f32.mrb[0].mxu0 }
 0x286   : > { %v1185_v8 = vadd.f32 %v2784_v5, %v1184_v6  ;;  %v2881_v9 = vpop.f32.mrb[1].mxu0 }
 0x287   : > { %v1187_v10 = vpop.f32.mrb[2].mxu0 }
 0x288   : > { %v1193_v12 = vadd.f32 %v1191_v7, %v1185_v8  ;;  %v1188_v13 = vadd.f32 %v2784_v5, %v1187_v10  ;;  %v2882_v14 = vpop.f32.mrb[3].mxu0 }
 0x28a   : > { %1196 = vst.msk [vmem:[%s4462_s29] sm:$0xff] %vm1195_vm2, %v1193_v12  ;;  %v1194_v15 = vadd.f32 %v1192_v11, %v1188_v13 }
 0x28c   : > { %1197 = vst.msk [vmem:[%s4462_s29 + $0x8] sm:$0xff] %vm1195_vm2, %v1194_v15 }
 0x28d PF: > { %v3232_v16 = vld [vmem:[%s4421_s27] sm:$0xff]   ;;  %v3788_v17 = vmov 0.0   ;;  %v3234_v19 = vld [vmem:[%s4421_s27 + $0x8] sm:$0xff]   ;;  %vm3789_vm3 = vmmov 0   ;;  %vm1224_vm4 = vcmask 261120   ;;  %s4903_s13 = scalar_lea.vmem [#allocation10], %s4396_s8 }
 0x28e   : > { %2883 = vmatprep.subr.bf16.mxu0 %v3788_v17  ;;  %2891 = vmatprep.subr.bf16.mxu1 %v3788_v17  ;;  %v3233_v18 = vld [vmem:[%s4426_s26] sm:$0xff]   ;;  %v3235_v20 = vld [vmem:[%s4426_s26 + $0x8] sm:$0xff]   ;;  %vm1469_vm5 = vcmask 64512   ;;  %s3790_s17 = smov 120   ;;  %s3792_s25 = smov 112   ;;  %vm1676_vm6 = vcmask 130048  }
 0x28f   : > { %2884 = vmatpush3.bf16.msra.mxu0 %v3232_v16  ;;  %2887 = vmatprep.mubr.msk.bf16.mxu0 %vm3789_vm3, %v3788_v17  ;;  %v3236_v24 = vld [vmem:[%s920_s10] sm:$0xff]   ;;  %v3237_v25 = vld [vmem:[%s920_s10 + $0x8] sm:$0xff]   ;;  %vm1956_vm7 = vcmask 1043456   ;;  %s4904_s27 = sld [smem:[#allocation56_spill]] }
 0x290   : > { %2892 = vmatpush3.bf16.msra.mxu1 %v3233_v18  ;;  %2885 = vmatprep.subr.bf16.mxu0 %v3788_v17  ;;  %v2787_v26 = vld [vmem:[%s4903_s13] ss:$0 sm:$0xff]  ;;  %v1666_v18 = vld [vmem:[#allocation5] sm:$0xff]  ;;  %s4910_s5 = sld [smem:[#allocation25_spill]] }
 0x291   : > { %2893 = vmatprep.subr.bf16.mxu1 %v3788_v17  ;;  %2895 = vmatprep.mubr.msk.bf16.mxu1 %vm3789_vm3, %v3788_v17  ;;  %v4480_v21 = vld [vmem:[%s4462_s29] sm:$0xff]  ;;  %v2791_v29 = vld [vmem:[%s911_s9] ss:$0 sm:$0xff]  ;;  %s3791_s9 = smov 104  }
 0x292   : > { %v2795_v0 = vld [vmem:[%s928_s19] ss:$0 sm:$0xff] }
 0x293   : > { %v4483_v22 = vld [vmem:[%s4462_s29 + $0x8] sm:$0xff]  ;;  %2886 = vmatpush3.bf16.msra.mxu0 %v3234_v19 }
 0x294   : > { %v1200_v23 = vpack.c.bf16 %v4483_v22, %v4480_v21  ;;  %2894 = vmatpush3.bf16.msra.mxu1 %v3235_v20  ;;  %2899 = vmatprep.subr.bf16.mxu0 %v3788_v17 }
 0x295   : > { %2907 = vmatprep.subr.bf16.mxu1 %v3788_v17  ;;  %s4905_s26 = scalar_lea.vmem %s4904_s27, %s4412_s7 }
 0x296   : > { %2888 = vmatmul.mubr.msk.bf16.vlgmr.msra.gmra.mrb[0].mxu0 %vm1224_vm4, %v1200_v23 }
 0x297   : > { %2896 = vmatmul.mubr.msk.bf16.vlgmr.msra.gmra.mrb[0].mxu1 %vm1224_vm4, %v1200_v23  ;;  %2903 = vmatprep.mubr.msk.bf16.mxu0 %vm3789_vm3, %v3788_v17 }
 0x298   : > { %2909 = vmatprep.mubr.msk.bf16.mxu1 %vm3789_vm3, %v3788_v17  ;;  %2900 = vmatpush3.bf16.msra.mxu0 %v3236_v24  ;;  %v1667_v24 = vld [vmem:[#allocation5 + $0x8] sm:$0xff] }
 0x299   : > { %2901 = vmatprep.subr.bf16.mxu0 %v3788_v17 }
 0x29c   : > { %2902 = vmatpush3.bf16.msra.mxu0 %v3237_v25 }
 0x29d   : > { %2913 = vmatprep.subr.bf16.mxu0 %v3788_v17 }
 0x29f   : > { %2904 = vmatmul.mubr.msk.bf16.vlgmr.msra.gmra.mrb[4].mxu0 %vm1224_vm4, %v1200_v23 }
 0x2a0   : > { %2915 = vmatprep.mubr.msk.bf16.mxu0 %vm3789_vm3, %v3788_v17 }
 0x369   : > { %v1262_v27 = vpop.f32.mrb[0].mxu0 }
 0x36a   : > { %v1263_v28 = vadd.f32 %v2787_v26, %v1262_v27  ;;  %v1326_v30 = vpop.f32.mrb[0].mxu1  ;;  %v2889_v31 = vpop.f32.mrb[1].mxu0 }
 0x36b   : > { %v2897_v32 = vpop.f32.mrb[1].mxu1  ;;  %v1265_v33 = vpop.f32.mrb[2].mxu0  ;;  %v1327_v37 = vadd.f32 %v2791_v29, %v1326_v30 }
 0x36c   : > { %v1266_v34 = vadd.f32 %v2787_v26, %v1265_v33  ;;  %v1329_v35 = vpop.f32.mrb[2].mxu1  ;;  %v2890_v36 = vpop.f32.mrb[3].mxu0 }
 0x36d   : > { %v1330_v38 = vadd.f32 %v2791_v29, %v1329_v35  ;;  %v2898_v39 = vpop.f32.mrb[3].mxu1 }
 0x36e   : > { %v1417_v40 = vpack.c.bf16 %v1266_v34, %v1263_v28  ;;  %v3197_v41 = vpack.i.bf16 %v1266_v34, %v1263_v28 }
 0x36f   : > { %v3187_v42 = vpack.i.bf16 %v1330_v38, %v1327_v37  ;;  %v1441_v43 = vpack.c.bf16 %v1330_v38, %v1327_v37 }
 0x370   : > { %3198 = vrot.lane.b32.xlu1 %v3197_v41, %s3790_s17 }
 0x371   : > { %3188 = vrot.lane.b32.xlu0 %v3187_v42, %s3790_s17  ;;  %v1474_v44 = vsel %vm1469_vm5, %v1441_v43, 0 }
 0x372   : > { %2908 = vmatpush3.bf16.xpose.msra.mxu1 %v1474_v44  ;;  %v1390_v45 = vpop.f32.mrb[4].mxu0 }
 0x373   : > { %2919 = vmatprep.subr.bf16.mxu1 %v3788_v17  ;;  %v2905_v46 = vpop.f32.mrb[5].mxu0  ;;  %v4524_v4 = vadd.f32 %v2795_v0, %v1390_v45 }
 0x374   : > { %3203 = vrot.lane.b32.xlu1 %v3187_v42, %s3791_s9  ;;  %v1393_v47 = vpop.f32.mrb[6].mxu0 }
 0x375   : > { %3193 = vrot.lane.b32.xlu0 %v3187_v42, %s3792_s25  ;;  %v2906_v48 = vpop.f32.mrb[7].mxu0  ;;  %v4526_v5 = vadd.f32 %v2795_v0, %v1393_v47 }
 0x377   : > { %v1465_v11 = vpack.c.bf16 %v4526_v5, %v4524_v4 }
 0x378   : > { %3213 = vrot.lane.b32.xlu1 %v3197_v41, %s3791_s9 }
 0x379   : > { %3208 = vrot.lane.b32.xlu0 %v3197_v41, %s3792_s25  ;;  %2910 = vmatmul.mubr.msk.bf16.vlgmr.msra.gmra.mrb[4].mxu1 %vm1469_vm5, %v1417_v40 }
 0x37a   : > { %2921 = vmatprep.mubr.msk.bf16.mxu1 %vm3789_vm3, %v3788_v17 }
 0x3e2   : > { %v3199_v49 = vpop.permute.xlu1 %3198 }
 0x3e3   : > { %v3189_v50 = vpop.permute.xlu0 %3188  ;;  %v3201_v61 = vunpack.i.h.bf16 %v3199_v49  ;;  %v3200_v62 = vunpack.i.l.bf16 %v3199_v49 }
 0x3e4   : > { %v3191_v51 = vunpack.i.h.bf16 %v3189_v50  ;;  %v3190_v52 = vunpack.i.l.bf16 %v3189_v50 }
 0x3e5   : > { %v1418_v6 = vpack.c.bf16 %v3201_v61, %v3200_v62  ;;  %v4553_v61 = vpack.i.bf16 %v4526_v5, %v4524_v4 }
 0x3e6   : > { %v1442_v53 = vpack.c.bf16 %v3191_v51, %v3190_v52  ;;  %v3204_v54 = vpop.permute.xlu1 %3203 }
 0x3e7   : > { %v3194_v55 = vpop.permute.xlu0 %3193  ;;  %v3206_v56 = vunpack.i.h.bf16 %v3204_v54  ;;  %v3205_v59 = vunpack.i.l.bf16 %v3204_v54 }
 0x3e8   : > { %v3196_v57 = vunpack.i.h.bf16 %v3194_v55  ;;  %v3195_v58 = vunpack.i.l.bf16 %v3194_v55  ;;  %v1521_v60 = vsel %vm1469_vm5, %v1442_v53, 0 }
 0x3e9   : > { %2914 = vmatpush3.bf16.xpose.msra.mxu0 %v1521_v60  ;;  %v1444_v2 = vpack.c.bf16 %v3206_v56, %v3205_v59 }
 0x3ea   : > { %v1443_v63 = vpack.c.bf16 %v3196_v57, %v3195_v58  ;;  %2925 = vmatprep.subr.bf16.mxu0 %v3788_v17  ;;  %v3214_v9 = vpop.permute.xlu1 %3213 }
 0x3eb   : > { %v3209_v1 = vpop.permute.xlu0 %3208  ;;  %v1615_v10 = vsel %vm1469_vm5, %v1444_v2, 0  ;;  %v3216_v13 = vunpack.i.h.bf16 %v3214_v9  ;;  %v3215_v14 = vunpack.i.l.bf16 %v3214_v9 }
 0x3ec   : > { %v1568_v3 = vsel %vm1469_vm5, %v1443_v63, 0  ;;  %v3211_v7 = vunpack.i.h.bf16 %v3209_v1  ;;  %v3210_v8 = vunpack.i.l.bf16 %v3209_v1 }
 0x3ed   : > { %2920 = vmatpush3.bf16.xpose.msra.mxu1 %v1568_v3  ;;  %v1420_v15 = vpack.c.bf16 %v3216_v13, %v3215_v14 }
 0x3ee   : > { %2931 = vmatprep.subr.bf16.mxu1 %v3788_v17  ;;  %v1419_v12 = vpack.c.bf16 %v3211_v7, %v3210_v8 }
 0x3f0   : > { %2916 = vmatmul.mubr.msk.bf16.vlgmr.msra.gmra.mrb[8].mxu0 %vm1469_vm5, %v1418_v6 }
 0x3f1   : > { %2926 = vmatpush3.bf16.xpose.msra.mxu0 %v1615_v10  ;;  %2927 = vmatprep.mubr.msk.bf16.mxu0 %vm3789_vm3, %v3788_v17 }
 0x3f2   : > { %2937 = vmatprep.subr.bf16.mxu0 %v3788_v17 }
 0x3f4   : > { %2922 = vmatmul.mubr.msk.bf16.vlgmr.msra.gmra.mrb[8].mxu1 %vm1469_vm5, %v1419_v12 }
 0x3f5   : > { %2932 = vmatpush3.bf16.msra.mxu1 %v1465_v11  ;;  %2933 = vmatprep.mubr.msk.bf16.mxu1 %vm3789_vm3, %v3788_v17 }
 0x3f6   : > { %2943 = vmatprep.subr.bf16.mxu1 %v3788_v17 }
 0x3f8   : > { %2928 = vmatmul.mubr.msk.bf16.vlgmr.msra.gmra.mrb[12].mxu0 %vm1469_vm5, %v1420_v15 }
 0x3f9   : > { %2939 = vmatprep.mubr.msk.bf16.mxu0 %vm3789_vm3, %v3788_v17 }
 0x44c   : > { %v1510_v16 = vpop.f32.mrb[4].mxu1 }
 0x44d   : > { %v1658_v19 = vmul.f32 0.35355338, %v1510_v16  ;;  %v2911_v20 = vpop.f32.mrb[5].mxu1 }
 0x44e   : > { %v1513_v23 = vpop.f32.mrb[6].mxu1 }
 0x44f   : > { %v1659_v25 = vmul.f32 0.35355338, %v1513_v23  ;;  %v2912_v26 = vpop.f32.mrb[7].mxu1  ;;  %v1668_v27 = vadd.f32 %v1666_v18, %v1658_v19 }
 0x451   : > { %v1677_v28 = vsel %vm1676_vm6, %v1668_v27, -inf  ;;  %v1669_v29 = vadd.f32 %v1667_v24, %v1659_v25 }
 0x452   : > { %1678 = vmax.xlane.f32.xlu0 %v1677_v28 }
 0x453   : > { %v1680_v30 = vsel %vm1676_vm6, %v1669_v29, -inf }
 0x454   : > { %1681 = vmax.xlane.f32.xlu1 %v1680_v30 }
 0x4c3   : > { %v1557_v31 = vpop.f32.mrb[8].mxu0 }
 0x4c4   : > { %v1660_v32 = vmul.f32 0.35355338, %v1557_v31  ;;  %v2917_v33 = vpop.f32.mrb[9].mxu0 }
 0x4c5   : > { %v1560_v34 = vpop.f32.mrb[10].mxu0 }
 0x4c6   : > { %v1661_v35 = vmul.f32 0.35355338, %v1560_v34  ;;  %v2918_v36 = vpop.f32.mrb[11].mxu0  ;;  %v1670_v37 = vadd.f32 %v1666_v18, %v1660_v32 }
 0x4c7   : > { %v1604_v38 = vpop.f32.mrb[8].mxu1 }
 0x4c8   : > { %v1662_v39 = vmul.f32 0.35355338, %v1604_v38  ;;  %v2923_v40 = vpop.f32.mrb[9].mxu1  ;;  %v1683_v41 = vsel %vm1676_vm6, %v1670_v37, -inf  ;;  %v1671_v42 = vadd.f32 %v1667_v24, %v1661_v35 }
 0x4c9   : > { %v1607_v43 = vpop.f32.mrb[10].mxu1  ;;  %1684 = vmax.xlane.f32.xlu0 %v1683_v41 }
 0x4ca   : > { %v1663_v44 = vmul.f32 0.35355338, %v1607_v43  ;;  %v2924_v45 = vpop.f32.mrb[11].mxu1  ;;  %v1672_v46 = vadd.f32 %v1666_v18, %v1662_v39  ;;  %v1686_v51 = vsel %vm1676_vm6, %v1671_v42, -inf }
 0x4cb   : > { %v1651_v47 = vpop.f32.mrb[12].mxu0 }
 0x4cc   : > { %v1664_v48 = vmul.f32 0.35355338, %v1651_v47  ;;  %v2929_v49 = vpop.f32.mrb[13].mxu0  ;;  %v1689_v50 = vsel %vm1676_vm6, %v1672_v46, -inf  ;;  %v1673_v52 = vadd.f32 %v1667_v24, %v1663_v44 }
 0x4cd   : > { %1690 = vmax.xlane.f32.xlu1 %v1689_v50  ;;  %1687 = vmax.xlane.f32.xlu0 %v1686_v51  ;;  %v1654_v53 = vpop.f32.mrb[14].mxu0 }
 0x4ce   : > { %v1665_v54 = vmul.f32 0.35355338, %v1654_v53  ;;  %v2930_v55 = vpop.f32.mrb[15].mxu0  ;;  %v1674_v56 = vadd.f32 %v1666_v18, %v1664_v48  ;;  %v1692_v57 = vsel %vm1676_vm6, %v1673_v52, -inf }
 0x4d0   : > { %v1695_v58 = vsel %vm1676_vm6, %v1674_v56, -inf  ;;  %v1675_v59 = vadd.f32 %v1667_v24, %v1665_v54 }
 0x4d1   : > { %1693 = vmax.xlane.f32.xlu0 %v1692_v57  ;;  %1696 = vmax.xlane.f32.xlu1 %v1695_v58 }
 0x4d2   : > { %v1698_v60 = vsel %vm1676_vm6, %v1675_v59, -inf }
 0x4d5   : > { %1699 = vmax.xlane.f32.xlu0 %v1698_v60 }
 0x4df   : > { %v1679_v1 = vpop.xlane.xlu0 %1678 }
 0x4e0   : > { %v1701_v3 = vsub.f32 %v1668_v27, %v1679_v1 }
 0x4e1   : > { %v1682_v62 = vpop.xlane.xlu1 %1681 }
 0x4e2   : > { %v1702_v63 = vsub.f32 %v1669_v29, %v1682_v62  ;;  %3218 = vrot.lane.b32.xlu1 %v4553_v61, %s3790_s17  ;;  %v1709_v7 = vmul.f32 1.442695, %v1701_v3  ;;  %s4913_s17 = sld [smem:[#allocation63_spill]] }
 0x4e4   : > { %v1711_v0 = vmul.f32 1.442695, %v1702_v63 }
 0x4e6   : > { %3242 = vpow2.f32 %v1711_v0 }
 0x4e7   : > { %3244 = vpow2.f32 %v1709_v7 }
 0x4f0   : > { %v4557_v2 = vpop.eup %3242 }
 0x4f1   : > { %v1728_v6 = vsel %vm1676_vm6, %v4557_v2, 0.0  ;;  %v3245_v8 = vpop.eup %3244 }
 0x4f2   : > { %1729 = vadd.xlane.f32.xlu0 %v1728_v6  ;;  %v1725_v4 = vsel %vm1676_vm6, %v3245_v8, 0.0 }
 0x506   : > { %1726 = vadd.xlane.f32.xlu1 %v1725_v4 }
 0x556   : > { %v1685_v5 = vpop.xlane.xlu0 %1684 }
 0x557   : > { %v1703_v9 = vsub.f32 %v1670_v37, %v1685_v5 }
 0x559   : > { %v1713_v10 = vmul.f32 1.442695, %v1703_v9  ;;  %v1949_v9 = vld [vmem:[%s4457_s18] sm:$0xf] }
 0x55a   : > { %v1691_v11 = vpop.xlane.xlu1 %1690  ;;  %v1688_v12 = vpop.xlane.xlu0 %1687 }
 0x55b   : > { %3246 = vpow2.f32 %v1713_v10  ;;  %v1705_v13 = vsub.f32 %v1672_v46, %v1691_v11  ;;  %v1704_v14 = vsub.f32 %v1671_v42, %v1688_v12 }
 0x55d   : > { %v1717_v15 = vmul.f32 1.442695, %v1705_v13  ;;  %v1715_v16 = vmul.f32 1.442695, %v1704_v14 }
 0x55e   : > { %v1694_v18 = vpop.xlane.xlu0 %1693  ;;  %v1697_v19 = vpop.xlane.xlu1 %1696 }
 0x55f   : > { %3248 = vpow2.f32 %v1717_v15  ;;  %v1706_v20 = vsub.f32 %v1673_v52, %v1694_v18  ;;  %v1707_v23 = vsub.f32 %v1674_v56, %v1697_v19  ;;  %v1958_v15 = vsel %vm1956_vm7, %v1949_v9, 0 }
 0x560   : > { %3250 = vpow2.f32 %v1715_v16 }
 0x561   : > { %v1719_v24 = vmul.f32 1.442695, %v1706_v20  ;;  %v1721_v25 = vmul.f32 1.442695, %v1707_v23  ;;  %v1950_v20 = vld [vmem:[%s4457_s18 + $0x4] sm:$0xf] }
 0x562   : > { %v3219_v26 = vpop.permute.xlu1 %3218  ;;  %v1700_v27 = vpop.xlane.xlu0 %1699  ;;  %v2005_v23 = vsel %vm1956_vm7, %v1950_v20, 0 }
 0x563   : > { %3252 = vpow2.f32 %v1719_v24  ;;  %v3221_v28 = vunpack.i.h.bf16 %v3219_v26  ;;  %v3220_v29 = vunpack.i.l.bf16 %v3219_v26  ;;  %v1708_v30 = vsub.f32 %v1675_v59, %v1700_v27 }
 0x564   : > { %3254 = vpow2.f32 %v1721_v25  ;;  %v1951_v25 = vld [vmem:[%s4457_s18 + $0x8] sm:$0xf] }
 0x565   : > { %v3247_v31 = vpop.eup %3246  ;;  %v1466_v32 = vpack.c.bf16 %v3221_v28, %v3220_v29  ;;  %v1723_v33 = vmul.f32 1.442695, %v1708_v30  ;;  %v2052_v30 = vsel %vm1956_vm7, %v1951_v25, 0  ;;  %v3239_v25 = vld [vmem:[%s4435_s3 + $0x8] sm:$0xff]  }
 0x566   : > { %v1731_v34 = vsel %vm1676_vm6, %v3247_v31, 0.0 }
 0x567   : > { %3256 = vpow2.f32 %v1723_v33  ;;  %1732 = vadd.xlane.f32.xlu1 %v1731_v34  ;;  %2938 = vmatpush3.bf16.msra.mxu0 %v1466_v32  ;;  %v1952_v32 = vld [vmem:[%s4457_s18 + $0xc] sm:$0xf]  ;;  %s4912_s18 = sld [smem:[#allocation36_spill]] }
 0x568   : > { %2949 = vmatprep.subr.bf16.mxu0 %v3788_v17 }
 0x569   : > { %v3249_v35 = vpop.eup %3248 }
 0x56a   : > { %v3251_v36 = vpop.eup %3250  ;;  %v1737_v37 = vsel %vm1676_vm6, %v3249_v35, 0.0 }
 0x56b   : > { %1738 = vadd.xlane.f32.xlu1 %v1737_v37  ;;  %v1734_v38 = vsel %vm1676_vm6, %v3251_v36, 0.0  ;;  %v2099_v37 = vsel %vm1956_vm7, %v1952_v32, 0 }
 0x56c   : > { %1735 = vadd.xlane.f32.xlu0 %v1734_v38 }
 0x56d   : > { %v3253_v39 = vpop.eup %3252  ;;  %p4915_p0 = scmp.ne.s32.totalorder %s4912_s18, 0 }
 0x56e   : > { %v3255_v40 = vpop.eup %3254  ;;  %v1740_v41 = vsel %vm1676_vm6, %v3253_v39, 0.0 }
 0x56f   : > { %v1743_v42 = vsel %vm1676_vm6, %v3255_v40, 0.0 }
 0x570   : > { %1744 = vadd.xlane.f32.xlu1 %v1743_v42  ;;  %1741 = vadd.xlane.f32.xlu0 %v1740_v41 }
 0x571   : > { %v3257_v43 = vpop.eup %3256 }
 0x572   : > { %v1746_v44 = vsel %vm1676_vm6, %v3257_v43, 0.0 }
 0x574   : > { %1747 = vadd.xlane.f32.xlu0 %v1746_v44 }
 0x57f   : > { %v1730_v45 = vpop.xlane.xlu0 %1729 }
 0x580   : > { %3258 = vrcp.f32 %v1730_v45 }
 0x581   : > { %3228 = vrot.lane.b32.xlu1 %v4553_v61, %s3791_s9 }
 0x58a   : > { %3223 = vrot.lane.b32.xlu0 %v4553_v61, %s3792_s25  ;;  %v3259_v47 = vpop.eup %3258  ;;  %s3793_s25 = smov [#allocation18]  }
 0x58b   : > { %v1758_v49 = vmul.f32 %v3259_v47, %v4557_v2  ;;  %s3638_s23 = sshll.u32 %s3793_s25, 4  ;;  %s3639_s23 = int_to_ptr.vmem [resolvable:$false] %s3638_s23 }
 0x58c   : > { %s3640_s6 = scalar_lea.vmem %s3639_s23, 512 }
 0x593   : > { %v1727_v46 = vpop.xlane.xlu1 %1726 }
 0x594   : > { %3260 = vrcp.f32 %v1727_v46 }
 0x59e   : > { %v3261_v48 = vpop.eup %3260 }
 0x59f   : > { %v1757_v50 = vmul.f32 %v3261_v48, %v3245_v8 }
 0x5a1   : > { %v1765_v51 = vpack.c.bf16 %v1758_v49, %v1757_v50 }
 0x5a3   : > { %2934 = vmatmul.mubr.msk.bf16.vlgmr.msra.gmra.mrb[12].mxu1 %vm1676_vm6, %v1765_v51 }
 0x5a4   : > { %2945 = vmatprep.mubr.msk.bf16.mxu1 %vm3789_vm3, %v3788_v17 }
 0x5f4   : > { %v1733_v52 = vpop.xlane.xlu1 %1732 }
 0x5f5   : > { %3262 = vrcp.f32 %v1733_v52 }
 0x5f8   : > { %v1739_v53 = vpop.xlane.xlu1 %1738 }
 0x5f9   : > { %v1736_v54 = vpop.xlane.xlu0 %1735 }
 0x5fa   : > { %3264 = vrcp.f32 %v1736_v54 }
 0x5fb   : > { %3266 = vrcp.f32 %v1739_v53 }
 0x5fd   : > { %v1745_v55 = vpop.xlane.xlu1 %1744  ;;  %v1742_v56 = vpop.xlane.xlu0 %1741 }
 0x5fe   : > { %3268 = vrcp.f32 %v1742_v56 }
 0x5ff   : > { %3270 = vrcp.f32 %v1745_v55  ;;  %v3263_v59 = vpop.eup %3262 }
 0x600   : > { %v1759_v63 = vmul.f32 %v3263_v59, %v3247_v31 }
 0x601   : > { %v3229_v57 = vpop.permute.xlu1 %3228  ;;  %v1748_v58 = vpop.xlane.xlu0 %1747 }
 0x602   : > { %3272 = vrcp.f32 %v1748_v58  ;;  %v3231_v61 = vunpack.i.h.bf16 %v3229_v57  ;;  %v3230_v62 = vunpack.i.l.bf16 %v3229_v57 }
 0x604   : > { %v3265_v60 = vpop.eup %3264  ;;  %v1468_v8 = vpack.c.bf16 %v3231_v61, %v3230_v62 }
 0x605   : > { %v1760_v0 = vmul.f32 %v3265_v60, %v3251_v36  ;;  %v3224_v1 = vpop.permute.xlu0 %3223  ;;  %v3267_v6 = vpop.eup %3266 }
 0x606   : > { %v3226_v2 = vunpack.i.h.bf16 %v3224_v1  ;;  %v3225_v3 = vunpack.i.l.bf16 %v3224_v1  ;;  %v1761_v11 = vmul.f32 %v3267_v6, %v3249_v35  ;;  %v2811_v1 = vld [vmem:[%s945_s22] ss:$0 sm:$0xff] }
 0x607   : > { %v1766_v7 = vpack.c.bf16 %v1760_v0, %v1759_v63 }
 0x608   : > { %v1467_v4 = vpack.c.bf16 %v3226_v2, %v3225_v3  ;;  %v3269_v5 = vpop.eup %3268 }
 0x609   : > { %2940 = vmatmul.mubr.msk.bf16.vlgmr.msra.gmra.mrb[16].mxu0 %vm1676_vm6, %v1766_v7  ;;  %v3271_v10 = vpop.eup %3270  ;;  %v1762_v12 = vmul.f32 %v3269_v5, %v3253_v39 }
 0x60a   : > { %2950 = vmatpush3.bf16.msra.mxu0 %v1468_v8  ;;  %2944 = vmatpush3.bf16.msra.mxu1 %v1467_v4  ;;  %v1763_v16 = vmul.f32 %v3271_v10, %v3255_v40 }
 0x60b   : > { %2951 = vmatprep.mubr.msk.bf16.mxu0 %vm3789_vm3, %v3788_v17  ;;  %2955 = vmatprep.subr.bf16.mxu1 %v3788_v17  ;;  %v1767_v14 = vpack.c.bf16 %v1762_v12, %v1761_v11 }
 0x60c   : > { %v3273_v13 = vpop.eup %3272  ;;  %2961 = vmatprep.subr.bf16.mxu0 %v3788_v17 }
 0x60d   : > { %v1764_v18 = vmul.f32 %v3273_v13, %v3257_v43  ;;  %2946 = vmatmul.mubr.msk.bf16.vlgmr.msra.gmra.mrb[16].mxu1 %vm1676_vm6, %v1767_v14 }
 0x60e   : > { %2956 = vmatpush3.bf16.msra.mxu1 %v1958_v15  ;;  %2957 = vmatprep.mubr.msk.bf16.mxu1 %vm3789_vm3, %v3788_v17 }
 0x60f   : > { %v1768_v19 = vpack.c.bf16 %v1764_v18, %v1763_v16  ;;  %2967 = vmatprep.subr.bf16.mxu1 %v3788_v17 }
 0x611   : > { %2952 = vmatmul.mubr.msk.bf16.vlgmr.msra.gmra.mrb[20].mxu0 %vm1676_vm6, %v1768_v19 }
 0x612   : > { %2963 = vmatprep.mubr.msk.bf16.mxu0 %vm3789_vm3, %v3788_v17  ;;  %2962 = vmatpush3.bf16.msra.mxu0 %v2005_v23 }
 0x613   : > { %2973 = vmatprep.subr.bf16.mxu0 %v3788_v17 }
 0x676   : > { %v1806_v24 = vpop.f32.mrb[12].mxu1 }
 0x677   : > { %v2935_v26 = vpop.f32.mrb[13].mxu1 }
 0x678   : > { %v1809_v27 = vpop.f32.mrb[14].mxu1 }
 0x679   : > { %v1945_v28 = vpack.c.bf16 %v1809_v27, %v1806_v24  ;;  %v2936_v29 = vpop.f32.mrb[15].mxu1 }
 0x67b   : > { %2958 = vmatmul.mubr.msk.bf16.vlgmr.msra.gmra.mrb[20].mxu1 %vm1469_vm5, %v1945_v28 }
 0x67c   : > { %2968 = vmatpush3.bf16.msra.mxu1 %v2052_v30  ;;  %2969 = vmatprep.mubr.msk.bf16.mxu1 %vm3789_vm3, %v3788_v17 }
 0x67d   : > { %2979 = vmatprep.subr.bf16.mxu1 %v3788_v17 }
 0x6dc   : > { %v1850_v31 = vpop.f32.mrb[16].mxu0 }
 0x6dd   : > { %v2941_v33 = vpop.f32.mrb[17].mxu0 }
 0x6de   : > { %v1853_v34 = vpop.f32.mrb[18].mxu0  ;;  %v2812_v33 = vld [vmem:[%s953_s11] ss:$0 sm:$0xff]  ;;  %s2404_s11 = sshll.u32 %s4462_s29, 4  ;;  %s4668_s11 = int_to_ptr.vmem [resolvable:$true] %s2404_s11 }
 0x6df   : > { %v1946_v35 = vpack.c.bf16 %v1853_v34, %v1850_v31  ;;  %v2942_v36 = vpop.f32.mrb[19].mxu0  ;;  %p3641_p13 = scmp.lt.s32.totalorder %s4668_s11, %s3639_s23 }
 0x6e0   : > { %v1894_v38 = vpop.f32.mrb[16].mxu1 }
 0x6e1   : > { %2964 = vmatmul.mubr.msk.bf16.vlgmr.msra.gmra.mrb[24].mxu0 %vm1469_vm5, %v1946_v35  ;;  %v2947_v39 = vpop.f32.mrb[17].mxu1 }
 0x6e2   : > { %2974 = vmatpush3.bf16.msra.mxu0 %v2099_v37  ;;  %2975 = vmatprep.mubr.msk.bf16.mxu0 %vm3789_vm3, %v3788_v17  ;;  %v1897_v40 = vpop.f32.mrb[18].mxu1 }
 0x6e3   : > { %2987 = vmatprep.subr.bf16.mxu0 %v3788_v17  ;;  %v1947_v41 = vpack.c.bf16 %v1897_v40, %v1894_v38  ;;  %v2948_v42 = vpop.f32.mrb[19].mxu1  ;;  %v2813_v38 = vld [vmem:[%s4905_s26] ss:$0 sm:$0xff] }
 0x6e4   : > { %v1938_v43 = vpop.f32.mrb[20].mxu0 }
 0x6e5   : > { %v2953_v44 = vpop.f32.mrb[21].mxu0  ;;  %2970 = vmatmul.mubr.msk.bf16.vlgmr.msra.gmra.mrb[24].mxu1 %vm1469_vm5, %v1947_v41 }
 0x6e6   : > { %v1941_v45 = vpop.f32.mrb[22].mxu0  ;;  %2983 = vmatprep.mubr.msk.bf16.mxu1 %vm3789_vm3, %v3788_v17  ;;  %v3241_v44 = vld [vmem:[%s962_s12 + $0x8] sm:$0xff]  }
 0x6e7   : > { %v1948_v46 = vpack.c.bf16 %v1941_v45, %v1938_v43  ;;  %v2954_v47 = vpop.f32.mrb[23].mxu0  ;;  %v3240_v43 = vld [vmem:[%s962_s12] sm:$0xff]   ;;  %v2814_v45 = vld [vmem:[%s1112_s20] ss:$0 sm:$0xff] }
 0x6e9   : > { %2976 = vmatmul.mubr.msk.bf16.vlgmr.msra.gmra.mrb[28].mxu0 %vm1469_vm5, %v1948_v46 }
 0x6ea   : > { %2991 = vmatprep.mubr.msk.bf16.mxu0 %vm3789_vm3, %v3788_v17  ;;  %2988 = vmatpush3.bf16.msra.mxu0 %v3240_v43 }
 0x6eb   : > { %2989 = vmatprep.subr.bf16.mxu0 %v3788_v17 }
 0x6ee   : > { %2990 = vmatpush3.bf16.msra.mxu0 %v3241_v44 }
 0x74e   : > { %v1994_v48 = vpop.f32.mrb[20].mxu1 }
 0x74f   : > { %v2959_v49 = vpop.f32.mrb[21].mxu1 }
 0x750   : > { %v1997_v50 = vpop.f32.mrb[22].mxu1 }
 0x751   : > { %v2960_v51 = vpop.f32.mrb[23].mxu1 }
 0x7b4   : > { %v2041_v52 = vpop.f32.mrb[24].mxu0 }
 0x7b5   : > { %v2142_v53 = vadd.f32 %v2041_v52, %v1994_v48  ;;  %v2965_v54 = vpop.f32.mrb[25].mxu0 }
 0x7b6   : > { %v2044_v55 = vpop.f32.mrb[26].mxu0 }
 0x7b7   : > { %v2143_v56 = vadd.f32 %v2044_v55, %v1997_v50  ;;  %v2966_v57 = vpop.f32.mrb[27].mxu0 }
 0x7b8   : > { %v2088_v58 = vpop.f32.mrb[24].mxu1 }
 0x7b9   : > { %v2144_v59 = vadd.f32 %v2142_v53, %v2088_v58  ;;  %v2971_v60 = vpop.f32.mrb[25].mxu1 }
 0x7ba   : > { %v2091_v61 = vpop.f32.mrb[26].mxu1 }
 0x7bb   : > { %v2145_v62 = vadd.f32 %v2143_v56, %v2091_v61  ;;  %v2972_v63 = vpop.f32.mrb[27].mxu1 }
 0x7bc   : > { %v2135_v0 = vpop.f32.mrb[28].mxu0 }
 0x7bd   : > { %v2146_v2 = vadd.f32 %v2144_v59, %v2135_v0  ;;  %v2977_v3 = vpop.f32.mrb[29].mxu0 }
 0x7be   : > { %v2138_v6 = vpop.f32.mrb[30].mxu0 }
 0x7bf   : > { %v2155_v7 = vadd.f32 %v2811_v1, %v2146_v2  ;;  %v2147_v8 = vadd.f32 %v2145_v62, %v2138_v6  ;;  %v2978_v4 = vpop.f32.mrb[31].mxu0 }
 0x7c1   : > { %v2156_v5 = vadd.f32 %v2811_v1, %v2147_v8  ;;  %v2157_v9 = vadd.f32 %v2155_v7, %v4480_v21 }
 0x7c3   : > { %v2161_v10 = vsel %vm1224_vm4, %v2157_v9, 0.0  ;;  %v2158_v11 = vadd.f32 %v2156_v5, %v4483_v22  ;;  %v3238_v22 = vld [vmem:[%s4435_s3] sm:$0xff]  }
 0x7c4   : > { %2162 = vadd.xlane.f32.xlu1 %v2161_v10  ;;  %2980 = vmatpush3.bf16.msra.mxu1 %v3238_v22 }
 0x7c5   : > { %v2164_v12 = vsel %vm1224_vm4, %v2158_v11, 0.0  ;;  %2981 = vmatprep.subr.bf16.mxu1 %v3788_v17  ;;  %v2818_v17 = vld [vmem:[%s1115_s14] ss:$0 sm:$0xff]  ;;  %s4908_s14 = sld [smem:[#allocation30_spill]] }
 0x7c6   : > { %2165 = vadd.xlane.f32.xlu0 %v2164_v12 }
 0x7c8   : > { %2982 = vmatpush3.bf16.msra.mxu1 %v3239_v25 }
 0x7cb   : > { %s2835_s22 = sshll.u32 %s4908_s14, 8 }
 0x7cc   : > { %s4666_s9 = scalar_lea.hbm %s4913_s17, %s2835_s22 }
 0x851   : > { %v2163_v13 = vpop.xlane.xlu1 %2162 }
 0x852   : > { %v2168_v14 = vmul.f32 0.03125, %v2163_v13 }
 0x853   : > { %v2166_v15 = vpop.xlane.xlu0 %2165 }
 0x854   : > { %v2170_v16 = vsub.f32 %v2157_v9, %v2168_v14  ;;  %v2169_v18 = vmul.f32 0.03125, %v2166_v15 }
 0x856   : > { %v2171_v19 = vsub.f32 %v2158_v11, %v2169_v18  ;;  %v2172_v20 = vmul.f32 %v2170_v16, %v2170_v16 }
 0x858   : > { %v2174_v23 = vsel %vm1224_vm4, %v2172_v20, 0.0  ;;  %v2173_v21 = vmul.f32 %v2171_v19, %v2171_v19 }
 0x859   : > { %2175 = vadd.xlane.f32.xlu0 %v2174_v23 }
 0x85a   : > { %v2177_v24 = vsel %vm1224_vm4, %v2173_v21, 0.0  ;;  %v2823_v21 = vld [vmem:[%s1121_s30] ss:$0 sm:$0xff]  ;;  %s3634_s30 = scalar_lea.vmem %s4668_s11, 256 }
 0x85b   : > { %2178 = vadd.xlane.f32.xlu1 %v2177_v24  ;;  %p3635_p3 = scmp.ne.s32.totalorder %s4668_s11, %s3634_s30  ;;  %p3642_p9 = scmp.lt.s32.totalorder %s3640_s6, %s3634_s30 }
 0x85d   : > { %p3636_p12 = pnand %p3635_p3, %p4915_p0  ;;  %p3643_p1 = por %p3642_p9, %p3641_p13 }
 0x85f   : > { %p3637_p2 = pneg %p3636_p12 }
 0x861   : > { %p3644_p6 = pnand %p3643_p1, %p3637_p2 }
 0x8e6   : > { %v2176_v26 = vpop.xlane.xlu0 %2175 }
 0x8e7   : > { %v2180_v27 = vmul.f32 0.03125, %v2176_v26 }
 0x8e8   : > { %v2179_v28 = vpop.xlane.xlu1 %2178 }
 0x8e9   : > { %v2182_v29 = vadd.f32 1e-05, %v2180_v27  ;;  %v2181_v30 = vmul.f32 0.03125, %v2179_v28 }
 0x8eb   : > { %3274 = vrsqrt.f32 %v2182_v29  ;;  %v2183_v31 = vadd.f32 1e-05, %v2181_v30 }
 0x8ed   : > { %3276 = vrsqrt.f32 %v2183_v31 }
 0x8f5   : > { %v3275_v32 = vpop.eup %3274 }
 0x8f6   : > { %v2186_v34 = vmul.f32 %v3275_v32, %v2170_v16 }
 0x8f7   : > { %v3277_v35 = vpop.eup %3276 }
 0x8f8   : > { %v2194_v36 = vmul.f32 %v2812_v33, %v2186_v34  ;;  %v2187_v37 = vmul.f32 %v3277_v35, %v2171_v19  ;;  %v2822_v19 = vld [vmem:[%s1118_s15] ss:$0 sm:$0xff]  ;;  %s4914_s15 = sand.u32 1, %s4910_s5  }
 0x8f9   : > { %s4676_s7 = scalar_lea.sflag [#allocation4], %s4914_s15 }
 0x8fa   : > { %v2195_v39 = vmul.f32 %v2812_v33, %v2187_v37  ;;  %v2202_v40 = vadd.f32 %v2813_v38, %v2194_v36 }
 0x8fc   : > { %v2203_v41 = vadd.f32 %v2813_v38, %v2195_v39 }
 0x8fe   : > { %v2204_v42 = vpack.c.bf16 %v2203_v41, %v2202_v40 }
 0x900   : > { %2984 = vmatmul.mubr.msk.bf16.vlgmr.msra.gmra.mrb[28].mxu1 %vm1224_vm4, %v2204_v42 }
 0x9d3   : > { %v2265_v46 = vpop.f32.mrb[28].mxu1 }
 0x9d4   : > { %v2266_v47 = vadd.f32 %v2814_v45, %v2265_v46  ;;  %v2985_v48 = vpop.f32.mrb[29].mxu1 }
 0x9d5   : > { %v2268_v49 = vpop.f32.mrb[30].mxu1 }
 0x9d6   : > { %v2269_v50 = vadd.f32 %v2814_v45, %v2268_v49  ;;  %v2986_v51 = vpop.f32.mrb[31].mxu1  ;;  %v2272_v52 = vmax.f32 %v2266_v47, 0.0 }
 0x9d8   : > { %v2273_v53 = vmax.f32 %v2269_v50, 0.0 }
 0x9da   : > { %v2274_v54 = vpack.c.bf16 %v2273_v53, %v2272_v52 }
 0x9dc   : > { %2992 = vmatmul.mubr.msk.bf16.vlgmr.msra.gmra.mrb[32].mxu0 %vm1224_vm4, %v2274_v54 }
 0xaaf   : > { %v2335_v55 = vpop.f32.mrb[32].mxu0 }
 0xab0   : > { %v2336_v56 = vadd.f32 %v2818_v17, %v2335_v55  ;;  %v2993_v57 = vpop.f32.mrb[33].mxu0 }
 0xab1   : > { %v2338_v58 = vpop.f32.mrb[34].mxu0 }
 0xab2   : > { %v2339_v59 = vadd.f32 %v2818_v17, %v2338_v58  ;;  %v2994_v60 = vpop.f32.mrb[35].mxu0  ;;  %v2342_v61 = vadd.f32 %v2336_v56, %v2202_v40 }
 0xab4   : > { %v2346_v62 = vsel %vm1224_vm4, %v2342_v61, 0.0  ;;  %v2343_v63 = vadd.f32 %v2339_v59, %v2203_v41 }
 0xab5   : > { %2347 = vadd.xlane.f32.xlu0 %v2346_v62 }
 0xab6   : > { %v2349_v0 = vsel %vm1224_vm4, %v2343_v63, 0.0 }
 0xab7   : > { %2350 = vadd.xlane.f32.xlu1 %v2349_v0 }
 0xb42   : > { %v2348_v1 = vpop.xlane.xlu0 %2347 }
 0xb43   : > { %v2352_v2 = vmul.f32 0.03125, %v2348_v1 }
 0xb44   : > { %v2351_v3 = vpop.xlane.xlu1 %2350 }
 0xb45   : > { %v2354_v6 = vsub.f32 %v2342_v61, %v2352_v2  ;;  %v2353_v7 = vmul.f32 0.03125, %v2351_v3 }
 0xb47   : > { %v2355_v8 = vsub.f32 %v2343_v63, %v2353_v7  ;;  %v2356_v4 = vmul.f32 %v2354_v6, %v2354_v6 }
 0xb49   : > { %v2358_v5 = vsel %vm1224_vm4, %v2356_v4, 0.0  ;;  %v2357_v9 = vmul.f32 %v2355_v8, %v2355_v8 }
 0xb4a   : > { %2359 = vadd.xlane.f32.xlu0 %v2358_v5 }
 0xb4b   : > { %v2361_v10 = vsel %vm1224_vm4, %v2357_v9, 0.0 }
 0xb4c   : > { %2362 = vadd.xlane.f32.xlu1 %v2361_v10 }
 0xbd7   : > { %v2360_v11 = vpop.xlane.xlu0 %2359 }
 0xbd8   : > { %v2364_v12 = vmul.f32 0.03125, %v2360_v11 }
 0xbd9   : > { %v2363_v13 = vpop.xlane.xlu1 %2362 }
 0xbda   : > { %v2366_v14 = vadd.f32 1e-05, %v2364_v12  ;;  %v2365_v15 = vmul.f32 0.03125, %v2363_v13 }
 0xbdc   : > { %3278 = vrsqrt.f32 %v2366_v14  ;;  %v2367_v16 = vadd.f32 1e-05, %v2365_v15 }
 0xbde   : > { %3280 = vrsqrt.f32 %v2367_v16 }
 0xbe6   : > { %v3279_v18 = vpop.eup %3278 }
 0xbe7   : > { %v2370_v20 = vmul.f32 %v3279_v18, %v2354_v6 }
 0xbe8   : > { %v3281_v23 = vpop.eup %3280 }
 0xbe9   : > { %v2378_v24 = vmul.f32 %v2822_v19, %v2370_v20  ;;  %v2371_v22 = vmul.f32 %v3281_v23, %v2355_v8 }
 0xbeb   : > { %v2386_v25 = vadd.f32 %v2823_v21, %v2378_v24  ;;  %v2379_v26 = vmul.f32 %v2822_v19, %v2371_v22 }
 0xbed   : > { %2388 = vst.msk [vmem:[%s4462_s29] sm:$0xff] %vm1224_vm4, %v2386_v25  ;;  %v2387_v27 = vadd.f32 %v2823_v21, %v2379_v26 }
 0xbef   : > { %2389 = vst.msk [vmem:[%s4462_s29 + $0x8] sm:$0xff] %vm1224_vm4, %v2387_v27 }
 0xbf0   : > { %3647 = shalt.err (!%p3644_p6)
}
 0xbf1   : > { %s3648_s29 = scalar_lea.hbm %s4666_s9, 256  ;;  %s3652_s8 = scalar_lea.hbm %s4913_s17, 512 }
 0xbf2   : > { %p3649_p4 = scmp.ne.s32.totalorder %s4666_s9, %s3648_s29  ;;  %p3653_p8 = scmp.lt.u32.totalorder %s4666_s9, %s4913_s17 }
 0xbf3   : > { %p3654_p11 = scmp.lt.u32.totalorder %s3652_s8, %s3648_s29  ;;  %p3656_p3 = scmp.lt.u32.totalorder %s3648_s29, %s4666_s9 }
 0xbf4   : > { %p3650_p5 = pnand %p3649_p4, %p4915_p0 }
 0xbf5   : > { %p3655_p10 = por %p3654_p11, %p3653_p8 }
 0xbf6   : > { %p3651_p7 = pneg %p3650_p5 }
 0xbf7   : > { %p3657_p12 = por %p3656_p3, %p3655_p10 }
 0xbf9   : > { %p3658_p2 = pnand %p3657_p12, %p3651_p7 }
 0xbfb   : > { %3661 = shalt.err (!%p3658_p2)
}
 0xbfc   : > { %s3794_s21 = smov 128   ;;  %s3795_s1 = smov 8  }
 0xbfd   : > { %3027 = dma.vmem_to_hbm [thread:$0]  (%p4915_p0), %s4668_s11, 256, %s4666_s9, %s4676_s7, %s3794_s21, %s3794_s21, %s3795_s1  }
 0xbfe PF: > { %s4916_s2 = sld [smem:[#allocation33_spill]]  ;;  %s4917_s14 = sld [smem:[#allocation24_spill]] }
 0xbff   : > { %s4918_s20 = sld [smem:[#allocation37_spill]] }
 0xc04   : > { %p3080_p13 = scmp.ge.s32.totalorder %s4916_s2, 2  ;;  %s2419_s0 = sand.u32 1, %s4917_s14  }
 0xc05   : > { %p4919_p9 = scmp.ne.s32.totalorder %s4918_s20, 0  ;;  %s2420_s4 = scalar_lea.sflag [#allocation4], %s2419_s0 }
 0xc07   : > { %p3068_p1 = pnand %p3080_p13, %p4919_p9 }
 0xc09   : > { %3723 = dma.done.wait (!%p3068_p1), %s2420_s4, 256  }
 0xc0a   : > { %3725 = vsyncadd (!%p3068_p1), %s2420_s4, 4294967040  ;;  %s37_s5 = sadd.s32 1, %s4916_s2   ;;  %s4920_s2 = sld [smem:[#allocation25_spill]] }
 0xc0b   : > { %p34_p6 = scmp.ge.s32.totalorder %s37_s5, 6   ;;  %s4921_s25 = sld [smem:[#allocation26_spill]] }
 0xc0c   : > { %s4922_s26 = sld [smem:[#allocation41_spill]]  ;;  %s4923_s27 = sld [smem:[#allocation27_spill]] }
 0xc0d   : > { %s4924_s3 = sld [smem:[#allocation28_spill]]  ;;  %s4925_s28 = sld [smem:[#allocation40_spill]] }
 0xc0e   : > { %s4926_s29 = sld [smem:[#allocation31_spill]]  ;;  %s4927_s0 = sld [smem:[#allocation32_spill]] }
 0xc0f   : > { %s4928_s4 = sld [smem:[#allocation38_spill]]  ;;  %s4929_s30 = sld [smem:[#allocation39_spill]] }
 0xc10   :  { %36 = sbr.rel (!%p34_p6) target bundleno = 33 (0x21), region = 272 }
 0xc17   :  { %2425 = vsyncpa [#allocation3], 1 }
 0xc18   :  { %2427 = vsyncpa [#allocation3 + $0x1], 1 }
 0xc19   :  { %2428 = vsyncpa [#allocation6], 1 }
 0xc1a   :  { %2429 = vsyncpa [#allocation9], 1 }
 0xc1b   :  { %2430 = vsyncpa [#allocation4], 1 }
 0xc1c   :  { %2432 = vsyncpa [#allocation4 + $0x1], 1 }

</bundles_post_ra>
